<compile_context>
chip_gen: v5e
topology: v5e:2x2
jax: 0.10.0
libtpu: 0.0.40
codegen_flags: <defaults>
</compile_context>

<pallas_src>
import functools

import jax
import jax.numpy as jnp
from jax.experimental import pallas as pl
from jax.experimental.pallas import tpu as pltpu

H1, H2, H3 = 1000, 500, 100
NCOLS = 18                      # col1_train .. col18_train
# lane-aligned padded sizes
H1P, H2P, H3P = 1024, 512, 128
NCOLS_P = 128
OUT_P = 128


def _round_up(x, m):
    return ((x + m - 1) // m) * m


# --------------------------------------------------------------------------
# Kernel: one batch tile per grid step; all weights VMEM-resident.
# --------------------------------------------------------------------------
def _survnet_kernel(x_ref, cols_ref,
                    w1_ref, b1_ref,
                    w2a_ref, w2b_ref, b2_ref,
                    w3_ref, b3_ref,
                    w4_ref, b4_ref,
                    out_ref):
    # fc1 -> relu   (BN1 is folded into w2a / b2)
    h1 = jnp.dot(x_ref[...], w1_ref[...],
                 preferred_element_type=jnp.float32) + b1_ref[...]
    h1 = jnp.maximum(h1, 0.0)                                    # (TN, 1024)

    # fc2 over cat([BN1(h1), cols]) as a split matmul (BN1 folded in)
    h2 = (jnp.dot(h1.astype(jnp.bfloat16), w2a_ref[...],
                  preferred_element_type=jnp.float32)
          + jnp.dot(cols_ref[...], w2b_ref[...],
                    preferred_element_type=jnp.float32)
          + b2_ref[...])
    h2 = jnp.maximum(h2, 0.0)                                    # (TN, 512)

    # fc3 -> relu   (BN2 folded in)
    h3 = jnp.dot(h2.astype(jnp.bfloat16), w3_ref[...],
                 preferred_element_type=jnp.float32) + b3_ref[...]
    h3 = jnp.maximum(h3, 0.0)                                    # (TN, 128)

    # fc4 (logits over durations; BN3 folded in)
    out_ref[...] = (jnp.dot(h3.astype(jnp.bfloat16), w4_ref[...],
                            preferred_element_type=jnp.float32)
                    + b4_ref[...])                               # (TN, 128)


# --------------------------------------------------------------------------
# Wrapper
# --------------------------------------------------------------------------
@functools.partial(jax.jit, static_argnames=("out_features", "tile_n"))
def survnet_2_8_forward(imfeat, cols, prep, *, out_features, tile_n=256):
    """imfeat: (N, in_features) f32; cols: (N, 18) f32 (col1..col18 stacked)."""
    n, f = imfeat.shape
    f_pad = _round_up(f, 128)
    assert prep["w1"].shape[0] == f_pad, "params prepared for a different in_features"

    n8 = _round_up(n, 8)
    if n8 <= tile_n:
        tn, n_pad = n8, n8
    else:
        tn, n_pad = tile_n, _round_up(n, tile_n)

    # pad inputs to lane/sublane-aligned shapes; cast matmul inputs to bf16
    x = jnp.zeros((n_pad, f_pad), jnp.bfloat16)
    x = x.at[:n, :f].set(imfeat.astype(jnp.bfloat16))
    c = jnp.zeros((n_pad, NCOLS_P), jnp.bfloat16)
    c = c.at[:n, :NCOLS].set(cols.astype(jnp.bfloat16))

    def tiled(shape):                      # batch-tiled arrays
        return pl.BlockSpec(shape, lambda i: (i, 0))

    def resident(shape):                   # weights / biases: same block every step
        return pl.BlockSpec(shape, lambda i: (0, 0))

    in_specs = [
        tiled((tn, f_pad)),
        tiled((tn, NCOLS_P)),
        resident(prep["w1"].shape), resident(prep["b1"].shape),
        resident(prep["w2a"].shape), resident(prep["w2b"].shape),
        resident(prep["b2"].shape),
        resident(prep["w3"].shape), resident(prep["b3"].shape),
        resident(prep["w4"].shape), resident(prep["b4"].shape),
    ]

    out = pl.pallas_call(
        _survnet_kernel,
        out_shape=jax.ShapeDtypeStruct((n_pad, OUT_P), jnp.float32),
        grid_spec=pltpu.PrefetchScalarGridSpec(
            num_scalar_prefetch=0,
            grid=(n_pad // tn,),
            in_specs=in_specs,
            out_specs=tiled((tn, OUT_P)),
        ),
        compiler_params=pltpu.CompilerParams(
            dimension_semantics=("parallel",)),
    )(x, c,
      prep["w1"], prep["b1"],
      prep["w2a"], prep["w2b"], prep["b2"],
      prep["w3"], prep["b3"],
      prep["w4"], prep["b4"])

    return out[:n, :out_features]


# --------------------------------------------------------------------------
# Parameter construction (torch-like shapes), BN folding, padding, bf16 cast
# --------------------------------------------------------------------------
def init_raw_params(key, in_features, out_features):
    """Raw f32 params mirroring torch.nn.Linear / BatchNorm1d (eval mode)."""
    ks = jax.random.split(key, 11)
    eps = 1e-5

    def linear(kw, kb, fi, fo):
        bound = 1.0 / jnp.sqrt(jnp.float32(fi))
        w = jax.random.uniform(kw, (fi, fo), jnp.float32, -bound, bound)
        b = jax.random.uniform(kb, (1, fo), jnp.float32, -bound, bound)
        return w, b

    def bn(k, dim):
        kg, kb, km, kv = jax.random.split(k, 4)
        gamma = 1.0 + 0.1 * jax.random.normal(kg, (1, dim), jnp.float32)
        beta = 0.1 * jax.random.normal(kb, (1, dim), jnp.float32)
        rmean = 0.1 * jax.random.normal(km, (1, dim), jnp.float32)
        rvar = 1.0 + 0.1 * jax.random.uniform(kv, (1, dim), jnp.float32)
        scale = gamma / jnp.sqrt(rvar + eps)
        shift = beta - rmean * scale
        return scale, shift

    w1, b1 = linear(ks[0], ks[1], in_features, H1)
    w2, b2 = linear(ks[2], ks[3], H1 + NCOLS, H2)
    w3, b3 = linear(ks[4], ks[5], H2, H3)
    w4, b4 = linear(ks[6], ks[7], H3, out_features)
    s1, t1 = bn(ks[8], H1)
    s2, t2 = bn(ks[9], H2)
    s3, t3 = bn(ks[10], H3)
    return {"w1": w1, "b1": b1, "w2": w2, "b2": b2, "w3": w3, "b3": b3,
            "w4": w4, "b4": b4, "s1": s1, "t1": t1, "s2": s2, "t2": t2,
            "s3": s3, "t3": t3}


def _pad2(a, rows, cols):
    out = jnp.zeros((rows, cols), a.dtype)
    return out.at[:a.shape[0], :a.shape[1]].set(a)


def prepare_params(raw, in_features):
    """Fold BN affines into the next layer, pad to 128-multiples, cast to bf16."""
    f_pad = _round_up(in_features, 128)

    # BN1 folded into fc2 (only the first H1 rows of w2 see BN1's output)
    w2a = raw["w2"][:H1, :] * raw["s1"].T                    # (1000, 500)
    w2b = raw["w2"][H1:, :]                                  # (18, 500)
    b2 = raw["b2"] + raw["t1"] @ raw["w2"][:H1, :]
    # BN2 folded into fc3
    w3 = raw["w3"] * raw["s2"].T
    b3 = raw["b3"] + raw["t2"] @ raw["w3"]
    # BN3 folded into fc4
    w4 = raw["w4"] * raw["s3"].T
    b4 = raw["b4"] + raw["t3"] @ raw["w4"]

    return {
        "w1": _pad2(raw["w1"], f_pad, H1P).astype(jnp.bfloat16),
        "b1": _pad2(raw["b1"], 1, H1P),                       # f32
        "w2a": _pad2(w2a, H1P, H2P).astype(jnp.bfloat16),
        "w2b": _pad2(w2b, NCOLS_P, H2P).astype(jnp.bfloat16),
        "b2": _pad2(b2, 1, H2P),
        "w3": _pad2(w3, H2P, H3P).astype(jnp.bfloat16),
        "b3": _pad2(b3, 1, H3P),
        "w4": _pad2(w4, H3P, OUT_P).astype(jnp.bfloat16),
        "b4": _pad2(b4, 1, OUT_P),
    }


def reference_forward(imfeat, cols, raw):
    """Unfused f32 reference with the original module structure (eval mode)."""
    h1 = jnp.maximum(imfeat @ raw["w1"] + raw["b1"], 0.0)
    h1 = h1 * raw["s1"] + raw["t1"]                           # BN1
    merged = jnp.concatenate([h1, cols], axis=1)
    h2 = jnp.maximum(merged @ raw["w2"] + raw["b2"], 0.0)
    h2 = h2 * raw["s2"] + raw["t2"]                           # BN2
    h3 = jnp.maximum(h2 @ raw["w3"] + raw["b3"], 0.0)
    h3 = h3 * raw["s3"] + raw["t3"]                           # BN3
    return h3 @ raw["w4"] + raw["b4"]


if __name__ == "__main__":
    in_features = 244        # 244-dim radiomics feature vector (CSV spec)
    out_features = 15        # num_durations = 15 -> LogisticHazard out_features
    batch = 8

    key = jax.random.PRNGKey(0)
    k_x, k_c, k_p = jax.random.split(key, 3)

    imfeat = jax.random.normal(k_x, (batch, in_features), jnp.float32)
    # col1_train .. col18_train, each (N, 1) as in the torch forward signature.
    col_keys = jax.random.split(k_c, NCOLS)
    col_list = [jax.random.normal(k, (batch, 1), jnp.float32) for k in col_keys]
    cols = jnp.concatenate(col_list, axis=1)                  # (N, 18)

    raw = init_raw_params(k_p, in_features, out_features)
    prep = prepare_params(raw, in_features)

    out = survnet_2_8_forward(imfeat, cols, prep, out_features=out_features)
    out = jax.block_until_ready(out)

    ref = reference_forward(imfeat, cols, raw)
    assert out.shape == (batch, out_features)
    # bf16 weights/activations with f32 accumulation vs pure-f32 reference
    assert jnp.allclose(out, ref, atol=3e-2, rtol=3e-2), "mismatch vs reference"

    print("KERNEL_OK")
</pallas_src>

<mosaic_0001>
module attributes {stable_mosaic.version = 11 : i64} {
  func.func @_survnet_kernel(%arg0: i32, %arg1: memref<8x256xbf16, #tpu.memory_space<vmem>>, %arg2: memref<8x128xbf16, #tpu.memory_space<vmem>>, %arg3: memref<256x1024xbf16, #tpu.memory_space<vmem>>, %arg4: memref<1x1024xf32, #tpu.memory_space<vmem>>, %arg5: memref<1024x512xbf16, #tpu.memory_space<vmem>>, %arg6: memref<128x512xbf16, #tpu.memory_space<vmem>>, %arg7: memref<1x512xf32, #tpu.memory_space<vmem>>, %arg8: memref<512x128xbf16, #tpu.memory_space<vmem>>, %arg9: memref<1x128xf32, #tpu.memory_space<vmem>>, %arg10: memref<128x128xbf16, #tpu.memory_space<vmem>>, %arg11: memref<1x128xf32, #tpu.memory_space<vmem>>, %arg12: memref<8x128xf32, #tpu.memory_space<vmem>>) attributes {dimension_semantics = [#tpu.dimension_semantics<parallel>], iteration_bounds = array<i64: 1>, scalar_prefetch = 0 : i64, scratch_operands = 0 : i64, tpu.core_type = #tpu.core_type<tc>, window_params = [{transform_indices = @transform_0, window_bounds = array<i64: 8, 256>}, {transform_indices = @transform_1, window_bounds = array<i64: 8, 128>}, {pipeline_mode = #tpu.pipeline_mode<synchronous>, transform_indices = @transform_2, window_bounds = array<i64: 256, 1024>}, {pipeline_mode = #tpu.pipeline_mode<synchronous>, transform_indices = @transform_3, window_bounds = array<i64: 1, 1024>}, {pipeline_mode = #tpu.pipeline_mode<synchronous>, transform_indices = @transform_4, window_bounds = array<i64: 1024, 512>}, {pipeline_mode = #tpu.pipeline_mode<synchronous>, transform_indices = @transform_5, window_bounds = array<i64: 128, 512>}, {pipeline_mode = #tpu.pipeline_mode<synchronous>, transform_indices = @transform_6, window_bounds = array<i64: 1, 512>}, {pipeline_mode = #tpu.pipeline_mode<synchronous>, transform_indices = @transform_7, window_bounds = array<i64: 512, 128>}, {pipeline_mode = #tpu.pipeline_mode<synchronous>, transform_indices = @transform_8, window_bounds = array<i64: 1, 128>}, {pipeline_mode = #tpu.pipeline_mode<synchronous>, transform_indices = @transform_9, window_bounds = array<i64: 128, 128>}, {pipeline_mode = #tpu.pipeline_mode<synchronous>, transform_indices = @transform_10, window_bounds = array<i64: 1, 128>}, {transform_indices = @transform_11, window_bounds = array<i64: 8, 128>}]} {
    %c0 = arith.constant 0 : index
    %c0_0 = arith.constant 0 : index
    %0 = vector.load %arg1[%c0, %c0_0] : memref<8x256xbf16, #tpu.memory_space<vmem>>, vector<8x256xbf16>
    %c0_1 = arith.constant 0 : index
    %c0_2 = arith.constant 0 : index
    %1 = vector.load %arg3[%c0_1, %c0_2] : memref<256x1024xbf16, #tpu.memory_space<vmem>>, vector<256x1024xbf16>
    %cst = arith.constant dense<0.000000e+00> : vector<8x1024xf32>
    %2 = tpu.matmul %0, %1, %cst {dimension_numbers = #tpu.dot_dimension_numbers<[1], [0], [0], [1], [0, 0, 1, 1], [], []>} : vector<8x256xbf16>, vector<256x1024xbf16>, vector<8x1024xf32> -> vector<8x1024xf32>
    %c0_3 = arith.constant 0 : index
    %c0_4 = arith.constant 0 : index
    %3 = vector.load %arg4[%c0_3, %c0_4] : memref<1x1024xf32, #tpu.memory_space<vmem>>, vector<1x1024xf32>
    %4 = vector.broadcast %3 : vector<1x1024xf32> to vector<8x1024xf32>
    %5 = arith.addf %2, %4 : vector<8x1024xf32>
    %cst_5 = arith.constant 0.000000e+00 : f32
    %6 = vector.broadcast %cst_5 : f32 to vector<8x1024xf32>
    %7 = arith.maximumf %5, %6 : vector<8x1024xf32>
    %8 = arith.truncf %7 : vector<8x1024xf32> to vector<8x1024xbf16>
    %c0_6 = arith.constant 0 : index
    %c0_7 = arith.constant 0 : index
    %9 = vector.load %arg5[%c0_6, %c0_7] : memref<1024x512xbf16, #tpu.memory_space<vmem>>, vector<1024x512xbf16>
    %cst_8 = arith.constant dense<0.000000e+00> : vector<8x512xf32>
    %10 = tpu.matmul %8, %9, %cst_8 {dimension_numbers = #tpu.dot_dimension_numbers<[1], [0], [0], [1], [0, 0, 1, 1], [], []>} : vector<8x1024xbf16>, vector<1024x512xbf16>, vector<8x512xf32> -> vector<8x512xf32>
    %c0_9 = arith.constant 0 : index
    %c0_10 = arith.constant 0 : index
    %11 = vector.load %arg2[%c0_9, %c0_10] : memref<8x128xbf16, #tpu.memory_space<vmem>>, vector<8x128xbf16>
    %c0_11 = arith.constant 0 : index
    %c0_12 = arith.constant 0 : index
    %12 = vector.load %arg6[%c0_11, %c0_12] : memref<128x512xbf16, #tpu.memory_space<vmem>>, vector<128x512xbf16>
    %cst_13 = arith.constant dense<0.000000e+00> : vector<8x512xf32>
    %13 = tpu.matmul %11, %12, %cst_13 {dimension_numbers = #tpu.dot_dimension_numbers<[1], [0], [0], [1], [0, 0, 1, 1], [], []>} : vector<8x128xbf16>, vector<128x512xbf16>, vector<8x512xf32> -> vector<8x512xf32>
    %14 = arith.addf %10, %13 : vector<8x512xf32>
    %c0_14 = arith.constant 0 : index
    %c0_15 = arith.constant 0 : index
    %15 = vector.load %arg7[%c0_14, %c0_15] : memref<1x512xf32, #tpu.memory_space<vmem>>, vector<1x512xf32>
    %16 = vector.broadcast %15 : vector<1x512xf32> to vector<8x512xf32>
    %17 = arith.addf %14, %16 : vector<8x512xf32>
    %cst_16 = arith.constant 0.000000e+00 : f32
    %18 = vector.broadcast %cst_16 : f32 to vector<8x512xf32>
    %19 = arith.maximumf %17, %18 : vector<8x512xf32>
    %20 = arith.truncf %19 : vector<8x512xf32> to vector<8x512xbf16>
    %c0_17 = arith.constant 0 : index
    %c0_18 = arith.constant 0 : index
    %21 = vector.load %arg8[%c0_17, %c0_18] : memref<512x128xbf16, #tpu.memory_space<vmem>>, vector<512x128xbf16>
    %cst_19 = arith.constant dense<0.000000e+00> : vector<8x128xf32>
    %22 = tpu.matmul %20, %21, %cst_19 {dimension_numbers = #tpu.dot_dimension_numbers<[1], [0], [0], [1], [0, 0, 1, 1], [], []>} : vector<8x512xbf16>, vector<512x128xbf16>, vector<8x128xf32> -> vector<8x128xf32>
    %c0_20 = arith.constant 0 : index
    %c0_21 = arith.constant 0 : index
    %23 = vector.load %arg9[%c0_20, %c0_21] : memref<1x128xf32, #tpu.memory_space<vmem>>, vector<1x128xf32>
    %24 = vector.broadcast %23 : vector<1x128xf32> to vector<8x128xf32>
    %25 = arith.addf %22, %24 : vector<8x128xf32>
    %cst_22 = arith.constant 0.000000e+00 : f32
    %26 = vector.broadcast %cst_22 : f32 to vector<8x128xf32>
    %27 = arith.maximumf %25, %26 : vector<8x128xf32>
    %28 = arith.truncf %27 : vector<8x128xf32> to vector<8x128xbf16>
    %c0_23 = arith.constant 0 : index
    %c0_24 = arith.constant 0 : index
    %29 = vector.load %arg10[%c0_23, %c0_24] : memref<128x128xbf16, #tpu.memory_space<vmem>>, vector<128x128xbf16>
    %cst_25 = arith.constant dense<0.000000e+00> : vector<8x128xf32>
    %30 = tpu.matmul %28, %29, %cst_25 {dimension_numbers = #tpu.dot_dimension_numbers<[1], [0], [0], [1], [0, 0, 1, 1], [], []>} : vector<8x128xbf16>, vector<128x128xbf16>, vector<8x128xf32> -> vector<8x128xf32>
    %c0_26 = arith.constant 0 : index
    %c0_27 = arith.constant 0 : index
    %31 = vector.load %arg11[%c0_26, %c0_27] : memref<1x128xf32, #tpu.memory_space<vmem>>, vector<1x128xf32>
    %32 = vector.broadcast %31 : vector<1x128xf32> to vector<8x128xf32>
    %33 = arith.addf %30, %32 : vector<8x128xf32>
    %c0_28 = arith.constant 0 : index
    %c0_29 = arith.constant 0 : index
    %34 = vector.load %arg12[%c0_28, %c0_29] : memref<8x128xf32, #tpu.memory_space<vmem>>, vector<8x128xf32>
    tpu.vector_store %arg12[%c0_28, %c0_29], %33 {strides = array<i32>} : memref<8x128xf32, #tpu.memory_space<vmem>>, vector<8x128xf32>,
    return
  }
  func.func @transform_0(%arg0: i32) -> (i32, i32) {
    %c0_i32 = arith.constant 0 : i32
    %c0_i32_0 = arith.constant 0 : i32
    return %arg0, %c0_i32 : i32, i32
  }
  func.func @transform_1(%arg0: i32) -> (i32, i32) {
    %c0_i32 = arith.constant 0 : i32
    %c0_i32_0 = arith.constant 0 : i32
    return %arg0, %c0_i32 : i32, i32
  }
  func.func @transform_2(%arg0: i32) -> (i32, i32) {
    %c0_i32 = arith.constant 0 : i32
    %c0_i32_0 = arith.constant 0 : i32
    %c0_i32_1 = arith.constant 0 : i32
    return %c0_i32, %c0_i32_0 : i32, i32
  }
  func.func @transform_3(%arg0: i32) -> (i32, i32) {
    %c0_i32 = arith.constant 0 : i32
    %c0_i32_0 = arith.constant 0 : i32
    %c0_i32_1 = arith.constant 0 : i32
    return %c0_i32, %c0_i32_0 : i32, i32
  }
  func.func @transform_4(%arg0: i32) -> (i32, i32) {
    %c0_i32 = arith.constant 0 : i32
    %c0_i32_0 = arith.constant 0 : i32
    %c0_i32_1 = arith.constant 0 : i32
    return %c0_i32, %c0_i32_0 : i32, i32
  }
  func.func @transform_5(%arg0: i32) -> (i32, i32) {
    %c0_i32 = arith.constant 0 : i32
    %c0_i32_0 = arith.constant 0 : i32
    %c0_i32_1 = arith.constant 0 : i32
    return %c0_i32, %c0_i32_0 : i32, i32
  }
  func.func @transform_6(%arg0: i32) -> (i32, i32) {
    %c0_i32 = arith.constant 0 : i32
    %c0_i32_0 = arith.constant 0 : i32
    %c0_i32_1 = arith.constant 0 : i32
    return %c0_i32, %c0_i32_0 : i32, i32
  }
  func.func @transform_7(%arg0: i32) -> (i32, i32) {
    %c0_i32 = arith.constant 0 : i32
    %c0_i32_0 = arith.constant 0 : i32
    %c0_i32_1 = arith.constant 0 : i32
    return %c0_i32, %c0_i32_0 : i32, i32
  }
  func.func @transform_8(%arg0: i32) -> (i32, i32) {
    %c0_i32 = arith.constant 0 : i32
    %c0_i32_0 = arith.constant 0 : i32
    %c0_i32_1 = arith.constant 0 : i32
    return %c0_i32, %c0_i32_0 : i32, i32
  }
  func.func @transform_9(%arg0: i32) -> (i32, i32) {
    %c0_i32 = arith.constant 0 : i32
    %c0_i32_0 = arith.constant 0 : i32
    %c0_i32_1 = arith.constant 0 : i32
    return %c0_i32, %c0_i32_0 : i32, i32
  }
  func.func @transform_10(%arg0: i32) -> (i32, i32) {
    %c0_i32 = arith.constant 0 : i32
    %c0_i32_0 = arith.constant 0 : i32
    %c0_i32_1 = arith.constant 0 : i32
    return %c0_i32, %c0_i32_0 : i32, i32
  }
  func.func @transform_11(%arg0: i32) -> (i32, i32) {
    %c0_i32 = arith.constant 0 : i32
    %c0_i32_0 = arith.constant 0 : i32
    return %arg0, %c0_i32 : i32, i32
  }
}

</mosaic_0001>

<bundles_post_ra>
// kernel: survnet_2_8_forward.1
= control target key start
LH: loop header
LB: loop body
LE: loop exit
PB: predicated region body
PF: predicated region fallthrough
CT: control target
= control target key end

     0   :  { %16 = vsyncpa [#allocation3], 0  ;;  %s6443_s0 = inlined_call_operand.vmem [shape: bf16[8,256], index: 0, kind: input, shape index: {}]   ;;  %s6444_s1 = inlined_call_operand.vmem [shape: bf16[8,128], index: 1, kind: input, shape index: {}]   ;;  %s6445_s2 = inlined_call_operand.hbm [shape: bf16[256,1024], index: 2, kind: input, shape index: {}]   ;;  %s6446_s3 = inlined_call_operand.vmem [shape: f32[1,1024], index: 3, kind: input, shape index: {}]   ;;  %s6447_s4 = inlined_call_operand.hbm [shape: bf16[1024,512], index: 4, kind: input, shape index: {}]   ;;  %s6448_s5 = inlined_call_operand.hbm [shape: bf16[128,512], index: 5, kind: input, shape index: {}]   ;;  %s6449_s6 = inlined_call_operand.vmem [shape: f32[1,512], index: 6, kind: input, shape index: {}]   ;;  %s6450_s7 = inlined_call_operand.hbm [shape: bf16[512,128], index: 7, kind: input, shape index: {}]   ;;  %s6451_s8 = inlined_call_operand.vmem [shape: f32[1,128], index: 8, kind: input, shape index: {}]   ;;  %s6452_s9 = inlined_call_operand.hbm [shape: bf16[128,128], index: 9, kind: input, shape index: {}]   ;;  %s6453_s10 = inlined_call_operand.vmem [shape: f32[1,128], index: 10, kind: input, shape index: {}]   ;;  %s6454_s11 = inlined_call_operand.hbm [shape: f32[8,128], index: 11, kind: output, shape index: {}]  }
   0x1   :  { %17 = vsyncpa [#allocation6], 0 }
   0x2   :  { %18 = vsyncpa [#allocation9], 0  ;;  %s43_s19 = sshll.u32 %s6447_s4, 4  ;;  %s44_s19 = int_to_ptr.hbm [resolvable:$true] %s43_s19 }
   0x3   :  { %19 = vsyncpa [#allocation4], 0  ;;  %s6215_s20 = smov [#allocation5]   ;;  %s71_s24 = sshll.u32 %s6450_s7, 4  ;;  %s72_s24 = int_to_ptr.hbm [resolvable:$true] %s71_s24 }
   0x4   :  { %s45_s21 = sshll.u32 %s6215_s20, 4  ;;  %s6216_s25 = smov 256   ;;  %s46_s21 = int_to_ptr.vmem [resolvable:$true] %s45_s21 }
   0x5   :  { %s6217_s26 = smov 16   ;;  %s6218_s27 = smov [#allocation8]  }
   0x6   :  { %51 = dma.hbm_to_vmem [thread:$0]  %s44_s19, 32768, %s46_s21, [#allocation6], %s6216_s25, %s6216_s25, %s6217_s26  }
   0x7   :  { %s73_s28 = sshll.u32 %s6218_s27, 4  ;;  %s6219_s29 = smov 64   ;;  %s74_s28 = int_to_ptr.vmem [resolvable:$true] %s73_s28 }
   0x8   :  { %s6220_s30 = smov 4   ;;  %s28_s13 = sshll.u32 %s6445_s2, 4  ;;  %s29_s13 = int_to_ptr.hbm [resolvable:$true] %s28_s13 }
   0x9   :  { %79 = dma.hbm_to_vmem [thread:$0]  %s72_s24, 4096, %s74_s28, [#allocation9], %s6219_s29, %s6219_s29, %s6220_s30  }
   0xa   :  { %s6221_s14 = smov [#allocation2]   ;;  %s56_s17 = sshll.u32 %s6448_s5, 4  ;;  %s57_s17 = int_to_ptr.hbm [resolvable:$true] %s56_s17 }
   0xb   :  { %s30_s15 = sshll.u32 %s6221_s14, 4  ;;  %s6222_s18 = smov 512   ;;  %s31_s15 = int_to_ptr.vmem [resolvable:$true] %s30_s15 }
   0xc   :  { %s6223_s19 = smov 32   ;;  %s6224_s20 = smov [#allocation7]  }
   0xd   :  { %36 = dma.hbm_to_vmem [thread:$0]  %s29_s13, 16384, %s31_s15, [#allocation3], %s6222_s18, %s6222_s18, %s6223_s19  }
   0xe   :  { %s58_s21 = sshll.u32 %s6224_s20, 4  ;;  %s86_s24 = sshll.u32 %s6452_s9, 4  ;;  %s59_s21 = int_to_ptr.vmem [resolvable:$true] %s58_s21  ;;  %s87_s24 = int_to_ptr.hbm [resolvable:$true] %s86_s24 }
   0xf   :  { %64 = dma.hbm_to_vmem [thread:$0]  %s57_s17, 4096, %s59_s21, [#allocation6], %s6216_s25, %s6216_s25, %s6217_s26  }
  0x10   :  { %s6225_s2 = smov [#allocation10]  }
  0x11   :  { %s88_s27 = sshll.u32 %s6225_s2, 4  ;;  %s89_s27 = int_to_ptr.vmem [resolvable:$true] %s88_s27 }
  0x12   :  { %94 = dma.hbm_to_vmem [thread:$0]  %s87_s24, 1024, %s89_s27, [#allocation9], %s6219_s29, %s6219_s29, %s6220_s30  }
  0x13   :  { %6207 = dma.done.wait [#allocation3], 16384  }
  0x14   :  { %6208 = vsyncadd [#allocation3], 4294950912 }
  0x15   :  { %6209 = dma.done.wait [#allocation6], 36864  }
  0x16   :  { %6210 = vsyncadd [#allocation6], 4294930432 }
  0x17   :  { %6211 = dma.done.wait [#allocation9], 5120  }
  0x18   :  { %6212 = vsyncadd [#allocation9], 4294962176  ;;  %v3995_v0 = vld [vmem:[#allocation2 + $0x1c0] sm:$0xf]  ;;  %v5649_v5 = vld [vmem:[#allocation2 + $0x1c4] sm:$0xf] }
  0x19   :  { %v5653_v1 = vld [vmem:[#allocation2 + $0x1dc] sm:$0xf0]  ;;  %v3997_v6 = vld [vmem:[#allocation2 + $0x1e0] sm:$0xf0]  ;;  %s6226_s4 = smov [#allocation11]   ;;  %s3757_s15 = sshll.u32 %s6454_s11, 4  ;;  %s3758_s15 = int_to_ptr.hbm [resolvable:$true] %s3757_s15 }
  0x1a   :  { %v4251_v2 = vld [vmem:[#allocation2 + $0x3c0] sm:$0xf]  ;;  %v3996_v3 = vor.u32 %v5653_v1, %v3995_v0  ;;  %v4000_v8 = vor.u32 %v5649_v5, %v3997_v6  ;;  %v5713_v9 = vld [vmem:[#allocation2 + $0x3c4] sm:$0xf]  ;;  %s3755_s12 = sshll.u32 %s6226_s4, 4  ;;  %s3756_s12 = int_to_ptr.vmem [resolvable:$true] %s3755_s12 }
  0x1b   :  { %v5717_v4 = vld [vmem:[#allocation2 + $0x3dc] sm:$0xf0]  ;;  %v4253_v10 = vld [vmem:[#allocation2 + $0x3e0] sm:$0xf0] }
  0x1c   :  { %v4252_v7 = vor.u32 %v5717_v4, %v4251_v2  ;;  %v3963_v11 = vld [vmem:[#allocation2 + $0x180] sm:$0xf]  ;;  %911 = vmatpush.bf16.msra.mxu0 %v3996_v3  ;;  %v4256_v12 = vor.u32 %v5713_v9, %v4253_v10  ;;  %937 = vmatpush.bf16.msra.mxu2 %v4000_v8  ;;  %v5641_v18 = vld [vmem:[#allocation2 + $0x184] sm:$0xf] }
  0x1d   :  { %v5645_v13 = vld [vmem:[#allocation2 + $0x19c] sm:$0xf0]  ;;  %v3965_v19 = vld [vmem:[#allocation2 + $0x1a0] sm:$0xf0] }
  0x1e   :  { %v4219_v14 = vld [vmem:[#allocation2 + $0x380] sm:$0xf]  ;;  %924 = vmatpush.bf16.msra.mxu1 %v4252_v7  ;;  %v3964_v16 = vor.u32 %v5645_v13, %v3963_v11  ;;  %v5705_v20 = vld [vmem:[#allocation2 + $0x384] sm:$0xf]  ;;  %950 = vmatpush.bf16.msra.mxu3 %v4256_v12  ;;  %v3968_v21 = vor.u32 %v5641_v18, %v3965_v19 }
  0x1f   :  { %v5709_v15 = vld [vmem:[#allocation2 + $0x39c] sm:$0xf0]  ;;  %v4221_v22 = vld [vmem:[#allocation2 + $0x3a0] sm:$0xf0] }
  0x20   :  { %v4220_v17 = vor.u32 %v5709_v15, %v4219_v14  ;;  %v3931_v23 = vld [vmem:[#allocation2 + $0x140] sm:$0xf]  ;;  %v4224_v25 = vor.u32 %v5705_v20, %v4221_v22  ;;  %v5633_v28 = vld [vmem:[#allocation2 + $0x144] sm:$0xf]  ;;  %912 = vmatpush.bf16.msra.mxu0 %v3964_v16  ;;  %938 = vmatpush.bf16.msra.mxu2 %v3968_v21 }
  0x21   :  { %v5637_v24 = vld [vmem:[#allocation2 + $0x15c] sm:$0xf0]  ;;  %v3933_v30 = vld [vmem:[#allocation2 + $0x160] sm:$0xf0] }
  0x22   :  { %v4187_v26 = vld [vmem:[#allocation2 + $0x340] sm:$0xf]  ;;  %v3932_v29 = vor.u32 %v5637_v24, %v3931_v23  ;;  %v5697_v31 = vld [vmem:[#allocation2 + $0x344] sm:$0xf]  ;;  %925 = vmatpush.bf16.msra.mxu1 %v4220_v17  ;;  %v3936_v34 = vor.u32 %v5633_v28, %v3933_v30  ;;  %951 = vmatpush.bf16.msra.mxu3 %v4224_v25  ;;  %v4003_v28 = vld [vmem:[#allocation2 + $0x1c8] sm:$0xf] }
  0x23   :  { %v5701_v27 = vld [vmem:[#allocation2 + $0x35c] sm:$0xf0]  ;;  %v4189_v32 = vld [vmem:[#allocation2 + $0x360] sm:$0xf0]  ;;  %v4259_v30 = vld [vmem:[#allocation2 + $0x3c8] sm:$0xf] }
  0x24   :  { %v4188_v33 = vor.u32 %v5701_v27, %v4187_v26  ;;  %v3899_v35 = vld [vmem:[#allocation2 + $0x100] sm:$0xf]  ;;  %v4192_v38 = vor.u32 %v5697_v31, %v4189_v32  ;;  %v5625_v40 = vld [vmem:[#allocation2 + $0x104] sm:$0xf]  ;;  %913 = vmatpush.bf16.msra.mxu0 %v3932_v29  ;;  %939 = vmatpush.bf16.msra.mxu2 %v3936_v34  ;;  %v5654_v29 = vld [vmem:[#allocation2 + $0x1e4] sm:$0xf0] }
  0x25   :  { %v5629_v36 = vld [vmem:[#allocation2 + $0x11c] sm:$0xf0]  ;;  %v3901_v41 = vld [vmem:[#allocation2 + $0x120] sm:$0xf0]  ;;  %v5718_v32 = vld [vmem:[#allocation2 + $0x3e4] sm:$0xf0] }
  0x26   :  { %v4155_v37 = vld [vmem:[#allocation2 + $0x300] sm:$0xf]  ;;  %v5689_v42 = vld [vmem:[#allocation2 + $0x304] sm:$0xf]  ;;  %v3900_v44 = vor.u32 %v5629_v36, %v3899_v35  ;;  %926 = vmatpush.bf16.msra.mxu1 %v4188_v33  ;;  %v3904_v46 = vor.u32 %v5625_v40, %v3901_v41  ;;  %952 = vmatpush.bf16.msra.mxu3 %v4192_v38  ;;  %v5650_v33 = vld [vmem:[#allocation2 + $0x1cc] sm:$0xf]  ;;  %v4004_v40 = vor.u32 %v5654_v29, %v4003_v28 }
  0x27   :  { %v5693_v39 = vld [vmem:[#allocation2 + $0x31c] sm:$0xf0]  ;;  %v4157_v43 = vld [vmem:[#allocation2 + $0x320] sm:$0xf0]  ;;  %v4005_v34 = vld [vmem:[#allocation2 + $0x1e8] sm:$0xf0]  ;;  %v4260_v41 = vor.u32 %v5718_v32, %v4259_v30 }
  0x28   :  { %v4156_v45 = vor.u32 %v5693_v39, %v4155_v37  ;;  %v3867_v47 = vld [vmem:[#allocation2 + $0xc0] sm:$0xf]  ;;  %v4160_v50 = vor.u32 %v5689_v42, %v4157_v43  ;;  %v5617_v52 = vld [vmem:[#allocation2 + $0xc4] sm:$0xf]  ;;  %914 = vmatpush.bf16.msra.mxu0 %v3900_v44  ;;  %940 = vmatpush.bf16.msra.mxu2 %v3904_v46  ;;  %v5714_v37 = vld [vmem:[#allocation2 + $0x3cc] sm:$0xf]  ;;  %v4008_v42 = vor.u32 %v5650_v33, %v4005_v34 }
  0x29   :  { %v5621_v48 = vld [vmem:[#allocation2 + $0xdc] sm:$0xf0]  ;;  %v3869_v53 = vld [vmem:[#allocation2 + $0xe0] sm:$0xf0]  ;;  %v4261_v38 = vld [vmem:[#allocation2 + $0x3e8] sm:$0xf0] }
  0x2a   :  { %v4123_v49 = vld [vmem:[#allocation2 + $0x2c0] sm:$0xf]  ;;  %v5681_v54 = vld [vmem:[#allocation2 + $0x2c4] sm:$0xf]  ;;  %v3868_v56 = vor.u32 %v5621_v48, %v3867_v47  ;;  %927 = vmatpush.bf16.msra.mxu1 %v4156_v45  ;;  %v3872_v58 = vor.u32 %v5617_v52, %v3869_v53  ;;  %953 = vmatpush.bf16.msra.mxu3 %v4160_v50  ;;  %v3971_v43 = vld [vmem:[#allocation2 + $0x188] sm:$0xf]  ;;  %v4264_v46 = vor.u32 %v5714_v37, %v4261_v38 }
  0x2b   :  { %v5685_v51 = vld [vmem:[#allocation2 + $0x2dc] sm:$0xf0]  ;;  %v4125_v55 = vld [vmem:[#allocation2 + $0x2e0] sm:$0xf0]  ;;  %v5646_v44 = vld [vmem:[#allocation2 + $0x1a4] sm:$0xf0] }
  0x2c   :  { %v4124_v57 = vor.u32 %v5685_v51, %v4123_v49  ;;  %v3835_v59 = vld [vmem:[#allocation2 + $0x80] sm:$0xf]  ;;  %v4128_v62 = vor.u32 %v5681_v54, %v4125_v55  ;;  %v5609_v0 = vld [vmem:[#allocation2 + $0x84] sm:$0xf]  ;;  %915 = vmatpush.bf16.msra.mxu0 %v3868_v56  ;;  %941 = vmatpush.bf16.msra.mxu2 %v3872_v58  ;;  %v4227_v45 = vld [vmem:[#allocation2 + $0x388] sm:$0xf]  ;;  %v3972_v53 = vor.u32 %v5646_v44, %v3971_v43 }
  0x2d   :  { %v5613_v60 = vld [vmem:[#allocation2 + $0x9c] sm:$0xf0]  ;;  %v3837_v1 = vld [vmem:[#allocation2 + $0xa0] sm:$0xf0]  ;;  %v5710_v47 = vld [vmem:[#allocation2 + $0x3a4] sm:$0xf0] }
  0x2e   :  { %v4091_v61 = vld [vmem:[#allocation2 + $0x280] sm:$0xf]  ;;  %v5673_v2 = vld [vmem:[#allocation2 + $0x284] sm:$0xf]  ;;  %v3836_v4 = vor.u32 %v5613_v60, %v3835_v59  ;;  %928 = vmatpush.bf16.msra.mxu1 %v4124_v57  ;;  %v3840_v6 = vor.u32 %v5609_v0, %v3837_v1  ;;  %954 = vmatpush.bf16.msra.mxu3 %v4128_v62  ;;  %v5642_v48 = vld [vmem:[#allocation2 + $0x18c] sm:$0xf]  ;;  %v4228_v56 = vor.u32 %v5710_v47, %v4227_v45 }
  0x2f   :  { %v5677_v63 = vld [vmem:[#allocation2 + $0x29c] sm:$0xf0]  ;;  %v4093_v3 = vld [vmem:[#allocation2 + $0x2a0] sm:$0xf0]  ;;  %v3973_v49 = vld [vmem:[#allocation2 + $0x1a8] sm:$0xf0] }
  0x30   :  { %v4092_v5 = vor.u32 %v5677_v63, %v4091_v61  ;;  %v3803_v7 = vld [vmem:[#allocation2 + $0x40] sm:$0xf]  ;;  %v4096_v10 = vor.u32 %v5673_v2, %v4093_v3  ;;  %v5601_v12 = vld [vmem:[#allocation2 + $0x44] sm:$0xf]  ;;  %916 = vmatpush.bf16.msra.mxu0 %v3836_v4  ;;  %942 = vmatpush.bf16.msra.mxu2 %v3840_v6  ;;  %v5706_v50 = vld [vmem:[#allocation2 + $0x38c] sm:$0xf]  ;;  %v3976_v57 = vor.u32 %v5642_v48, %v3973_v49 }
  0x31   :  { %v5605_v8 = vld [vmem:[#allocation2 + $0x5c] sm:$0xf0]  ;;  %v3805_v13 = vld [vmem:[#allocation2 + $0x60] sm:$0xf0]  ;;  %v4229_v51 = vld [vmem:[#allocation2 + $0x3a8] sm:$0xf0] }
  0x32   :  { %v4059_v9 = vld [vmem:[#allocation2 + $0x240] sm:$0xf]  ;;  %v5665_v14 = vld [vmem:[#allocation2 + $0x244] sm:$0xf]  ;;  %v3804_v16 = vor.u32 %v5605_v8, %v3803_v7  ;;  %929 = vmatpush.bf16.msra.mxu1 %v4092_v5  ;;  %v3808_v20 = vor.u32 %v5601_v12, %v3805_v13  ;;  %955 = vmatpush.bf16.msra.mxu3 %v4096_v10  ;;  %v3939_v58 = vld [vmem:[#allocation2 + $0x148] sm:$0xf]  ;;  %v4232_v61 = vor.u32 %v5706_v50, %v4229_v51 }
  0x33   :  { %v5669_v11 = vld [vmem:[#allocation2 + $0x25c] sm:$0xf0]  ;;  %v4061_v15 = vld [vmem:[#allocation2 + $0x260] sm:$0xf0]  ;;  %v5638_v59 = vld [vmem:[#allocation2 + $0x164] sm:$0xf0] }
  0x34   :  { %v3771_v17 = vld [vmem:[#allocation2] sm:$0xf]  ;;  %v4060_v19 = vor.u32 %v5669_v11, %v4059_v9  ;;  %v5593_v23 = vld [vmem:[#allocation2 + $0x4] sm:$0xf]  ;;  %v4064_v24 = vor.u32 %v5665_v14, %v4061_v15  ;;  %917 = vmatpush.bf16.msra.mxu0 %v3804_v16  ;;  %943 = vmatpush.bf16.msra.mxu2 %v3808_v20  ;;  %v4195_v60 = vld [vmem:[#allocation2 + $0x348] sm:$0xf]  ;;  %v3940_v5 = vor.u32 %v5638_v59, %v3939_v58 }
  0x35   :  { %v5597_v18 = vld [vmem:[#allocation2 + $0x1c] sm:$0xf0]  ;;  %v3773_v25 = vld [vmem:[#allocation2 + $0x20] sm:$0xf0]  ;;  %v5702_v62 = vld [vmem:[#allocation2 + $0x364] sm:$0xf0] }
  0x36   :  { %v4027_v21 = vld [vmem:[#allocation2 + $0x200] sm:$0xf]  ;;  %v5657_v26 = vld [vmem:[#allocation2 + $0x204] sm:$0xf]  ;;  %v3772_v31 = vor.u32 %v5597_v18, %v3771_v17  ;;  %930 = vmatpush.bf16.msra.mxu1 %v4060_v19  ;;  %v3776_v36 = vor.u32 %v5593_v23, %v3773_v25  ;;  %956 = vmatpush.bf16.msra.mxu3 %v4064_v24  ;;  %v5634_v63 = vld [vmem:[#allocation2 + $0x14c] sm:$0xf]  ;;  %v4196_v6 = vor.u32 %v5702_v62, %v4195_v60 }
  0x37   :  { %v5661_v22 = vld [vmem:[#allocation2 + $0x21c] sm:$0xf0]  ;;  %v4029_v27 = vld [vmem:[#allocation2 + $0x220] sm:$0xf0]  ;;  %v3941_v0 = vld [vmem:[#allocation2 + $0x168] sm:$0xf0] }
  0x38   :  { %v4028_v35 = vor.u32 %v5661_v22, %v4027_v21  ;;  %v4032_v39 = vor.u32 %v5657_v26, %v4029_v27  ;;  %918 = vmatpush.bf16.msra.mxu0 %v3772_v31  ;;  %944 = vmatpush.bf16.msra.mxu2 %v3776_v36  ;;  %v117_v52 = vld [vmem:[%s6443_s0] sm:$0xff]  ;;  %v5698_v2 = vld [vmem:[#allocation2 + $0x34c] sm:$0xf]  ;;  %v3944_v7 = vor.u32 %v5634_v63, %v3941_v0  ;;  %v3907_v8 = vld [vmem:[#allocation2 + $0x108] sm:$0xf] }
  0x39   :  { %v265_v54 = vunpack.c.l.b16 %v117_v52  ;;  %v266_v55 = vunpack.c.h.b16 %v117_v52  ;;  %v4197_v3 = vld [vmem:[#allocation2 + $0x368] sm:$0xf0]  ;;  %v5630_v9 = vld [vmem:[#allocation2 + $0x124] sm:$0xf0] }
  0x3a   :  { %931 = vmatpush.bf16.msra.mxu1 %v4028_v35  ;;  %957 = vmatpush.bf16.msra.mxu3 %v4032_v39  ;;  %v4163_v10 = vld [vmem:[#allocation2 + $0x308] sm:$0xf]  ;;  %v4200_v11 = vor.u32 %v5698_v2, %v4197_v3  ;;  %v5626_v13 = vld [vmem:[#allocation2 + $0x10c] sm:$0xf]  ;;  %v3908_v17 = vor.u32 %v5630_v9, %v3907_v8  ;;  %v4011_v2 = vld [vmem:[#allocation2 + $0x1d0] sm:$0xf] }
  0x3b   :  { %v6305_v1 = vpack.c.b16 %v265_v54, %v265_v54  ;;  %v6307_v4 = vpack.c.b16 %v266_v55, %v266_v55  ;;  %v5694_v12 = vld [vmem:[#allocation2 + $0x324] sm:$0xf0]  ;;  %v3909_v14 = vld [vmem:[#allocation2 + $0x128] sm:$0xf0]  ;;  %v5655_v3 = vld [vmem:[#allocation2 + $0x1ec] sm:$0xf0] }
  0x3c   :  { %963 = vmatpush.bf16.msrb.mxu0 %v4004_v40  ;;  %989 = vmatpush.bf16.msrb.mxu2 %v4008_v42  ;;  %v5690_v15 = vld [vmem:[#allocation2 + $0x30c] sm:$0xf]  ;;  %v4164_v18 = vor.u32 %v5694_v12, %v4163_v10  ;;  %v3912_v19 = vor.u32 %v5626_v13, %v3909_v14  ;;  %v3875_v20 = vld [vmem:[#allocation2 + $0xc8] sm:$0xf]  ;;  %v5651_v8 = vld [vmem:[#allocation2 + $0x1d4] sm:$0xf] }
  0x3d   :  { %945 = vmatmul.bf16.vlgmr.msra.gmra.mxu2 %v6305_v1  ;;  %919 = vmatmul.bf16.vlgmr.msra.gmra.mxu0 %v6305_v1  ;;  %v4165_v16 = vld [vmem:[#allocation2 + $0x328] sm:$0xf0]  ;;  %v5622_v21 = vld [vmem:[#allocation2 + $0xe4] sm:$0xf0]  ;;  %v4013_v9 = vld [vmem:[#allocation2 + $0x1f0] sm:$0xf0] }
  0x3e   :  { %976 = vmatpush.bf16.msrb.mxu1 %v4260_v41  ;;  %1002 = vmatpush.bf16.msrb.mxu3 %v4264_v46  ;;  %v4131_v22 = vld [vmem:[#allocation2 + $0x2c8] sm:$0xf]  ;;  %v4168_v23 = vor.u32 %v5690_v15, %v4165_v16  ;;  %v5618_v25 = vld [vmem:[#allocation2 + $0xcc] sm:$0xf]  ;;  %v3876_v29 = vor.u32 %v5622_v21, %v3875_v20  ;;  %v5715_v12 = vld [vmem:[#allocation2 + $0x3d4] sm:$0xf]  ;;  %v4012_v15 = vor.u32 %v5655_v3, %v4011_v2 }
  0x3f   :  { %932 = vmatmul.bf16.vlgmr.msra.gmra.mxu1 %v6307_v4  ;;  %958 = vmatmul.bf16.vlgmr.msra.gmra.mxu3 %v6307_v4  ;;  %v5686_v24 = vld [vmem:[#allocation2 + $0x2e4] sm:$0xf0]  ;;  %v3877_v26 = vld [vmem:[#allocation2 + $0xe8] sm:$0xf0]  ;;  %v4269_v13 = vld [vmem:[#allocation2 + $0x3f0] sm:$0xf0] }
  0x40   :  { %964 = vmatpush.bf16.msrb.mxu0 %v3972_v53  ;;  %990 = vmatpush.bf16.msrb.mxu2 %v3976_v57  ;;  %v5682_v27 = vld [vmem:[#allocation2 + $0x2cc] sm:$0xf]  ;;  %v4132_v30 = vor.u32 %v5686_v24, %v4131_v22  ;;  %v3880_v31 = vor.u32 %v5618_v25, %v3877_v26  ;;  %v3843_v32 = vld [vmem:[#allocation2 + $0x88] sm:$0xf]  ;;  %v4235_v20 = vld [vmem:[#allocation2 + $0x390] sm:$0xf]  ;;  %v4272_v21 = vor.u32 %v5715_v12, %v4269_v13 }
  0x41   :  { %v4133_v28 = vld [vmem:[#allocation2 + $0x2e8] sm:$0xf0]  ;;  %v5614_v33 = vld [vmem:[#allocation2 + $0xa4] sm:$0xf0]  ;;  %v5711_v22 = vld [vmem:[#allocation2 + $0x3ac] sm:$0xf0] }
  0x42   :  { %977 = vmatpush.bf16.msrb.mxu1 %v4228_v56  ;;  %1003 = vmatpush.bf16.msrb.mxu3 %v4232_v61  ;;  %v4099_v34 = vld [vmem:[#allocation2 + $0x288] sm:$0xf]  ;;  %v4136_v35 = vor.u32 %v5682_v27, %v4133_v28  ;;  %v5610_v37 = vld [vmem:[#allocation2 + $0x8c] sm:$0xf]  ;;  %v3844_v41 = vor.u32 %v5614_v33, %v3843_v32  ;;  %v3981_v24 = vld [vmem:[#allocation2 + $0x1b0] sm:$0xf0]  ;;  %v4236_v28 = vor.u32 %v5711_v22, %v4235_v20 }
  0x43   :  { %v5678_v36 = vld [vmem:[#allocation2 + $0x2a4] sm:$0xf0]  ;;  %v3845_v38 = vld [vmem:[#allocation2 + $0xa8] sm:$0xf0]  ;;  %v5707_v25 = vld [vmem:[#allocation2 + $0x394] sm:$0xf] }
  0x44   :  { %965 = vmatpush.bf16.msrb.mxu0 %v3940_v5  ;;  %991 = vmatpush.bf16.msrb.mxu2 %v3944_v7  ;;  %v5674_v39 = vld [vmem:[#allocation2 + $0x28c] sm:$0xf]  ;;  %v4100_v42 = vor.u32 %v5678_v36, %v4099_v34  ;;  %v3848_v43 = vor.u32 %v5610_v37, %v3845_v38  ;;  %v3811_v44 = vld [vmem:[#allocation2 + $0x48] sm:$0xf]  ;;  %v4267_v5 = vld [vmem:[#allocation2 + $0x3d0] sm:$0xf] }
  0x45   :  { %v4101_v40 = vld [vmem:[#allocation2 + $0x2a8] sm:$0xf0]  ;;  %v5606_v45 = vld [vmem:[#allocation2 + $0x64] sm:$0xf0]  ;;  %v5719_v7 = vld [vmem:[#allocation2 + $0x3ec] sm:$0xf0] }
  0x46   :  { %978 = vmatpush.bf16.msrb.mxu1 %v4196_v6  ;;  %1004 = vmatpush.bf16.msrb.mxu3 %v4200_v11  ;;  %v4067_v46 = vld [vmem:[#allocation2 + $0x248] sm:$0xf]  ;;  %v4104_v47 = vor.u32 %v5674_v39, %v4101_v40  ;;  %v5602_v49 = vld [vmem:[#allocation2 + $0x4c] sm:$0xf]  ;;  %v3812_v53 = vor.u32 %v5606_v45, %v3811_v44  ;;  %v4268_v16 = vor.u32 %v5719_v7, %v4267_v5  ;;  %v4237_v26 = vld [vmem:[#allocation2 + $0x3b0] sm:$0xf0] }
  0x47   :  { %v5670_v48 = vld [vmem:[#allocation2 + $0x264] sm:$0xf0]  ;;  %v3813_v50 = vld [vmem:[#allocation2 + $0x68] sm:$0xf0]  ;;  %v4203_v32 = vld [vmem:[#allocation2 + $0x350] sm:$0xf]  ;;  %v4240_v33 = vor.u32 %v5707_v25, %v4237_v26 }
  0x48   :  { %966 = vmatpush.bf16.msrb.mxu0 %v3908_v17  ;;  %992 = vmatpush.bf16.msrb.mxu2 %v3912_v19  ;;  %v5666_v51 = vld [vmem:[#allocation2 + $0x24c] sm:$0xf]  ;;  %v3779_v54 = vld [vmem:[#allocation2 + $0x8] sm:$0xf]  ;;  %v4068_v56 = vor.u32 %v5670_v48, %v4067_v46  ;;  %v3816_v57 = vor.u32 %v5602_v49, %v3813_v50  ;;  %v4016_v17 = vor.u32 %v5651_v8, %v4013_v9  ;;  %v5647_v19 = vld [vmem:[#allocation2 + $0x1ac] sm:$0xf0] }
  0x49   :  { %v4069_v52 = vld [vmem:[#allocation2 + $0x268] sm:$0xf0]  ;;  %v5598_v55 = vld [vmem:[#allocation2 + $0x24] sm:$0xf0]  ;;  %v5703_v34 = vld [vmem:[#allocation2 + $0x36c] sm:$0xf0] }
  0x4a   :  { %979 = vmatpush.bf16.msrb.mxu1 %v4164_v18  ;;  %1005 = vmatpush.bf16.msrb.mxu3 %v4168_v23  ;;  %v4035_v58 = vld [vmem:[#allocation2 + $0x208] sm:$0xf]  ;;  %v5594_v60 = vld [vmem:[#allocation2 + $0xc] sm:$0xf]  ;;  %v4072_v61 = vor.u32 %v5666_v51, %v4069_v52  ;;  %v3780_v6 = vor.u32 %v5598_v55, %v3779_v54  ;;  %v3979_v18 = vld [vmem:[#allocation2 + $0x190] sm:$0xf]  ;;  %v4204_v40 = vor.u32 %v5703_v34, %v4203_v32 }
  0x4b   :  { %v5662_v59 = vld [vmem:[#allocation2 + $0x224] sm:$0xf0]  ;;  %v3781_v62 = vld [vmem:[#allocation2 + $0x28] sm:$0xf0]  ;;  %v5643_v23 = vld [vmem:[#allocation2 + $0x194] sm:$0xf]  ;;  %v3980_v27 = vor.u32 %v5647_v19, %v3979_v18 }
  0x4c   :  { %967 = vmatpush.bf16.msrb.mxu0 %v3876_v29  ;;  %993 = vmatpush.bf16.msrb.mxu2 %v3880_v31  ;;  %v5658_v63 = vld [vmem:[#allocation2 + $0x20c] sm:$0xf]  ;;  %v4036_v10 = vor.u32 %v5662_v59, %v4035_v58  ;;  %v3784_v11 = vor.u32 %v5594_v60, %v3781_v62  ;;  %v3984_v29 = vor.u32 %v5643_v23, %v3981_v24  ;;  %v5639_v31 = vld [vmem:[#allocation2 + $0x16c] sm:$0xf0]  ;;  %v3949_v36 = vld [vmem:[#allocation2 + $0x170] sm:$0xf0] }
  0x4d   :  { %v4037_v0 = vld [vmem:[#allocation2 + $0x228] sm:$0xf0]  ;;  %v5699_v37 = vld [vmem:[#allocation2 + $0x354] sm:$0xf]  ;;  %v4171_v44 = vld [vmem:[#allocation2 + $0x310] sm:$0xf] }
  0x4e   :  { %980 = vmatpush.bf16.msrb.mxu1 %v4132_v30  ;;  %1006 = vmatpush.bf16.msrb.mxu3 %v4136_v35  ;;  %v4040_v14 = vor.u32 %v5658_v63, %v4037_v0  ;;  %v3947_v30 = vld [vmem:[#allocation2 + $0x150] sm:$0xf]  ;;  %v5635_v35 = vld [vmem:[#allocation2 + $0x154] sm:$0xf] }
  0x4f   :  { %v4205_v38 = vld [vmem:[#allocation2 + $0x370] sm:$0xf0]  ;;  %v3948_v39 = vor.u32 %v5639_v31, %v3947_v30  ;;  %v5695_v46 = vld [vmem:[#allocation2 + $0x32c] sm:$0xf0] }
  0x50   :  { %968 = vmatpush.bf16.msrb.mxu0 %v3844_v41  ;;  %994 = vmatpush.bf16.msrb.mxu2 %v3848_v43  ;;  %v3952_v41 = vor.u32 %v5635_v35, %v3949_v36  ;;  %v5631_v43 = vld [vmem:[#allocation2 + $0x12c] sm:$0xf0]  ;;  %v4208_v45 = vor.u32 %v5699_v37, %v4205_v38  ;;  %v3917_v48 = vld [vmem:[#allocation2 + $0x130] sm:$0xf0]  ;;  %v4172_v52 = vor.u32 %v5695_v46, %v4171_v44  ;;  %v4019_v37 = vld [vmem:[#allocation2 + $0x1d8] sm:$0xf] }
  0x51   :  { %v5691_v49 = vld [vmem:[#allocation2 + $0x314] sm:$0xf]  ;;  %v3883_v54 = vld [vmem:[#allocation2 + $0xd0] sm:$0xf]  ;;  %v5656_v38 = vld [vmem:[#allocation2 + $0x1f4] sm:$0xf0] }
  0x52   :  { %981 = vmatpush.bf16.msrb.mxu1 %v4100_v42  ;;  %1007 = vmatpush.bf16.msrb.mxu3 %v4104_v47  ;;  %v3915_v42 = vld [vmem:[#allocation2 + $0x110] sm:$0xf]  ;;  %v5627_v47 = vld [vmem:[#allocation2 + $0x114] sm:$0xf]  ;;  %v5716_v46 = vld [vmem:[#allocation2 + $0x3dc] sm:$0xf] }
  0x53   :  { %v4173_v50 = vld [vmem:[#allocation2 + $0x330] sm:$0xf0]  ;;  %v3916_v51 = vor.u32 %v5631_v43, %v3915_v42  ;;  %v5623_v55 = vld [vmem:[#allocation2 + $0xec] sm:$0xf0]  ;;  %v5652_v42 = vld [vmem:[#allocation2 + $0x1dc] sm:$0xf] }
  0x54   :  { %969 = vmatpush.bf16.msrb.mxu0 %v3812_v53  ;;  %995 = vmatpush.bf16.msrb.mxu2 %v3816_v57  ;;  %v3920_v53 = vor.u32 %v5627_v47, %v3917_v48  ;;  %v4176_v57 = vor.u32 %v5691_v49, %v4173_v50  ;;  %v5687_v58 = vld [vmem:[#allocation2 + $0x2ec] sm:$0xf0]  ;;  %v5619_v59 = vld [vmem:[#allocation2 + $0xd4] sm:$0xf]  ;;  %v3884_v63 = vor.u32 %v5623_v55, %v3883_v54  ;;  %v4021_v43 = vld [vmem:[#allocation2 + $0x1f8] sm:$0xf0] }
  0x55   :  { %v3885_v60 = vld [vmem:[#allocation2 + $0xf0] sm:$0xf0]  ;;  %v3851_v3 = vld [vmem:[#allocation2 + $0x90] sm:$0xf]  ;;  %v4277_v47 = vld [vmem:[#allocation2 + $0x3f8] sm:$0xf0]  ;;  %v4020_v49 = vor.u32 %v5656_v38, %v4019_v37 }
  0x56   :  { %982 = vmatpush.bf16.msrb.mxu1 %v4068_v56  ;;  %1008 = vmatpush.bf16.msrb.mxu3 %v4072_v61  ;;  %v4139_v56 = vld [vmem:[#allocation2 + $0x2d0] sm:$0xf]  ;;  %v5683_v61 = vld [vmem:[#allocation2 + $0x2d4] sm:$0xf]  ;;  %v3888_v2 = vor.u32 %v5619_v59, %v3885_v60  ;;  %v4243_v54 = vld [vmem:[#allocation2 + $0x398] sm:$0xf]  ;;  %v4280_v55 = vor.u32 %v5716_v46, %v4277_v47 }
  0x57   :  { %v4141_v62 = vld [vmem:[#allocation2 + $0x2f0] sm:$0xf0]  ;;  %v4140_v0 = vor.u32 %v5687_v58, %v4139_v56  ;;  %v5615_v5 = vld [vmem:[#allocation2 + $0xac] sm:$0xf0]  ;;  %v5712_v56 = vld [vmem:[#allocation2 + $0x3b4] sm:$0xf0] }
  0x58   :  { %970 = vmatpush.bf16.msrb.mxu0 %v3780_v6  ;;  %996 = vmatpush.bf16.msrb.mxu2 %v3784_v11  ;;  %v4107_v6 = vld [vmem:[#allocation2 + $0x290] sm:$0xf]  ;;  %v4144_v7 = vor.u32 %v5683_v61, %v4141_v62  ;;  %v5611_v9 = vld [vmem:[#allocation2 + $0x94] sm:$0xf]  ;;  %v3852_v13 = vor.u32 %v5615_v5, %v3851_v3  ;;  %v3989_v58 = vld [vmem:[#allocation2 + $0x1b8] sm:$0xf0]  ;;  %v4244_v62 = vor.u32 %v5712_v56, %v4243_v54 }
  0x59   :  { %v5679_v8 = vld [vmem:[#allocation2 + $0x2ac] sm:$0xf0]  ;;  %v5675_v11 = vld [vmem:[#allocation2 + $0x294] sm:$0xf]  ;;  %v5708_v59 = vld [vmem:[#allocation2 + $0x39c] sm:$0xf] }
  0x5a   :  { %983 = vmatpush.bf16.msrb.mxu1 %v4036_v10  ;;  %1009 = vmatpush.bf16.msrb.mxu3 %v4040_v14  ;;  %v3853_v10 = vld [vmem:[#allocation2 + $0xb0] sm:$0xf0]  ;;  %v4108_v14 = vor.u32 %v5679_v8, %v4107_v6  ;;  %v4075_v18 = vld [vmem:[#allocation2 + $0x250] sm:$0xf]  ;;  %v4245_v60 = vld [vmem:[#allocation2 + $0x3b8] sm:$0xf0] }
  0x5b   :  { %971 = vmatmul.bf16.vlgmr.msrb.gmra.mxu0 %v6305_v1  ;;  %997 = vmatmul.bf16.vlgmr.msrb.gmra.mxu2 %v6305_v1  ;;  %v4109_v12 = vld [vmem:[#allocation2 + $0x2b0] sm:$0xf0]  ;;  %v5671_v20 = vld [vmem:[#allocation2 + $0x26c] sm:$0xf0]  ;;  %v4211_v3 = vld [vmem:[#allocation2 + $0x358] sm:$0xf]  ;;  %v4248_v5 = vor.u32 %v5708_v59, %v4245_v60 }
  0x5c   :  { %1015 = vmatpush.bf16.msra.mxu0 %v4012_v15  ;;  %1041 = vmatpush.bf16.msra.mxu2 %v4016_v17  ;;  %v3856_v15 = vor.u32 %v5611_v9, %v3853_v10  ;;  %v5607_v17 = vld [vmem:[#allocation2 + $0x6c] sm:$0xf0]  ;;  %v4112_v19 = vor.u32 %v5675_v11, %v4109_v12  ;;  %v3821_v22 = vld [vmem:[#allocation2 + $0x70] sm:$0xf0]  ;;  %v5704_v6 = vld [vmem:[#allocation2 + $0x374] sm:$0xf0] }
  0x5d   :  { %984 = vmatmul.bf16.vlgmr.msrb.gmra.mxu1 %v6307_v4  ;;  %1010 = vmatmul.bf16.vlgmr.msrb.gmra.mxu3 %v6307_v4  ;;  %v5667_v23 = vld [vmem:[#allocation2 + $0x254] sm:$0xf]  ;;  %v3787_v26 = vld [vmem:[#allocation2 + $0x10] sm:$0xf]  ;;  %v3957_v8 = vld [vmem:[#allocation2 + $0x178] sm:$0xf0]  ;;  %v4212_v12 = vor.u32 %v5704_v6, %v4211_v3 }
  0x5e   :  { %1028 = vmatpush.bf16.msra.mxu1 %v4268_v16  ;;  %1054 = vmatpush.bf16.msra.mxu3 %v4272_v21  ;;  %v3819_v16 = vld [vmem:[#allocation2 + $0x50] sm:$0xf]  ;;  %v5603_v21 = vld [vmem:[#allocation2 + $0x54] sm:$0xf]  ;;  %v5700_v9 = vld [vmem:[#allocation2 + $0x35c] sm:$0xf] }
  0x5f   :  { %v4077_v24 = vld [vmem:[#allocation2 + $0x270] sm:$0xf0]  ;;  %v3820_v25 = vor.u32 %v5607_v17, %v3819_v16  ;;  %v4043_v30 = vld [vmem:[#allocation2 + $0x210] sm:$0xf]  ;;  %v4213_v10 = vld [vmem:[#allocation2 + $0x378] sm:$0xf0] }
  0x60   :  { %1016 = vmatpush.bf16.msra.mxu0 %v3980_v27  ;;  %1042 = vmatpush.bf16.msra.mxu2 %v3984_v29  ;;  %v5599_v27 = vld [vmem:[#allocation2 + $0x2c] sm:$0xf0]  ;;  %v3824_v29 = vor.u32 %v5603_v21, %v3821_v22  ;;  %v5595_v32 = vld [vmem:[#allocation2 + $0x14] sm:$0xf]  ;;  %v4179_v16 = vld [vmem:[#allocation2 + $0x318] sm:$0xf]  ;;  %v4216_v17 = vor.u32 %v5700_v9, %v4213_v10 }
  0x61   :  { %v5663_v31 = vld [vmem:[#allocation2 + $0x22c] sm:$0xf0]  ;;  %v3789_v34 = vld [vmem:[#allocation2 + $0x30] sm:$0xf0]  ;;  %v5692_v21 = vld [vmem:[#allocation2 + $0x31c] sm:$0xf] }
  0x62   :  { %1029 = vmatpush.bf16.msra.mxu1 %v4236_v28  ;;  %1055 = vmatpush.bf16.msra.mxu3 %v4240_v33  ;;  %v4076_v28 = vor.u32 %v5671_v20, %v4075_v18  ;;  %v4080_v33 = vor.u32 %v5667_v23, %v4077_v24  ;;  %v5659_v35 = vld [vmem:[#allocation2 + $0x214] sm:$0xf]  ;;  %v4044_v44 = vor.u32 %v5663_v31, %v4043_v30  ;;  %v5696_v18 = vld [vmem:[#allocation2 + $0x334] sm:$0xf0]  ;;  %v3925_v20 = vld [vmem:[#allocation2 + $0x138] sm:$0xf0] }
  0x63   :  { %v4045_v36 = vld [vmem:[#allocation2 + $0x230] sm:$0xf0]  ;;  %v4181_v22 = vld [vmem:[#allocation2 + $0x338] sm:$0xf0]  ;;  %v4180_v24 = vor.u32 %v5696_v18, %v4179_v16  ;;  %v5688_v30 = vld [vmem:[#allocation2 + $0x2f4] sm:$0xf0] }
  0x64   :  { %1017 = vmatpush.bf16.msra.mxu0 %v3948_v39  ;;  %1043 = vmatpush.bf16.msra.mxu2 %v3952_v41  ;;  %v4275_v39 = vld [vmem:[#allocation2 + $0x3d8] sm:$0xf]  ;;  %v4048_v48 = vor.u32 %v5659_v35, %v4045_v36  ;;  %v5620_v31 = vld [vmem:[#allocation2 + $0xdc] sm:$0xf]  ;;  %v4395_v9 = vld [vmem:[#allocation7 + $0xe0] sm:$0xf] }
  0x65   :  { %v5720_v41 = vld [vmem:[#allocation2 + $0x3f4] sm:$0xf0]  ;;  %v4117_v46 = vld [vmem:[#allocation2 + $0x2b8] sm:$0xf0]  ;;  %v6007_v10 = vld [vmem:[#allocation7 + $0xec] sm:$0xf0] }
  0x66   :  { %1030 = vmatpush.bf16.msra.mxu1 %v4204_v40  ;;  %1056 = vmatpush.bf16.msra.mxu3 %v4208_v45  ;;  %v3788_v40 = vor.u32 %v5599_v27, %v3787_v26  ;;  %v3792_v45 = vor.u32 %v5595_v32, %v3789_v34  ;;  %v4276_v50 = vor.u32 %v5720_v41, %v4275_v39  ;;  %v3891_v26 = vld [vmem:[#allocation2 + $0xd8] sm:$0xf]  ;;  %v3893_v32 = vld [vmem:[#allocation2 + $0xf8] sm:$0xf0]  ;;  %v4379_v18 = vld [vmem:[#allocation7 + $0xc0] sm:$0xf] }
  0x67   :  { %v5624_v27 = vld [vmem:[#allocation2 + $0xf4] sm:$0xf0]  ;;  %v4149_v34 = vld [vmem:[#allocation2 + $0x2f8] sm:$0xf0]  ;;  %v3896_v37 = vor.u32 %v5620_v31, %v3893_v32 }
  0x68   :  { %1018 = vmatpush.bf16.msra.mxu0 %v3916_v51  ;;  %1044 = vmatpush.bf16.msra.mxu2 %v3920_v53  ;;  %v4024_v51 = vor.u32 %v5652_v42, %v4021_v43  ;;  %v5648_v53 = vld [vmem:[#allocation2 + $0x1b4] sm:$0xf0]  ;;  %v3892_v35 = vor.u32 %v5624_v27, %v3891_v26  ;;  %v5612_v43 = vld [vmem:[#allocation2 + $0x9c] sm:$0xf]  ;;  %v4381_v26 = vld [vmem:[#allocation7 + $0xd0] sm:$0xf0] }
  0x69   :  { %v3859_v38 = vld [vmem:[#allocation2 + $0x98] sm:$0xf]  ;;  %v3829_v56 = vld [vmem:[#allocation2 + $0x78] sm:$0xf0] }
  0x6a   :  { %1031 = vmatpush.bf16.msra.mxu1 %v4172_v52  ;;  %1057 = vmatpush.bf16.msra.mxu3 %v4176_v57  ;;  %v3987_v52 = vld [vmem:[#allocation2 + $0x198] sm:$0xf]  ;;  %v5644_v57 = vld [vmem:[#allocation2 + $0x19c] sm:$0xf] }
  0x6b   :  { %v3988_v61 = vor.u32 %v5648_v53, %v3987_v52  ;;  %v5616_v39 = vld [vmem:[#allocation2 + $0xb4] sm:$0xf0]  ;;  %v3797_v6 = vld [vmem:[#allocation2 + $0x38] sm:$0xf0] }
  0x6c   :  { %1019 = vmatpush.bf16.msra.mxu0 %v3884_v63  ;;  %1045 = vmatpush.bf16.msra.mxu2 %v3888_v2  ;;  %v3992_v63 = vor.u32 %v5644_v57, %v3989_v58  ;;  %v5640_v2 = vld [vmem:[#allocation2 + $0x174] sm:$0xf0]  ;;  %v3860_v47 = vor.u32 %v5616_v39, %v3859_v38  ;;  %v5668_v57 = vld [vmem:[#allocation2 + $0x25c] sm:$0xf]  ;;  %v4365_v38 = vld [vmem:[#allocation7 + $0xb0] sm:$0xf0] }
  0x6d   :  { %v5680_v42 = vld [vmem:[#allocation2 + $0x2b4] sm:$0xf0]  ;;  %v4085_v58 = vld [vmem:[#allocation2 + $0x278] sm:$0xf0] }
  0x6e   :  { %1032 = vmatpush.bf16.msra.mxu1 %v4140_v0  ;;  %1058 = vmatpush.bf16.msra.mxu3 %v4144_v7  ;;  %v3955_v0 = vld [vmem:[#allocation2 + $0x158] sm:$0xf]  ;;  %v5636_v7 = vld [vmem:[#allocation2 + $0x15c] sm:$0xf]  ;;  %v4088_v3 = vor.u32 %v5668_v57, %v4085_v58  ;;  %v5994_v57 = vld [vmem:[#allocation7 + $0x8c] sm:$0xf] }
  0x6f   :  { %v3956_v11 = vor.u32 %v5640_v2, %v3955_v0  ;;  %v4083_v52 = vld [vmem:[#allocation2 + $0x258] sm:$0xf]  ;;  %v4357_v58 = vld [vmem:[#allocation7 + $0x98] sm:$0xf0] }
  0x70   :  { %1020 = vmatpush.bf16.msra.mxu0 %v3852_v13  ;;  %1046 = vmatpush.bf16.msra.mxu2 %v3856_v15  ;;  %v3960_v13 = vor.u32 %v5636_v7, %v3957_v8  ;;  %v5632_v15 = vld [vmem:[#allocation2 + $0x134] sm:$0xf0]  ;;  %v5660_v7 = vld [vmem:[#allocation2 + $0x21c] sm:$0xf] }
  0x71   :  { %v5672_v54 = vld [vmem:[#allocation2 + $0x274] sm:$0xf0]  ;;  %v4053_v8 = vld [vmem:[#allocation2 + $0x238] sm:$0xf0] }
  0x72   :  { %1033 = vmatpush.bf16.msra.mxu1 %v4108_v14  ;;  %1059 = vmatpush.bf16.msra.mxu3 %v4112_v19  ;;  %v3923_v14 = vld [vmem:[#allocation2 + $0x118] sm:$0xf]  ;;  %v5628_v19 = vld [vmem:[#allocation2 + $0x11c] sm:$0xf]  ;;  %v4056_v16 = vor.u32 %v5660_v7, %v4053_v8  ;;  %v5990_v7 = vld [vmem:[#allocation7 + $0x6c] sm:$0xf] }
  0x73   :  { %v3924_v23 = vor.u32 %v5632_v15, %v3923_v14  ;;  %v3795_v60 = vld [vmem:[#allocation2 + $0x18] sm:$0xf]  ;;  %v4341_v8 = vld [vmem:[#allocation7 + $0x78] sm:$0xf0] }
  0x74   :  { %1021 = vmatpush.bf16.msra.mxu0 %v3820_v25  ;;  %1047 = vmatpush.bf16.msra.mxu2 %v3824_v29  ;;  %v3928_v25 = vor.u32 %v5628_v19, %v3925_v20  ;;  %v4184_v29 = vor.u32 %v5692_v21, %v4181_v22  ;;  %v4051_v0 = vld [vmem:[#allocation2 + $0x218] sm:$0xf]  ;;  %v4403_v19 = vld [vmem:[#allocation7 + $0xe8] sm:$0xf]  ;;  %v6003_v22 = vld [vmem:[#allocation7 + $0xcc] sm:$0xf0] }
  0x75   :  { %v5664_v2 = vld [vmem:[#allocation2 + $0x234] sm:$0xf0] }
  0x76   :  { %1034 = vmatpush.bf16.msra.mxu1 %v4076_v28  ;;  %1060 = vmatpush.bf16.msra.mxu3 %v4080_v33  ;;  %v4147_v28 = vld [vmem:[#allocation2 + $0x2d8] sm:$0xf]  ;;  %v5684_v33 = vld [vmem:[#allocation2 + $0x2dc] sm:$0xf]  ;;  %v4052_v14 = vor.u32 %v5664_v2, %v4051_v0  ;;  %v4339_v0 = vld [vmem:[#allocation7 + $0x68] sm:$0xf] }
  0x77   :  { %v4148_v36 = vor.u32 %v5688_v30, %v4147_v28  ;;  %v4152_v41 = vor.u32 %v5684_v33, %v4149_v34  ;;  %v6008_v20 = vld [vmem:[#allocation7 + $0xf4] sm:$0xf0]  ;;  %v4380_v28 = vor.u32 %v6003_v22, %v4379_v18  ;;  %v4387_v30 = vld [vmem:[#allocation7 + $0xc8] sm:$0xf]  ;;  %v5999_v34 = vld [vmem:[#allocation7 + $0xac] sm:$0xf0] }
  0x78   :  { %1022 = vmatpush.bf16.msra.mxu0 %v3788_v40  ;;  %1048 = vmatpush.bf16.msra.mxu2 %v3792_v45  ;;  %v4115_v40 = vld [vmem:[#allocation2 + $0x298] sm:$0xf]  ;;  %v5676_v45 = vld [vmem:[#allocation2 + $0x29c] sm:$0xf]  ;;  %v4404_v27 = vor.u32 %v6008_v20, %v4403_v19  ;;  %v5983_v18 = vld [vmem:[#allocation7 + $0x2c] sm:$0xf0] }
  0x79   :  { %v4120_v53 = vor.u32 %v5676_v45, %v4117_v46  ;;  %v6004_v31 = vld [vmem:[#allocation7 + $0xd4] sm:$0xf0]  ;;  %v5995_v46 = vld [vmem:[#allocation7 + $0x8c] sm:$0xf0]  ;;  %v5986_v19 = vld [vmem:[#allocation7 + $0x4c] sm:$0xf] }
  0x7a   :  { %1035 = vmatpush.bf16.msra.mxu1 %v4044_v44  ;;  %1061 = vmatpush.bf16.msra.mxu3 %v4048_v48  ;;  %v3861_v44 = vld [vmem:[#allocation2 + $0xb8] sm:$0xf0]  ;;  %v4116_v48 = vor.u32 %v5680_v42, %v4115_v40  ;;  %v4388_v39 = vor.u32 %v6004_v31, %v4387_v30  ;;  %v4371_v42 = vld [vmem:[#allocation7 + $0xa8] sm:$0xf]  ;;  %v5992_v2 = vld [vmem:[#allocation7 + $0x74] sm:$0xf0] }
  0x7b   :  { %1023 = vmatmul.bf16.vlgmr.msra.gmra.mxu0 %v6305_v1  ;;  %1049 = vmatmul.bf16.vlgmr.msra.gmra.mxu2 %v6305_v1  ;;  %v4325_v20 = vld [vmem:[#allocation7 + $0x58] sm:$0xf0]  ;;  %v4301_v22 = vld [vmem:[#allocation7 + $0x30] sm:$0xf0]  ;;  %v5977_v31 = vld [vmem:[#allocation7 + $0x4] sm:$0xf] }
  0x7c   :  { %1067 = vmatpush.bf16.msrb.mxu0 %v4020_v49  ;;  %1093 = vmatpush.bf16.msrb.mxu2 %v4024_v51  ;;  %v3864_v49 = vor.u32 %v5612_v43, %v3861_v44  ;;  %v5608_v51 = vld [vmem:[#allocation2 + $0x74] sm:$0xf0] }
  0x7d   :  { %1036 = vmatmul.bf16.vlgmr.msra.gmra.mxu1 %v6307_v4  ;;  %1062 = vmatmul.bf16.vlgmr.msra.gmra.mxu3 %v6307_v4  ;;  %v6000_v43 = vld [vmem:[#allocation7 + $0xb4] sm:$0xf0] }
  0x7e   :  { %1080 = vmatpush.bf16.msrb.mxu1 %v4276_v50  ;;  %1106 = vmatpush.bf16.msrb.mxu3 %v4280_v55  ;;  %v3827_v50 = vld [vmem:[#allocation2 + $0x58] sm:$0xf]  ;;  %v5604_v55 = vld [vmem:[#allocation2 + $0x5c] sm:$0xf] }
  0x7f   :  { %v3828_v59 = vor.u32 %v5608_v51, %v3827_v50  ;;  %v4372_v50 = vor.u32 %v6000_v43, %v4371_v42  ;;  %v4331_v51 = vld [vmem:[#allocation7 + $0x60] sm:$0xf]  ;;  %v4291_v42 = vld [vmem:[#allocation7 + $0x8] sm:$0xf]  ;;  %v5980_v43 = vld [vmem:[#allocation7 + $0x14] sm:$0xf0] }
  0x80   :  { %1068 = vmatpush.bf16.msrb.mxu0 %v3988_v61  ;;  %1094 = vmatpush.bf16.msrb.mxu2 %v3992_v63  ;;  %v4084_v61 = vor.u32 %v5672_v54, %v4083_v52  ;;  %v5600_v63 = vld [vmem:[#allocation2 + $0x34] sm:$0xf0]  ;;  %v4355_v52 = vld [vmem:[#allocation7 + $0x88] sm:$0xf] }
  0x82   :  { %1081 = vmatpush.bf16.msrb.mxu1 %v4244_v62  ;;  %1107 = vmatpush.bf16.msrb.mxu3 %v4248_v5  ;;  %v3832_v62 = vor.u32 %v5604_v55, %v3829_v56  ;;  %v5596_v5 = vld [vmem:[#allocation2 + $0x1c] sm:$0xf]  ;;  %v5991_v56 = vld [vmem:[#allocation7 + $0x6c] sm:$0xf0] }
  0x83   :  { %v3800_v15 = vor.u32 %v5596_v5, %v3797_v6  ;;  %v5987_v6 = vld [vmem:[#allocation7 + $0x4c] sm:$0xf0] }
  0x84   :  { %1069 = vmatpush.bf16.msrb.mxu0 %v3956_v11  ;;  %1095 = vmatpush.bf16.msrb.mxu2 %v3960_v13  ;;  %v3796_v11 = vor.u32 %v5600_v63, %v3795_v60  ;;  %v4397_v13 = vld [vmem:[#allocation7 + $0xf0] sm:$0xf0]  ;;  %v4315_v63 = vld [vmem:[#allocation7 + $0x40] sm:$0xf] }
  0x85   :  { %v4333_v60 = vld [vmem:[#allocation7 + $0x70] sm:$0xf0] }
  0x86   :  { %1082 = vmatpush.bf16.msrb.mxu1 %v4212_v12  ;;  %1108 = vmatpush.bf16.msrb.mxu3 %v4216_v17  ;;  %v6005_v12 = vld [vmem:[#allocation7 + $0xe4] sm:$0xf]  ;;  %v4396_v17 = vor.u32 %v6007_v10, %v4395_v9  ;;  %v4317_v10 = vld [vmem:[#allocation7 + $0x50] sm:$0xf0] }
  0x87   :  { %v4400_v21 = vor.u32 %v6005_v12, %v4397_v13  ;;  %v5985_v9 = vld [vmem:[#allocation7 + $0x44] sm:$0xf]  ;;  %v4316_v12 = vor.u32 %v5987_v6, %v4315_v63  ;;  %v4299_v13 = vld [vmem:[#allocation7 + $0x20] sm:$0xf] }
  0x88   :  { %1070 = vmatpush.bf16.msrb.mxu0 %v3924_v23  ;;  %1096 = vmatpush.bf16.msrb.mxu2 %v3928_v25  ;;  %v6006_v23 = vld [vmem:[#allocation7 + $0xec] sm:$0xf]  ;;  %v6001_v25 = vld [vmem:[#allocation7 + $0xc4] sm:$0xf]  ;;  %v4619_v6 = vld [vmem:[#allocation5 + $0x1a0] sm:$0xf] }
  0x89   :  { %v4384_v33 = vor.u32 %v6001_v25, %v4381_v26  ;;  %v4300_v25 = vor.u32 %v5983_v18, %v4299_v13  ;;  %v5979_v26 = vld [vmem:[#allocation7 + $0xc] sm:$0xf0]  ;;  %v4603_v18 = vld [vmem:[#allocation5 + $0x180] sm:$0xf] }
  0x8a   :  { %1083 = vmatpush.bf16.msrb.mxu1 %v4180_v24  ;;  %1109 = vmatpush.bf16.msrb.mxu3 %v4184_v29  ;;  %v4405_v24 = vld [vmem:[#allocation7 + $0xf8] sm:$0xf0]  ;;  %v4363_v29 = vld [vmem:[#allocation7 + $0xa0] sm:$0xf] }
  0x8b   :  { %v4408_v32 = vor.u32 %v6006_v23, %v4405_v24  ;;  %v4364_v40 = vor.u32 %v5999_v34, %v4363_v29  ;;  %v4283_v23 = vld [vmem:[#allocation7] sm:$0xf]  ;;  %v4328_v29 = vor.u32 %v5986_v19, %v4325_v20  ;;  %v4285_v34 = vld [vmem:[#allocation7 + $0x10] sm:$0xf0]  ;;  %v5771_v19 = vld [vmem:[#allocation5 + $0x18c] sm:$0xf0] }
  0x8c   :  { %1071 = vmatpush.bf16.msrb.mxu0 %v3892_v35  ;;  %1097 = vmatpush.bf16.msrb.mxu2 %v3896_v37  ;;  %v6002_v35 = vld [vmem:[#allocation7 + $0xcc] sm:$0xf]  ;;  %v5997_v37 = vld [vmem:[#allocation7 + $0xa4] sm:$0xf]  ;;  %v4459_v20 = vld [vmem:[#allocation5 + $0x60] sm:$0xf] }
  0x8d   :  { %v4368_v45 = vor.u32 %v5997_v37, %v4365_v38  ;;  %v4651_v37 = vld [vmem:[#allocation5 + $0x1e0] sm:$0xf]  ;;  %v5783_v38 = vld [vmem:[#allocation5 + $0x1ec] sm:$0xf0] }
  0x8e   :  { %1084 = vmatpush.bf16.msrb.mxu1 %v4148_v36  ;;  %1110 = vmatpush.bf16.msrb.mxu3 %v4152_v41  ;;  %v4389_v36 = vld [vmem:[#allocation7 + $0xd8] sm:$0xf0]  ;;  %v4347_v41 = vld [vmem:[#allocation7 + $0x80] sm:$0xf] }
  0x8f   :  { %v4392_v44 = vor.u32 %v6002_v35, %v4389_v36  ;;  %v4523_v35 = vld [vmem:[#allocation5 + $0xe0] sm:$0xf]  ;;  %v5751_v36 = vld [vmem:[#allocation5 + $0xec] sm:$0xf0] }
  0x90   :  { %1072 = vmatpush.bf16.msrb.mxu0 %v3860_v47  ;;  %1098 = vmatpush.bf16.msrb.mxu2 %v3864_v49  ;;  %v5998_v47 = vld [vmem:[#allocation7 + $0xac] sm:$0xf]  ;;  %v5993_v49 = vld [vmem:[#allocation7 + $0x84] sm:$0xf] }
  0x92   :  { %1085 = vmatpush.bf16.msrb.mxu1 %v4116_v48  ;;  %1111 = vmatpush.bf16.msrb.mxu3 %v4120_v53  ;;  %v4373_v48 = vld [vmem:[#allocation7 + $0xb8] sm:$0xf0]  ;;  %v5996_v53 = vld [vmem:[#allocation7 + $0x94] sm:$0xf0] }
  0x93   :  { %v4376_v54 = vor.u32 %v5998_v47, %v4373_v48  ;;  %v4524_v47 = vor.u32 %v5751_v36, %v4523_v35  ;;  %v5815_v48 = vld [vmem:[#allocation5 + $0x2ec] sm:$0xf0] }
  0x94   :  { %1073 = vmatpush.bf16.msrb.mxu0 %v3828_v59  ;;  %1099 = vmatpush.bf16.msrb.mxu2 %v3832_v62  ;;  %v5989_v59 = vld [vmem:[#allocation7 + $0x64] sm:$0xf]  ;;  %v4332_v62 = vor.u32 %v5991_v56, %v4331_v51  ;;  %v4907_v51 = vld [vmem:[#allocation5 + $0x3e0] sm:$0xf] }
  0x95   :  { %v4336_v5 = vor.u32 %v5989_v59, %v4333_v60  ;;  %v4491_v60 = vld [vmem:[#allocation5 + $0xa0] sm:$0xf] }
  0x96   :  { %1086 = vmatpush.bf16.msrb.mxu1 %v4084_v61  ;;  %1112 = vmatpush.bf16.msrb.mxu3 %v4088_v3  ;;  %v4356_v61 = vor.u32 %v5996_v53, %v4355_v52  ;;  %v4360_v3 = vor.u32 %v5994_v57, %v4357_v58  ;;  %v5847_v52 = vld [vmem:[#allocation5 + $0x3ec] sm:$0xf0]  ;;  %v4635_v53 = vld [vmem:[#allocation5 + $0x1c0] sm:$0xf] }
  0x97   :  { %v1391_v58 = vld [vmem:[%s6444_s1] sm:$0xf]  ;;  %v4908_v63 = vor.u32 %v5847_v52, %v4907_v51 }
  0x98   :  { %1074 = vmatpush.bf16.msrb.mxu0 %v3796_v11  ;;  %1100 = vmatpush.bf16.msrb.mxu2 %v3800_v15  ;;  %v4340_v11 = vor.u32 %v5992_v2, %v4339_v0  ;;  %v5988_v15 = vld [vmem:[#allocation7 + $0x54] sm:$0xf0]  ;;  %v5743_v2 = vld [vmem:[#allocation5 + $0xac] sm:$0xf0]  ;;  %v4699_v52 = vld [vmem:[#allocation5 + $0x240] sm:$0xf] }
  0x9a   :  { %1087 = vmatpush.bf16.msrb.mxu1 %v4052_v14  ;;  %1113 = vmatpush.bf16.msrb.mxu3 %v4056_v16  ;;  %v4323_v14 = vld [vmem:[#allocation7 + $0x48] sm:$0xf]  ;;  %v4344_v16 = vor.u32 %v5990_v7, %v4341_v8  ;;  %v5775_v7 = vld [vmem:[#allocation5 + $0x1ac] sm:$0xf0] }
  0x9b   :  { %1075 = vmatmul.bf16.vlgmr.msrb.gmra.mxu0 %v6305_v1  ;;  %1101 = vmatmul.bf16.vlgmr.msrb.gmra.mxu2 %v6305_v1  ;;  %v4349_v1 = vld [vmem:[#allocation7 + $0x90] sm:$0xf0]  ;;  %v4324_v24 = vor.u32 %v5988_v15, %v4323_v14  ;;  %v4620_v14 = vor.u32 %v5775_v7, %v4619_v6  ;;  %v5739_v15 = vld [vmem:[#allocation5 + $0x8c] sm:$0xf0] }
  0x9c   :  { %1584 = vmatpush.bf16.msra.mxu0 %v4396_v17  ;;  %1610 = vmatpush.bf16.msra.mxu2 %v4404_v27  ;;  %v4352_v55 = vor.u32 %v5993_v49, %v4349_v1  ;;  %v4320_v17 = vor.u32 %v5985_v9, %v4317_v10  ;;  %v4307_v27 = vld [vmem:[#allocation7 + $0x28] sm:$0xf]  ;;  %v5978_v49 = vld [vmem:[#allocation7 + $0xc] sm:$0xf]  ;;  %v4293_v1 = vld [vmem:[#allocation7 + $0x18] sm:$0xf0]  ;;  %v4492_v9 = vor.u32 %v5743_v2, %v4491_v60 }
  0x9d   :  { %1088 = vmatmul.bf16.vlgmr.msrb.gmra.mxu1 %v6307_v4  ;;  %1114 = vmatmul.bf16.vlgmr.msrb.gmra.mxu3 %v6307_v4  ;;  %v4348_v4 = vor.u32 %v5995_v46, %v4347_v41  ;;  %v4507_v41 = vld [vmem:[#allocation5 + $0xc0] sm:$0xf]  ;;  %v4288_v46 = vor.u32 %v5977_v31, %v4285_v34  ;;  %v4296_v57 = vor.u32 %v5978_v49, %v4293_v1 }
  0x9e   :  { %1597 = vmatpush.bf16.msra.mxu1 %v4400_v21  ;;  %1623 = vmatpush.bf16.msra.mxu3 %v4408_v32  ;;  %v5981_v21 = vld [vmem:[#allocation7 + $0x24] sm:$0xf]  ;;  %v5982_v32 = vld [vmem:[#allocation7 + $0x2c] sm:$0xf]  ;;  %v4475_v10 = vld [vmem:[#allocation5 + $0x80] sm:$0xf] }
  0x9f   :  { %v4304_v30 = vor.u32 %v5981_v21, %v4301_v22  ;;  %v4476_v22 = vor.u32 %v5739_v15, %v4475_v10  ;;  %v4587_v31 = vld [vmem:[#allocation5 + $0x160] sm:$0xf]  ;;  %v5823_v15 = vld [vmem:[#allocation5 + $0x32c] sm:$0xf0] }
  0xa0   :  { %1585 = vmatpush.bf16.msra.mxu0 %v4380_v28  ;;  %1611 = vmatpush.bf16.msra.mxu2 %v4388_v39  ;;  %v5984_v28 = vld [vmem:[#allocation7 + $0x34] sm:$0xf0]  ;;  %v4555_v60 = vld [vmem:[#allocation5 + $0x120] sm:$0xf] }
  0xa1   :  { %v4308_v39 = vor.u32 %v5984_v28, %v4307_v27  ;;  %v4604_v27 = vor.u32 %v5771_v19, %v4603_v18  ;;  %v5735_v28 = vld [vmem:[#allocation5 + $0x6c] sm:$0xf0] }
  0xa2   :  { %1598 = vmatpush.bf16.msra.mxu1 %v4384_v33  ;;  %1624 = vmatpush.bf16.msra.mxu3 %v4392_v44  ;;  %v4309_v33 = vld [vmem:[#allocation7 + $0x38] sm:$0xf0]  ;;  %v4779_v44 = vld [vmem:[#allocation5 + $0x2e0] sm:$0xf]  ;;  %v4460_v36 = vor.u32 %v5735_v28, %v4459_v20  ;;  %v5879_v18 = vld [vmem:[#allocation5 + $0x4ec] sm:$0xf0] }
  0xa3   :  { %v4780_v56 = vor.u32 %v5815_v48, %v4779_v44  ;;  %v5763_v48 = vld [vmem:[#allocation5 + $0x14c] sm:$0xf0]  ;;  %v5163_v20 = vld [vmem:[#allocation5 + $0x5e0] sm:$0xf] }
  0xa4   :  { %1586 = vmatpush.bf16.msra.mxu0 %v4364_v40  ;;  %1612 = vmatpush.bf16.msra.mxu2 %v4372_v50  ;;  %v4284_v40 = vor.u32 %v5979_v26, %v4283_v23  ;;  %v4652_v50 = vor.u32 %v5783_v38, %v4651_v37  ;;  %v6331_v23 = vld [vmem:[%s6446_s3] sm:$0xff]  ;;  %v5731_v37 = vld [vmem:[#allocation5 + $0x4c] sm:$0xf0] }
  0xa5   :  { %v248_v34 = vperm.slane %v6331_v23, 0  ;;  %v249_v44 = vperm.slane %v6331_v23, 1  ;;  %v4667_v28 = vld [vmem:[#allocation5 + $0x200] sm:$0xf] }
  0xa6   :  { %1599 = vmatpush.bf16.msra.mxu1 %v4368_v45  ;;  %1625 = vmatpush.bf16.msra.mxu3 %v4376_v54  ;;  %v4312_v45 = vor.u32 %v5982_v32, %v4309_v33  ;;  %v5779_v54 = vld [vmem:[#allocation5 + $0x1cc] sm:$0xf0]  ;;  %v4443_v33 = vld [vmem:[#allocation5 + $0x40] sm:$0xf] }
  0xa7   :  { %v4636_v0 = vor.u32 %v5779_v54, %v4635_v53  ;;  %v5767_v32 = vld [vmem:[#allocation5 + $0x16c] sm:$0xf0] }
  0xa8   :  { %1587 = vmatpush.bf16.msra.mxu0 %v4348_v4  ;;  %1613 = vmatpush.bf16.msra.mxu2 %v4356_v61  ;;  %v5747_v4 = vld [vmem:[#allocation5 + $0xcc] sm:$0xf0]  ;;  %v4763_v61 = vld [vmem:[#allocation5 + $0x2c0] sm:$0xf] }
  0xa9   :  { %v4508_v59 = vor.u32 %v5747_v4, %v4507_v41  ;;  %v4427_v4 = vld [vmem:[#allocation5 + $0x20] sm:$0xf]  ;;  %v5795_v53 = vld [vmem:[#allocation5 + $0x24c] sm:$0xf0] }
  0xaa   :  { %1600 = vmatpush.bf16.msra.mxu1 %v4352_v55  ;;  %1626 = vmatpush.bf16.msra.mxu3 %v4360_v3  ;;  %v4292_v55 = vor.u32 %v5980_v43, %v4291_v42  ;;  %v4891_v3 = vld [vmem:[#allocation5 + $0x3c0] sm:$0xf]  ;;  %v4588_v42 = vor.u32 %v5767_v32, %v4587_v31  ;;  %v4700_v2 = vor.u32 %v5795_v53, %v4699_v52  ;;  %v5871_v52 = vld [vmem:[#allocation5 + $0x4ac] sm:$0xf0] }
  0xab   :  { %v5131_v53 = vld [vmem:[#allocation5 + $0x5a0] sm:$0xf] }
  0xac   :  { %1588 = vmatpush.bf16.msra.mxu0 %v4332_v62  ;;  %1614 = vmatpush.bf16.msra.mxu2 %v4340_v11  ;;  %v5811_v62 = vld [vmem:[#allocation5 + $0x2cc] sm:$0xf0]  ;;  %v4747_v11 = vld [vmem:[#allocation5 + $0x2a0] sm:$0xf] }
  0xad   :  { %v4764_v8 = vor.u32 %v5811_v62, %v4763_v61  ;;  %v5759_v61 = vld [vmem:[#allocation5 + $0x12c] sm:$0xf0] }
  0xae   :  { %1601 = vmatpush.bf16.msra.mxu1 %v4336_v5  ;;  %1627 = vmatpush.bf16.msra.mxu3 %v4344_v16  ;;  %v5843_v5 = vld [vmem:[#allocation5 + $0x3cc] sm:$0xf0]  ;;  %v4875_v16 = vld [vmem:[#allocation5 + $0x3a0] sm:$0xf] }
  0xaf   :  { %v4892_v13 = vor.u32 %v5843_v5, %v4891_v3  ;;  %v5723_v5 = vld [vmem:[#allocation5 + $0xc] sm:$0xf0] }
  0xb0   :  { %1589 = vmatpush.bf16.msra.mxu0 %v4316_v12  ;;  %1615 = vmatpush.bf16.msra.mxu2 %v4324_v24  ;;  %v5807_v12 = vld [vmem:[#allocation5 + $0x2ac] sm:$0xf0]  ;;  %v4731_v24 = vld [vmem:[#allocation5 + $0x280] sm:$0xf] }
  0xb1   :  { %v4748_v21 = vor.u32 %v5807_v12, %v4747_v11  ;;  %v4556_v11 = vor.u32 %v5759_v61, %v4555_v60  ;;  %v4539_v12 = vld [vmem:[#allocation5 + $0x100] sm:$0xf]  ;;  %v250_v60 = vperm.slane %v6331_v23, 2 }
  0xb2   :  { %1602 = vmatpush.bf16.msra.mxu1 %v4320_v17  ;;  %1628 = vmatpush.bf16.msra.mxu3 %v4328_v29  ;;  %v5839_v17 = vld [vmem:[#allocation5 + $0x3ac] sm:$0xf0]  ;;  %v4859_v29 = vld [vmem:[#allocation5 + $0x380] sm:$0xf] }
  0xb3   :  { %v4876_v26 = vor.u32 %v5839_v17, %v4875_v16  ;;  %v5755_v16 = vld [vmem:[#allocation5 + $0x10c] sm:$0xf0]  ;;  %v5035_v17 = vld [vmem:[#allocation5 + $0x4e0] sm:$0xf] }
  0xb4   :  { %1590 = vmatpush.bf16.msra.mxu0 %v4300_v25  ;;  %1616 = vmatpush.bf16.msra.mxu2 %v4308_v39  ;;  %v5803_v25 = vld [vmem:[#allocation5 + $0x28c] sm:$0xf0]  ;;  %v4715_v39 = vld [vmem:[#allocation5 + $0x260] sm:$0xf]  ;;  %v4540_v31 = vor.u32 %v5755_v16, %v4539_v12  ;;  %v5036_v32 = vor.u32 %v5879_v18, %v5035_v17 }
  0xb5   :  { %v4732_v35 = vor.u32 %v5803_v25, %v4731_v24  ;;  %v5259_v61 = vld [vmem:[#allocation5 + $0x6a0] sm:$0xf]  ;;  %v5931_v12 = vld [vmem:[#allocation5 + $0x68c] sm:$0xf0] }
  0xb6   :  { %1603 = vmatpush.bf16.msra.mxu1 %v4304_v30  ;;  %1629 = vmatpush.bf16.msra.mxu3 %v4312_v45  ;;  %v5835_v30 = vld [vmem:[#allocation5 + $0x38c] sm:$0xf0]  ;;  %v4843_v45 = vld [vmem:[#allocation5 + $0x360] sm:$0xf] }
  0xb7   :  { %v4860_v41 = vor.u32 %v5835_v30, %v4859_v29  ;;  %v5787_v29 = vld [vmem:[#allocation5 + $0x20c] sm:$0xf0]  ;;  %v5099_v17 = vld [vmem:[#allocation5 + $0x560] sm:$0xf] }
  0xb8   :  { %1591 = vmatpush.bf16.msra.mxu0 %v4284_v40  ;;  %1617 = vmatpush.bf16.msra.mxu2 %v4292_v55  ;;  %v5799_v40 = vld [vmem:[#allocation5 + $0x26c] sm:$0xf0] }
  0xb9   :  { %v4716_v1 = vor.u32 %v5799_v40, %v4715_v39  ;;  %v5819_v39 = vld [vmem:[#allocation5 + $0x30c] sm:$0xf0] }
  0xba   :  { %1604 = vmatpush.bf16.msra.mxu1 %v4288_v46  ;;  %1630 = vmatpush.bf16.msra.mxu3 %v4296_v57  ;;  %v920_v38 = vpop.f32.mrf.mxu0  ;;  %v5831_v46 = vld [vmem:[#allocation5 + $0x36c] sm:$0xf0] }
  0xbb   :  { %1592 = vmatmul.bf16.vlgmr.msra.gmra.mxu0 %v1391_v58  ;;  %1618 = vmatmul.bf16.vlgmr.msra.gmra.mxu2 %v1391_v58  ;;  %v921_v49 = vadd.f32 %v920_v38, %v248_v34  ;;  %v4844_v54 = vor.u32 %v5831_v46, %v4843_v45  ;;  %v5291_v34 = vld [vmem:[#allocation5 + $0x6e0] sm:$0xf]  ;;  %v5975_v45 = vld [vmem:[#allocation5 + $0x7ec] sm:$0xf0] }
  0xbc   :  { %2916 = vmatpush.bf16.msrb.mxu0 %v4524_v47  ;;  %2942 = vmatpush.bf16.msrb.mxu2 %v4780_v56  ;;  %v933_v43 = vpop.f32.mrf.mxu1  ;;  %v4571_v47 = vld [vmem:[#allocation5 + $0x140] sm:$0xf]  ;;  %v5727_v56 = vld [vmem:[#allocation5 + $0x2c] sm:$0xf0] }
  0xbd   :  { %1605 = vmatmul.bf16.vlgmr.msra.gmra.mxu1 %v1391_v58  ;;  %1631 = vmatmul.bf16.vlgmr.msra.gmra.mxu3 %v1391_v58  ;;  %v4572_v55 = vor.u32 %v5763_v48, %v4571_v47  ;;  %v4827_v58 = vld [vmem:[#allocation5 + $0x340] sm:$0xf]  ;;  %v934_v62 = vadd.f32 %v933_v43, %v921_v49  ;;  %v4428_v3 = vor.u32 %v5727_v56, %v4427_v4  ;;  %v5863_v16 = vld [vmem:[#allocation5 + $0x46c] sm:$0xf0] }
  0xbe   :  { %2929 = vmatpush.bf16.msrb.mxu1 %v4652_v50  ;;  %2955 = vmatpush.bf16.msrb.mxu3 %v4908_v63  ;;  %v4444_v50 = vor.u32 %v5731_v37, %v4443_v33  ;;  %v4411_v63 = vld [vmem:[#allocation5] sm:$0xf]  ;;  %v5875_v33 = vld [vmem:[#allocation5 + $0x4cc] sm:$0xf0]  ;;  %v4668_v43 = vor.u32 %v5787_v29, %v4667_v28 }
  0xbf   :  { %v1119_v19 = vmax.f32 %v934_v62, 0.0  ;;  %v4412_v24 = vor.u32 %v5723_v5, %v4411_v63  ;;  %v5147_v37 = vld [vmem:[#allocation5 + $0x5c0] sm:$0xf]  ;;  %v5935_v62 = vld [vmem:[#allocation5 + $0x6ac] sm:$0xf0] }
  0xc0   :  { %2917 = vmatpush.bf16.msrb.mxu0 %v4508_v59  ;;  %2943 = vmatpush.bf16.msrb.mxu2 %v4764_v8  ;;  %v946_v51 = vpop.f32.mrf.mxu2  ;;  %v5827_v59 = vld [vmem:[#allocation5 + $0x34c] sm:$0xf0]  ;;  %v4683_v8 = vld [vmem:[#allocation5 + $0x220] sm:$0xf] }
  0xc1   :  { %v947_v57 = vadd.f32 %v946_v51, %v249_v44  ;;  %v4828_v10 = vor.u32 %v5827_v59, %v4827_v58  ;;  %v4795_v38 = vld [vmem:[#allocation5 + $0x300] sm:$0xf]  ;;  %v6335_v40 = vpack.c.bf16 %v1119_v19, %v1119_v19 }
  0xc2   :  { %2930 = vmatpush.bf16.msrb.mxu1 %v4636_v0  ;;  %2956 = vmatpush.bf16.msrb.mxu3 %v4892_v13  ;;  %v959_v0 = vpop.f32.mrf.mxu3  ;;  %v922_v6 = vpop.f32.mrf.mxu0  ;;  %v5419_v44 = vld [vmem:[#allocation5 + $0x7e0] sm:$0xf]  ;;  %v4796_v49 = vor.u32 %v5819_v39, %v4795_v38  ;;  %v5959_v39 = vld [vmem:[#allocation5 + $0x76c] sm:$0xf0] }
  0xc3   :  { %v960_v7 = vadd.f32 %v959_v0, %v947_v57  ;;  %v5003_v51 = vld [vmem:[#allocation5 + $0x4a0] sm:$0xf]  ;;  %v5971_v57 = vld [vmem:[#allocation5 + $0x7cc] sm:$0xf0] }
  0xc4   :  { %2918 = vmatpush.bf16.msrb.mxu0 %v4492_v9  ;;  %2944 = vmatpush.bf16.msrb.mxu2 %v4748_v21  ;;  %v5791_v9 = vld [vmem:[#allocation5 + $0x22c] sm:$0xf0]  ;;  %v935_v13 = vpop.f32.mrf.mxu1  ;;  %v5403_v56 = vld [vmem:[#allocation5 + $0x7c0] sm:$0xf]  ;;  %v5004_v59 = vor.u32 %v5871_v52, %v5003_v51 }
  0xc5   :  { %v5911_v21 = vld [vmem:[#allocation5 + $0x5ec] sm:$0xf0]  ;;  %v1120_v25 = vmax.f32 %v960_v7, 0.0  ;;  %v4987_v0 = vld [vmem:[#allocation5 + $0x480] sm:$0xf]  ;;  %v5404_v5 = vor.u32 %v5971_v57, %v5403_v56 }
  0xc6   :  { %2931 = vmatpush.bf16.msrb.mxu1 %v4620_v14  ;;  %2957 = vmatpush.bf16.msrb.mxu3 %v4876_v26  ;;  %v4811_v14 = vld [vmem:[#allocation5 + $0x320] sm:$0xf]  ;;  %v5899_v6 = vld [vmem:[#allocation5 + $0x58c] sm:$0xf0] }
  0xc7   :  { %v5019_v26 = vld [vmem:[#allocation5 + $0x4c0] sm:$0xf]  ;;  %v4812_v30 = vor.u32 %v5823_v15, %v4811_v14  ;;  %v6337_v46 = vpack.c.bf16 %v1120_v25, %v1120_v25  ;;  %v251_v25 = vperm.slane %v6331_v23, 3 }
  0xc8   :  { %2919 = vmatpush.bf16.msrb.mxu0 %v4476_v22  ;;  %2945 = vmatpush.bf16.msrb.mxu2 %v4732_v35  ;;  %v4684_v22 = vor.u32 %v5791_v9, %v4683_v8  ;;  %v5943_v35 = vld [vmem:[#allocation5 + $0x6ec] sm:$0xf0]  ;;  %v5020_v48 = vor.u32 %v5875_v33, %v5019_v26  ;;  %v5387_v7 = vld [vmem:[#allocation5 + $0x7a0] sm:$0xf]  ;;  %v5260_v9 = vor.u32 %v5935_v62, %v5259_v61 }
  0xc9   :  { %v5292_v47 = vor.u32 %v5943_v35, %v5291_v34  ;;  %v5967_v8 = vld [vmem:[#allocation5 + $0x7ac] sm:$0xf0]  ;;  %v4971_v15 = vld [vmem:[#allocation5 + $0x460] sm:$0xf] }
  0xca   :  { %2932 = vmatpush.bf16.msrb.mxu1 %v4604_v27  ;;  %2958 = vmatpush.bf16.msrb.mxu3 %v4860_v41  ;;  %v948_v27 = vpop.f32.mrf.mxu2  ;;  %v5907_v41 = vld [vmem:[#allocation5 + $0x5cc] sm:$0xf0]  ;;  %v5388_v18 = vor.u32 %v5967_v8, %v5387_v7  ;;  %v4972_v28 = vor.u32 %v5863_v16, %v4971_v15  ;;  %v4955_v29 = vld [vmem:[#allocation5 + $0x440] sm:$0xf]  ;;  %v5749_v7 = vld [vmem:[#allocation5 + $0xe4] sm:$0xf] }
  0xcb   :  { %v5148_v4 = vor.u32 %v5907_v41, %v5147_v37  ;;  %v5859_v33 = vld [vmem:[#allocation5 + $0x44c] sm:$0xf0]  ;;  %v5083_v34 = vld [vmem:[#allocation5 + $0x540] sm:$0xf]  ;;  %v4525_v8 = vld [vmem:[#allocation5 + $0xf0] sm:$0xf0] }
  0xcc   :  { %2920 = vmatpush.bf16.msrb.mxu0 %v4460_v36  ;;  %2946 = vmatpush.bf16.msrb.mxu2 %v4716_v1  ;;  %v5164_v36 = vor.u32 %v5911_v21, %v5163_v20  ;;  %v5275_v1 = vld [vmem:[#allocation5 + $0x6c0] sm:$0xf]  ;;  %v5895_v21 = vld [vmem:[#allocation5 + $0x56c] sm:$0xf0] }
  0xcd   :  { %v5891_v35 = vld [vmem:[#allocation5 + $0x54c] sm:$0xf0]  ;;  %v5355_v38 = vld [vmem:[#allocation5 + $0x760] sm:$0xf] }
  0xce   :  { %2933 = vmatpush.bf16.msrb.mxu1 %v4588_v42  ;;  %2959 = vmatpush.bf16.msrb.mxu3 %v4844_v54  ;;  %v961_v42 = vpop.f32.mrf.mxu3  ;;  %v5420_v54 = vor.u32 %v5975_v45, %v5419_v44  ;;  %v4956_v44 = vor.u32 %v5859_v33, %v4955_v29  ;;  %v5211_v45 = vld [vmem:[#allocation5 + $0x640] sm:$0xf]  ;;  %v5356_v52 = vor.u32 %v5959_v39, %v5355_v38  ;;  %v5851_v62 = vld [vmem:[#allocation5 + $0x40c] sm:$0xf0]  ;;  %v5777_v29 = vld [vmem:[#allocation5 + $0x1c4] sm:$0xf] }
  0xcf   :  { %v4923_v57 = vld [vmem:[#allocation5 + $0x400] sm:$0xf]  ;;  %v5951_v15 = vld [vmem:[#allocation5 + $0x72c] sm:$0xf0]  ;;  %v5809_v39 = vld [vmem:[#allocation5 + $0x2c4] sm:$0xf] }
  0xd0   :  { %2921 = vmatpush.bf16.msrb.mxu0 %v4444_v50  ;;  %2947 = vmatpush.bf16.msrb.mxu2 %v4700_v2  ;;  %v5939_v50 = vld [vmem:[#allocation5 + $0x6cc] sm:$0xf0]  ;;  %v4924_v16 = vor.u32 %v5851_v62, %v4923_v57  ;;  %v5307_v33 = vld [vmem:[#allocation5 + $0x700] sm:$0xf]  ;;  %v4477_v57 = vld [vmem:[#allocation5 + $0x90] sm:$0xf0] }
  0xd1   :  { %v5276_v58 = vor.u32 %v5939_v50, %v5275_v1  ;;  %v5867_v2 = vld [vmem:[#allocation5 + $0x48c] sm:$0xf0]  ;;  %v5084_v1 = vor.u32 %v5891_v35, %v5083_v34  ;;  %v4939_v50 = vld [vmem:[#allocation5 + $0x420] sm:$0xf] }
  0xd2   :  { %2934 = vmatpush.bf16.msrb.mxu1 %v4572_v55  ;;  %2960 = vmatpush.bf16.msrb.mxu3 %v4828_v10  ;;  %v5903_v55 = vld [vmem:[#allocation5 + $0x5ac] sm:$0xf0]  ;;  %v4988_v10 = vor.u32 %v5867_v2, %v4987_v0 }
  0xd3   :  { %v5132_v63 = vor.u32 %v5903_v55, %v5131_v53  ;;  %v5067_v53 = vld [vmem:[#allocation5 + $0x520] sm:$0xf]  ;;  %v5919_v0 = vld [vmem:[#allocation5 + $0x62c] sm:$0xf0] }
  0xd4   :  { %2922 = vmatpush.bf16.msrb.mxu0 %v4428_v3  ;;  %2948 = vmatpush.bf16.msrb.mxu2 %v4684_v22  ;;  %v5115_v3 = vld [vmem:[#allocation5 + $0x580] sm:$0xf]  ;;  %v5947_v34 = vld [vmem:[#allocation5 + $0x70c] sm:$0xf0] }
  0xd5   :  { %v5116_v14 = vor.u32 %v5899_v6, %v5115_v3  ;;  %v5371_v22 = vld [vmem:[#allocation5 + $0x780] sm:$0xf]  ;;  %v5883_v6 = vld [vmem:[#allocation5 + $0x50c] sm:$0xf0] }
  0xd6   :  { %2935 = vmatpush.bf16.msrb.mxu1 %v4556_v11  ;;  %2961 = vmatpush.bf16.msrb.mxu3 %v4812_v30  ;;  %v5243_v11 = vld [vmem:[#allocation5 + $0x680] sm:$0xf] }
  0xd7   :  { %v5244_v26 = vor.u32 %v5931_v12, %v5243_v11  ;;  %v5227_v30 = vld [vmem:[#allocation5 + $0x660] sm:$0xf]  ;;  %v4653_v12 = vld [vmem:[#allocation5 + $0x1f0] sm:$0xf0] }
  0xd8   :  { %2923 = vmatpush.bf16.msrb.mxu0 %v4412_v24  ;;  %2949 = vmatpush.bf16.msrb.mxu2 %v4668_v43  ;;  %v972_v13 = vpop.f32.mrf.mxu0  ;;  %v5963_v24 = vld [vmem:[#allocation5 + $0x78c] sm:$0xf0] }
  0xd9   :  { %v973_v19 = vadd.f32 %v972_v13, %v250_v60  ;;  %v5955_v60 = vld [vmem:[#allocation5 + $0x74c] sm:$0xf0] }
  0xda   :  { %2936 = vmatpush.bf16.msrb.mxu1 %v4540_v31  ;;  %2962 = vmatpush.bf16.msrb.mxu3 %v4796_v49  ;;  %v985_v20 = vpop.f32.mrf.mxu1  ;;  %v5927_v31 = vld [vmem:[#allocation5 + $0x66c] sm:$0xf0] }
  0xdb   :  { %2924 = vmatmul.bf16.vlgmr.msrb.gmra.mxu0 %v6335_v40  ;;  %v986_v27 = vadd.f32 %v985_v20, %v973_v19  ;;  %v5228_v41 = vor.u32 %v5927_v31, %v5227_v30  ;;  %v5915_v19 = vld [vmem:[#allocation5 + $0x60c] sm:$0xf0]  ;;  %v4637_v31 = vld [vmem:[#allocation5 + $0x1d0] sm:$0xf0] }
  0xdc   :  { %2968 = vmatpush.bf16.msra.mxu0 %v5036_v32  ;;  %2994 = vmatpush.bf16.msra.mxu2 %v5292_v47  ;;  %v5100_v32 = vor.u32 %v5895_v21, %v5099_v17  ;;  %v5923_v47 = vld [vmem:[#allocation5 + $0x64c] sm:$0xf0]  ;;  %v4528_v21 = vor.u32 %v5749_v7, %v4525_v8  ;;  %v5733_v7 = vld [vmem:[#allocation5 + $0x64] sm:$0xf]  ;;  %v4461_v8 = vld [vmem:[#allocation5 + $0x70] sm:$0xf0] }
  0xdd   :  { %2937 = vmatmul.bf16.vlgmr.msrb.gmra.mxu1 %v6337_v46  ;;  %v1121_v37 = vmax.f32 %v986_v27, 0.0  ;;  %v5745_v27 = vld [vmem:[#allocation5 + $0xc4] sm:$0xf] }
  0xde   :  { %2981 = vmatpush.bf16.msra.mxu1 %v5164_v36  ;;  %3007 = vmatpush.bf16.msra.mxu3 %v5420_v54  ;;  %v5372_v36 = vor.u32 %v5963_v24, %v5371_v22  ;;  %v998_v43 = vpop.f32.mrf.mxu2  ;;  %v5887_v54 = vld [vmem:[#allocation5 + $0x52c] sm:$0xf0]  ;;  %v5813_v24 = vld [vmem:[#allocation5 + $0x2e4] sm:$0xf] }
  0xdf   :  { %v6343_v42 = vpack.c.bf16 %v1121_v37, %v1121_v37  ;;  %v5068_v3 = vor.u32 %v5887_v54, %v5067_v53  ;;  %v4909_v37 = vld [vmem:[#allocation5 + $0x3f0] sm:$0xf0]  ;;  %v5805_v53 = vld [vmem:[#allocation5 + $0x2a4] sm:$0xf] }
  0xe0   :  { %2969 = vmatpush.bf16.msra.mxu0 %v5020_v48  ;;  %2995 = vmatpush.bf16.msra.mxu2 %v5276_v58  ;;  %v999_v48 = vadd.f32 %v998_v43, %v251_v25  ;;  %v1011_v49 = vpop.f32.mrf.mxu3  ;;  %v974_v51 = vpop.f32.mrf.mxu0  ;;  %v5212_v58 = vor.u32 %v5923_v47, %v5211_v45  ;;  %v4781_v25 = vld [vmem:[#allocation5 + $0x2f0] sm:$0xf0]  ;;  %v4640_v43 = vor.u32 %v5777_v29, %v4637_v31 }
  0xe1   :  { %2950 = vmatmul.bf16.vlgmr.msrb.gmra.mxu2 %v6343_v42  ;;  %v4784_v35 = vor.u32 %v5813_v24, %v4781_v25  ;;  %v4493_v45 = vld [vmem:[#allocation5 + $0xb0] sm:$0xf0]  ;;  %v5308_v47 = vor.u32 %v5947_v34, %v5307_v33  ;;  %v5729_v25 = vld [vmem:[#allocation5 + $0x44] sm:$0xf] }
  0xe2   :  { %2982 = vmatpush.bf16.msra.mxu1 %v5148_v4  ;;  %3008 = vmatpush.bf16.msra.mxu3 %v5404_v5  ;;  %v5855_v4 = vld [vmem:[#allocation5 + $0x42c] sm:$0xf0]  ;;  %v987_v55 = vpop.f32.mrf.mxu1  ;;  %v1012_v56 = vadd.f32 %v1011_v49, %v999_v48  ;;  %v5051_v5 = vld [vmem:[#allocation5 + $0x500] sm:$0xf]  ;;  %v5773_v48 = vld [vmem:[#allocation5 + $0x1a4] sm:$0xf] }
  0xe3   :  { %v4940_v61 = vor.u32 %v5855_v4, %v4939_v50  ;;  %v5052_v20 = vor.u32 %v5883_v6, %v5051_v5  ;;  %v4621_v49 = vld [vmem:[#allocation5 + $0x1b0] sm:$0xf0]  ;;  %v5841_v4 = vld [vmem:[#allocation5 + $0x3c4] sm:$0xf] }
  0xe4   :  { %2970 = vmatpush.bf16.msra.mxu0 %v5004_v59  ;;  %2996 = vmatpush.bf16.msra.mxu2 %v5260_v9  ;;  %v5339_v59 = vld [vmem:[#allocation5 + $0x740] sm:$0xf]  ;;  %v1122_v2 = vmax.f32 %v1012_v56, 0.0  ;;  %v5781_v9 = vld [vmem:[#allocation5 + $0x1e4] sm:$0xf]  ;;  %v4624_v55 = vor.u32 %v5773_v48, %v4621_v49 }
  0xe5   :  { %v4893_v51 = vld [vmem:[#allocation5 + $0x3d0] sm:$0xf0]  ;;  %v5737_v56 = vld [vmem:[#allocation5 + $0x84] sm:$0xf] }
  0xe6   :  { %2983 = vmatpush.bf16.msra.mxu1 %v5132_v63  ;;  %3009 = vmatpush.bf16.msra.mxu3 %v5388_v18  ;;  %v5195_v63 = vld [vmem:[#allocation5 + $0x620] sm:$0xf]  ;;  %v6346_v11 = vpack.c.bf16 %v1122_v2, %v1122_v2  ;;  %v1000_v17 = vpop.f32.mrf.mxu2  ;;  %v4749_v54 = vld [vmem:[#allocation5 + $0x2b0] sm:$0xf0]  ;;  %v4480_v2 = vor.u32 %v5737_v56, %v4477_v57  ;;  %v5829_v33 = vld [vmem:[#allocation5 + $0x364] sm:$0xf] }
  0xe7   :  { %v5196_v13 = vor.u32 %v5919_v0, %v5195_v63  ;;  %v5179_v18 = vld [vmem:[#allocation5 + $0x600] sm:$0xf]  ;;  %v4752_v62 = vor.u32 %v5805_v53, %v4749_v54  ;;  %v5837_v63 = vld [vmem:[#allocation5 + $0x3a4] sm:$0xf]  ;;  %v4877_v0 = vld [vmem:[#allocation5 + $0x3b0] sm:$0xf0] }
  0xe8   :  { %2971 = vmatpush.bf16.msra.mxu0 %v4988_v10  ;;  %2997 = vmatpush.bf16.msra.mxu2 %v5244_v26  ;;  %v5340_v10 = vor.u32 %v5955_v60, %v5339_v59  ;;  %v1013_v22 = vpop.f32.mrf.mxu3  ;;  %v4656_v26 = vor.u32 %v5781_v9, %v4653_v12  ;;  %v4605_v59 = vld [vmem:[#allocation5 + $0x190] sm:$0xf0]  ;;  %v4896_v60 = vor.u32 %v5841_v4, %v4893_v51  ;;  %v5833_v17 = vld [vmem:[#allocation5 + $0x384] sm:$0xf] }
  0xe9   :  { %2963 = vmatmul.bf16.vlgmr.msrb.gmra.mxu3 %v6346_v11  ;;  %v4733_v5 = vld [vmem:[#allocation5 + $0x290] sm:$0xf0]  ;;  %v5757_v48 = vld [vmem:[#allocation5 + $0x124] sm:$0xf] }
  0xea   :  { %2984 = vmatpush.bf16.msra.mxu1 %v5116_v14  ;;  %3010 = vmatpush.bf16.msra.mxu3 %v5372_v36  ;;  %v5323_v14 = vld [vmem:[#allocation5 + $0x720] sm:$0xf]  ;;  %v5845_v36 = vld [vmem:[#allocation5 + $0x3e4] sm:$0xf]  ;;  %v4589_v12 = vld [vmem:[#allocation5 + $0x170] sm:$0xf0] }
  0xeb   :  { %v5324_v30 = vor.u32 %v5951_v15, %v5323_v14  ;;  %v4573_v29 = vld [vmem:[#allocation5 + $0x150] sm:$0xf0]  ;;  %v5721_v4 = vld [vmem:[#allocation5 + $0x4] sm:$0xf] }
  0xec   :  { %2972 = vmatpush.bf16.msra.mxu0 %v4972_v28  ;;  %2998 = vmatpush.bf16.msra.mxu2 %v5228_v41  ;;  %v4509_v28 = vld [vmem:[#allocation5 + $0xd0] sm:$0xf0]  ;;  %v5825_v53 = vld [vmem:[#allocation5 + $0x344] sm:$0xf] }
  0xed   :  { %v4512_v38 = vor.u32 %v5745_v27, %v4509_v28  ;;  %v4765_v41 = vld [vmem:[#allocation5 + $0x2d0] sm:$0xf0]  ;;  %v253_v27 = vperm.slane %v6331_v23, 5  ;;  %v5761_v28 = vld [vmem:[#allocation5 + $0x144] sm:$0xf] }
  0xee   :  { %2985 = vmatpush.bf16.msra.mxu1 %v5100_v32  ;;  %3011 = vmatpush.bf16.msra.mxu3 %v5356_v52  ;;  %v5180_v32 = vor.u32 %v5915_v19, %v5179_v18  ;;  %v4768_v50 = vor.u32 %v5809_v39, %v4765_v41  ;;  %v4861_v18 = vld [vmem:[#allocation5 + $0x390] sm:$0xf0]  ;;  %v4464_v19 = vor.u32 %v5733_v7, %v4461_v8  ;;  %v5821_v8 = vld [vmem:[#allocation5 + $0x324] sm:$0xf] }
  0xef   :  { %v4845_v34 = vld [vmem:[#allocation5 + $0x370] sm:$0xf0]  ;;  %v4576_v41 = vor.u32 %v5761_v28, %v4573_v29 }
  0xf0   :  { %2973 = vmatpush.bf16.msra.mxu0 %v4956_v44  ;;  %2999 = vmatpush.bf16.msra.mxu2 %v5212_v58  ;;  %v5741_v44 = vld [vmem:[#allocation5 + $0xa4] sm:$0xf]  ;;  %v4557_v49 = vld [vmem:[#allocation5 + $0x130] sm:$0xf0] }
  0xf1   :  { %v4496_v52 = vor.u32 %v5741_v44, %v4493_v45  ;;  %v5769_v58 = vld [vmem:[#allocation5 + $0x184] sm:$0xf]  ;;  %v4429_v44 = vld [vmem:[#allocation5 + $0x30] sm:$0xf0] }
  0xf2   :  { %2986 = vmatpush.bf16.msra.mxu1 %v5084_v1  ;;  %3012 = vmatpush.bf16.msra.mxu3 %v5340_v10  ;;  %v4912_v1 = vor.u32 %v5845_v36, %v4909_v37  ;;  %v4608_v6 = vor.u32 %v5769_v58, %v4605_v59  ;;  %v5765_v10 = vld [vmem:[#allocation5 + $0x164] sm:$0xf]  ;;  %v4701_v37 = vld [vmem:[#allocation5 + $0x250] sm:$0xf0] }
  0xf3   :  { %v4592_v24 = vor.u32 %v5765_v10, %v4589_v12  ;;  %v5793_v36 = vld [vmem:[#allocation5 + $0x244] sm:$0xf]  ;;  %v4829_v54 = vld [vmem:[#allocation5 + $0x350] sm:$0xf0] }
  0xf4   :  { %2974 = vmatpush.bf16.msra.mxu0 %v4940_v61  ;;  %3000 = vmatpush.bf16.msra.mxu2 %v5196_v13  ;;  %v252_v61 = vperm.slane %v6331_v23, 4  ;;  %v4880_v13 = vor.u32 %v5837_v63, %v4877_v0  ;;  %v4413_v57 = vld [vmem:[#allocation5 + $0x10] sm:$0xf0]  ;;  %v5789_v58 = vld [vmem:[#allocation5 + $0x224] sm:$0xf] }
  0xf5   :  { %v4685_v59 = vld [vmem:[#allocation5 + $0x230] sm:$0xf0]  ;;  %v5877_v63 = vld [vmem:[#allocation5 + $0x4e4] sm:$0xf]  ;;  %v4416_v12 = vor.u32 %v5721_v4, %v4413_v57 }
  0xf6   :  { %2987 = vmatpush.bf16.msra.mxu1 %v5068_v3  ;;  %3013 = vmatpush.bf16.msra.mxu3 %v5324_v30  ;;  %v5801_v3 = vld [vmem:[#allocation5 + $0x284] sm:$0xf]  ;;  %v4864_v30 = vor.u32 %v5833_v17, %v4861_v18  ;;  %v4688_v7 = vor.u32 %v5789_v58, %v4685_v59  ;;  %v4797_v28 = vld [vmem:[#allocation5 + $0x310] sm:$0xf0] }
  0xf7   :  { %v5893_v4 = vld [vmem:[#allocation5 + $0x564] sm:$0xf]  ;;  %v4957_v58 = vld [vmem:[#allocation5 + $0x450] sm:$0xf0] }
  0xf8   :  { %2975 = vmatpush.bf16.msra.mxu0 %v4924_v16  ;;  %3001 = vmatpush.bf16.msra.mxu2 %v5180_v32  ;;  %v1024_v9 = vpop.f32.mrf.mxu0  ;;  %v4736_v16 = vor.u32 %v5801_v3, %v4733_v5  ;;  %v5909_v3 = vld [vmem:[#allocation5 + $0x5e4] sm:$0xf]  ;;  %v4832_v5 = vor.u32 %v5825_v53, %v4829_v54 }
  0xf9   :  { %v1025_v14 = vadd.f32 %v1024_v9, %v252_v61  ;;  %v5753_v61 = vld [vmem:[#allocation5 + $0x104] sm:$0xf]  ;;  %v4813_v9 = vld [vmem:[#allocation5 + $0x330] sm:$0xf0] }
  0xfa   :  { %2988 = vmatpush.bf16.msra.mxu1 %v5052_v20  ;;  %3014 = vmatpush.bf16.msra.mxu3 %v5308_v47  ;;  %v1037_v15 = vpop.f32.mrf.mxu1  ;;  %v5797_v20 = vld [vmem:[#allocation5 + $0x264] sm:$0xf] }
  0xfb   :  { %v1038_v22 = vadd.f32 %v1037_v15, %v1025_v14  ;;  %v4669_v14 = vld [vmem:[#allocation5 + $0x210] sm:$0xf0]  ;;  %v5941_v59 = vld [vmem:[#allocation5 + $0x6e4] sm:$0xf] }
  0xfc   :  { %3020 = vmatpush.bf16.msrb.mxu0 %v4528_v21  ;;  %3046 = vmatpush.bf16.msrb.mxu2 %v4784_v35  ;;  %v4717_v21 = vld [vmem:[#allocation5 + $0x270] sm:$0xf0] }
  0xfd   :  { %v1123_v31 = vmax.f32 %v1038_v22, 0.0  ;;  %v4720_v32 = vor.u32 %v5797_v20, %v4717_v21  ;;  %v5873_v20 = vld [vmem:[#allocation5 + $0x4c4] sm:$0xf]  ;;  %v5021_v21 = vld [vmem:[#allocation5 + $0x4d0] sm:$0xf0] }
  0xfe   :  { %3033 = vmatpush.bf16.msrb.mxu1 %v4656_v26  ;;  %3059 = vmatpush.bf16.msrb.mxu3 %v4912_v1  ;;  %v4445_v26 = vld [vmem:[#allocation5 + $0x50] sm:$0xf0]  ;;  %v1050_v39 = vpop.f32.mrf.mxu2  ;;  %v5905_v22 = vld [vmem:[#allocation5 + $0x5c4] sm:$0xf]  ;;  %v5024_v29 = vor.u32 %v5873_v20, %v5021_v21 }
  0xff   :  { %v4448_v35 = vor.u32 %v5729_v25, %v4445_v26  ;;  %v1051_v45 = vadd.f32 %v1050_v39, %v253_v27  ;;  %v5149_v25 = vld [vmem:[#allocation5 + $0x5d0] sm:$0xf0]  ;;  %v5817_v27 = vld [vmem:[#allocation5 + $0x304] sm:$0xf] }
 0x100   :  { %3021 = vmatpush.bf16.msrb.mxu0 %v4512_v38  ;;  %3047 = vmatpush.bf16.msrb.mxu2 %v4768_v50  ;;  %v6351_v38 = vpack.c.bf16 %v1123_v31, %v1123_v31  ;;  %v1063_v47 = vpop.f32.mrf.mxu3  ;;  %v1026_v1 = vpop.f32.mrf.mxu0  ;;  %v4848_v50 = vor.u32 %v5829_v33, %v4845_v34  ;;  %v5869_v31 = vld [vmem:[#allocation5 + $0x4a4] sm:$0xf]  ;;  %v4800_v33 = vor.u32 %v5817_v27, %v4797_v28  ;;  %v5421_v20 = vld [vmem:[#allocation5 + $0x7f0] sm:$0xf0] }
 0x101   :  { %v5901_v34 = vld [vmem:[#allocation5 + $0x5a4] sm:$0xf]  ;;  %v4973_v1 = vld [vmem:[#allocation5 + $0x470] sm:$0xf0] }
 0x102   :  { %3034 = vmatpush.bf16.msrb.mxu1 %v4640_v43  ;;  %3060 = vmatpush.bf16.msrb.mxu3 %v4896_v60  ;;  %v5725_v43 = vld [vmem:[#allocation5 + $0x24] sm:$0xf]  ;;  %v1039_v51 = vpop.f32.mrf.mxu1  ;;  %v4560_v60 = vor.u32 %v5757_v48, %v4557_v49 }
 0x103   :  { %2976 = vmatmul.bf16.vlgmr.msra.gmra.mxu0 %v6351_v38  ;;  %v4432_v56 = vor.u32 %v5725_v43, %v4429_v44  ;;  %v5865_v39 = vld [vmem:[#allocation5 + $0x484] sm:$0xf]  ;;  %v5117_v44 = vld [vmem:[#allocation5 + $0x590] sm:$0xf0] }
 0x104   :  { %3022 = vmatpush.bf16.msrb.mxu0 %v4496_v52  ;;  %3048 = vmatpush.bf16.msrb.mxu2 %v4752_v62  ;;  %v4704_v52 = vor.u32 %v5793_v36, %v4701_v37  ;;  %v4541_v62 = vld [vmem:[#allocation5 + $0x110] sm:$0xf0]  ;;  %v5897_v43 = vld [vmem:[#allocation5 + $0x584] sm:$0xf] }
 0x105   :  { %v4544_v15 = vor.u32 %v5753_v61, %v4541_v62  ;;  %v5120_v48 = vor.u32 %v5897_v43, %v5117_v44  ;;  %v5861_v49 = vld [vmem:[#allocation5 + $0x464] sm:$0xf]  ;;  %v5101_v51 = vld [vmem:[#allocation5 + $0x570] sm:$0xf0]  ;;  %v255_v61 = vperm.slane %v6331_v23, 7 }
 0x106   :  { %3035 = vmatpush.bf16.msrb.mxu1 %v4624_v55  ;;  %3061 = vmatpush.bf16.msrb.mxu3 %v4880_v13  ;;  %v1064_v55 = vadd.f32 %v1063_v47, %v1051_v45  ;;  %v5785_v13 = vld [vmem:[#allocation5 + $0x204] sm:$0xf]  ;;  %v1052_v17 = vpop.f32.mrf.mxu2  ;;  %v254_v45 = vperm.slane %v6331_v23, 6  ;;  %v4976_v54 = vor.u32 %v5861_v49, %v4973_v1  ;;  %v5104_v57 = vor.u32 %v5893_v4, %v5101_v51  ;;  %v5069_v23 = vld [vmem:[#allocation5 + $0x530] sm:$0xf0] }
 0x107   :  { %v4672_v26 = vor.u32 %v5785_v13, %v4669_v14  ;;  %v5889_v62 = vld [vmem:[#allocation5 + $0x544] sm:$0xf]  ;;  %v5277_v13 = vld [vmem:[#allocation5 + $0x6d0] sm:$0xf0] }
 0x108   :  { %3023 = vmatpush.bf16.msrb.mxu0 %v4480_v2  ;;  %3049 = vmatpush.bf16.msrb.mxu2 %v4736_v16  ;;  %v1124_v0 = vmax.f32 %v1064_v55, 0.0  ;;  %v5037_v2 = vld [vmem:[#allocation5 + $0x4f0] sm:$0xf0]  ;;  %v5857_v55 = vld [vmem:[#allocation5 + $0x444] sm:$0xf] }
 0x109   :  { %v5040_v16 = vor.u32 %v5877_v63, %v5037_v2  ;;  %v5085_v63 = vld [vmem:[#allocation5 + $0x550] sm:$0xf0]  ;;  %v4960_v2 = vor.u32 %v5857_v55, %v4957_v58  ;;  %v5885_v17 = vld [vmem:[#allocation5 + $0x524] sm:$0xf]  ;;  %v4643_v55 = vld [vmem:[#allocation5 + $0x1c8] sm:$0xf] }
 0x10a   :  { %3036 = vmatpush.bf16.msrb.mxu1 %v4608_v6  ;;  %3062 = vmatpush.bf16.msrb.mxu3 %v4864_v30  ;;  %v5165_v6 = vld [vmem:[#allocation5 + $0x5f0] sm:$0xf0]  ;;  %v6354_v10 = vpack.c.bf16 %v1124_v0, %v1124_v0  ;;  %v5152_v30 = vor.u32 %v5905_v22, %v5149_v25  ;;  %v5849_v25 = vld [vmem:[#allocation5 + $0x404] sm:$0xf]  ;;  %v5072_v28 = vor.u32 %v5885_v17, %v5069_v23  ;;  %v4483_v17 = vld [vmem:[#allocation5 + $0x88] sm:$0xf] }
 0x10b   :  { %v5168_v18 = vor.u32 %v5909_v3, %v5165_v6  ;;  %v5881_v27 = vld [vmem:[#allocation5 + $0x504] sm:$0xf]  ;;  %v5740_v23 = vld [vmem:[#allocation5 + $0x94] sm:$0xf0] }
 0x10c   :  { %3024 = vmatpush.bf16.msrb.mxu0 %v4464_v19  ;;  %3050 = vmatpush.bf16.msrb.mxu2 %v4720_v32  ;;  %v1065_v19 = vpop.f32.mrf.mxu3  ;;  %v5005_v32 = vld [vmem:[#allocation5 + $0x4b0] sm:$0xf0]  ;;  %v5969_v44 = vld [vmem:[#allocation5 + $0x7c4] sm:$0xf] }
 0x10d   :  { %2989 = vmatmul.bf16.vlgmr.msra.gmra.mxu1 %v6354_v10  ;;  %v5008_v36 = vor.u32 %v5869_v31, %v5005_v32  ;;  %v5973_v19 = vld [vmem:[#allocation5 + $0x7e4] sm:$0xf]  ;;  %v5261_v31 = vld [vmem:[#allocation5 + $0x6b0] sm:$0xf0] }
 0x10e   :  { %3037 = vmatpush.bf16.msrb.mxu1 %v4592_v24  ;;  %3063 = vmatpush.bf16.msrb.mxu3 %v4848_v50  ;;  %v4816_v24 = vor.u32 %v5821_v8, %v4813_v9  ;;  %v5088_v8 = vor.u32 %v5889_v62, %v5085_v63  ;;  %v4941_v9 = vld [vmem:[#allocation5 + $0x430] sm:$0xf0]  ;;  %v5929_v1 = vld [vmem:[#allocation5 + $0x684] sm:$0xf] }
 0x10f   :  { %v5965_v58 = vld [vmem:[#allocation5 + $0x7a4] sm:$0xf]  ;;  %v5229_v62 = vld [vmem:[#allocation5 + $0x670] sm:$0xf0] }
 0x110   :  { %3025 = vmatpush.bf16.msrb.mxu0 %v4448_v35  ;;  %3051 = vmatpush.bf16.msrb.mxu2 %v4704_v52  ;;  %v5133_v35 = vld [vmem:[#allocation5 + $0x5b0] sm:$0xf0] }
 0x111   :  { %v5136_v37 = vor.u32 %v5901_v34, %v5133_v35  ;;  %v5752_v34 = vld [vmem:[#allocation5 + $0xf4] sm:$0xf0]  ;;  %v5424_v35 = vor.u32 %v5973_v19, %v5421_v20  ;;  %v4611_v19 = vld [vmem:[#allocation5 + $0x188] sm:$0xf] }
 0x112   :  { %3038 = vmatpush.bf16.msrb.mxu1 %v4576_v41  ;;  %3064 = vmatpush.bf16.msrb.mxu3 %v4832_v5  ;;  %v4989_v41 = vld [vmem:[#allocation5 + $0x490] sm:$0xf0]  ;;  %v5853_v5 = vld [vmem:[#allocation5 + $0x424] sm:$0xf]  ;;  %v5772_v20 = vld [vmem:[#allocation5 + $0x194] sm:$0xf0] }
 0x113   :  { %v4992_v47 = vor.u32 %v5865_v39, %v4989_v41  ;;  %v4944_v22 = vor.u32 %v5853_v5, %v4941_v9  ;;  %v4627_v5 = vld [vmem:[#allocation5 + $0x1a8] sm:$0xf]  ;;  %v5961_v9 = vld [vmem:[#allocation5 + $0x784] sm:$0xf] }
 0x114   :  { %3026 = vmatpush.bf16.msrb.mxu0 %v4432_v56  ;;  %3052 = vmatpush.bf16.msrb.mxu2 %v4688_v7 }
 0x116   :  { %3039 = vmatpush.bf16.msrb.mxu1 %v4560_v60  ;;  %3065 = vmatpush.bf16.msrb.mxu3 %v4816_v24  ;;  %v5293_v60 = vld [vmem:[#allocation5 + $0x6f0] sm:$0xf0] }
 0x117   :  { %v5296_v3 = vor.u32 %v5941_v59, %v5293_v60  ;;  %v5389_v59 = vld [vmem:[#allocation5 + $0x7b0] sm:$0xf0] }
 0x118   :  { %3027 = vmatpush.bf16.msrb.mxu0 %v4416_v12  ;;  %3053 = vmatpush.bf16.msrb.mxu2 %v4672_v26  ;;  %v1076_v50 = vpop.f32.mrf.mxu0  ;;  %v5937_v12 = vld [vmem:[#allocation5 + $0x6c4] sm:$0xf]  ;;  %v4925_v26 = vld [vmem:[#allocation5 + $0x410] sm:$0xf0] }
 0x119   :  { %v1077_v52 = vadd.f32 %v1076_v50, %v254_v45  ;;  %v5280_v24 = vor.u32 %v5937_v12, %v5277_v13  ;;  %v4928_v41 = vor.u32 %v5849_v25, %v4925_v26  ;;  %v5405_v45 = vld [vmem:[#allocation5 + $0x7d0] sm:$0xf0]  ;;  %v4484_v25 = vor.u32 %v5740_v23, %v4483_v17  ;;  %v5917_v26 = vld [vmem:[#allocation5 + $0x624] sm:$0xf]  ;;  %v5724_v17 = vld [vmem:[#allocation5 + $0x14] sm:$0xf0] }
 0x11a   :  { %3040 = vmatpush.bf16.msrb.mxu1 %v4544_v15  ;;  %3066 = vmatpush.bf16.msrb.mxu3 %v4800_v33  ;;  %v1089_v53 = vpop.f32.mrf.mxu1  ;;  %v4531_v33 = vld [vmem:[#allocation5 + $0xe8] sm:$0xf]  ;;  %v5245_v50 = vld [vmem:[#allocation5 + $0x690] sm:$0xf0] }
 0x11b   :  { %3028 = vmatmul.bf16.vlgmr.msrb.gmra.mxu0 %v6335_v40  ;;  %v1090_v56 = vadd.f32 %v1089_v53, %v1077_v52  ;;  %v4532_v49 = vor.u32 %v5752_v34, %v4531_v33  ;;  %v4515_v52 = vld [vmem:[#allocation5 + $0xc8] sm:$0xf]  ;;  %v5748_v53 = vld [vmem:[#allocation5 + $0xd4] sm:$0xf0]  ;;  %v5373_v12 = vld [vmem:[#allocation5 + $0x790] sm:$0xf0] }
 0x11c   :  { %3072 = vmatpush.bf16.msra.mxu0 %v5040_v16  ;;  %v4516_v60 = vor.u32 %v5748_v53, %v4515_v52  ;;  %v5768_v33 = vld [vmem:[#allocation5 + $0x174] sm:$0xf0]  ;;  %v5949_v53 = vld [vmem:[#allocation5 + $0x724] sm:$0xf]  ;;  %v4755_v23 = vld [vmem:[#allocation5 + $0x2a8] sm:$0xf] }
 0x11d   :  { %3041 = vmatmul.bf16.vlgmr.msrb.gmra.mxu1 %v6337_v46  ;;  %v1125_v0 = vmax.f32 %v1090_v56, 0.0  ;;  %v5780_v56 = vld [vmem:[#allocation5 + $0x1d4] sm:$0xf0] }
 0x11e   :  { %3085 = vmatpush.bf16.msra.mxu1 %v5168_v18  ;;  %v1102_v7 = vpop.f32.mrf.mxu2  ;;  %v4644_v63 = vor.u32 %v5780_v56, %v4643_v55 }
 0x11f   :  { %v6361_v6 = vpack.c.bf16 %v1125_v0, %v1125_v0  ;;  %v1103_v14 = vadd.f32 %v1102_v7, %v255_v61  ;;  %v5925_v61 = vld [vmem:[#allocation5 + $0x664] sm:$0xf]  ;;  %v4499_v0 = vld [vmem:[#allocation5 + $0xa8] sm:$0xf]  ;;  %v5776_v7 = vld [vmem:[#allocation5 + $0x1b4] sm:$0xf0] }
 0x120   :  { %3073 = vmatpush.bf16.msra.mxu0 %v5024_v29  ;;  %v1115_v15 = vpop.f32.mrf.mxu3  ;;  %v1078_v16 = vpop.f32.mrf.mxu0  ;;  %v5053_v29 = vld [vmem:[#allocation5 + $0x510] sm:$0xf0] }
 0x121   :  { %3002 = vmatmul.bf16.vlgmr.msra.gmra.mxu2 %v6361_v6  ;;  %v1116_v21 = vadd.f32 %v1115_v15, %v1103_v14  ;;  %v5921_v14 = vld [vmem:[#allocation5 + $0x644] sm:$0xf]  ;;  %v5213_v15 = vld [vmem:[#allocation5 + $0x650] sm:$0xf0]  ;;  %v4628_v16 = vor.u32 %v5776_v7, %v4627_v5 }
 0x122   :  { %3086 = vmatpush.bf16.msra.mxu1 %v5152_v30  ;;  %v1091_v18 = vpop.f32.mrf.mxu1  ;;  %3098 = vmatpush.bf16.msra.mxu2 %v5296_v3  ;;  %v5933_v30 = vld [vmem:[#allocation5 + $0x6a4] sm:$0xf]  ;;  %v5392_v3 = vor.u32 %v5965_v58, %v5389_v59  ;;  %v4435_v58 = vld [vmem:[#allocation5 + $0x28] sm:$0xf]  ;;  %v5309_v5 = vld [vmem:[#allocation5 + $0x710] sm:$0xf0] }
 0x123   :  { %v1126_v32 = vmax.f32 %v1116_v21, 0.0  ;;  %v5264_v43 = vor.u32 %v5933_v30, %v5261_v31  ;;  %v5376_v18 = vor.u32 %v5961_v9, %v5373_v12  ;;  %v5216_v21 = vor.u32 %v5921_v14, %v5213_v15  ;;  %v5736_v30 = vld [vmem:[#allocation5 + $0x74] sm:$0xf0]  ;;  %v4915_v12 = vld [vmem:[#allocation5 + $0x3e8] sm:$0xf] }
 0x124   :  { %3074 = vmatpush.bf16.msra.mxu0 %v5008_v36  ;;  %v4659_v36 = vld [vmem:[#allocation5 + $0x1e8] sm:$0xf] }
 0x125   :  { %v6364_v39 = vpack.c.bf16 %v1126_v32, %v1126_v32  ;;  %v4595_v32 = vld [vmem:[#allocation5 + $0x168] sm:$0xf] }
 0x126   :  { %3087 = vmatpush.bf16.msra.mxu1 %v5136_v37  ;;  %v5784_v37 = vld [vmem:[#allocation5 + $0x1f4] sm:$0xf0]  ;;  %3099 = vmatpush.bf16.msra.mxu2 %v5280_v24  ;;  %v5357_v24 = vld [vmem:[#allocation5 + $0x770] sm:$0xf0]  ;;  %v4419_v14 = vld [vmem:[#allocation5 + $0x8] sm:$0xf] }
 0x127   :  { %3015 = vmatmul.bf16.vlgmr.msra.gmra.mxu3 %v6364_v39  ;;  %v4660_v51 = vor.u32 %v5784_v37, %v4659_v36  ;;  %v5341_v36 = vld [vmem:[#allocation5 + $0x750] sm:$0xf0] }
 0x128   :  { %3075 = vmatpush.bf16.msra.mxu0 %v4992_v47  ;;  %v1104_v47 = vpop.f32.mrf.mxu2  ;;  %v1117_v4 = vpop.f32.mrf.mxu3  ;;  %3111 = vmatpush.bf16.msra.mxu3 %v5424_v35  ;;  %v5953_v35 = vld [vmem:[#allocation5 + $0x744] sm:$0xf] }
 0x129   :  { %v4596_v47 = vor.u32 %v5768_v33, %v4595_v32  ;;  %v4579_v4 = vld [vmem:[#allocation5 + $0x148] sm:$0xf]  ;;  %v5844_v33 = vld [vmem:[#allocation5 + $0x3d4] sm:$0xf0] }
 0x12a   :  { %3088 = vmatpush.bf16.msra.mxu1 %v5120_v48  ;;  %v5056_v48 = vor.u32 %v5881_v27, %v5053_v29  ;;  %3100 = vmatpush.bf16.msra.mxu2 %v5264_v43  ;;  %v5197_v27 = vld [vmem:[#allocation5 + $0x630] sm:$0xf0]  ;;  %v4467_v29 = vld [vmem:[#allocation5 + $0x68] sm:$0xf]  ;;  %v5913_v43 = vld [vmem:[#allocation5 + $0x604] sm:$0xf] }
 0x12b   :  { %v5200_v34 = vor.u32 %v5917_v26, %v5197_v27  ;;  %v5880_v26 = vld [vmem:[#allocation5 + $0x4f4] sm:$0xf0]  ;;  %v5171_v27 = vld [vmem:[#allocation5 + $0x5e8] sm:$0xf] }
 0x12c   :  { %3076 = vmatpush.bf16.msra.mxu0 %v4976_v54  ;;  %v5408_v54 = vor.u32 %v5969_v44, %v5405_v45  ;;  %v5181_v44 = vld [vmem:[#allocation5 + $0x610] sm:$0xf0]  ;;  %v4451_v45 = vld [vmem:[#allocation5 + $0x48] sm:$0xf] }
 0x12d   :  { %v5184_v52 = vor.u32 %v5913_v43, %v5181_v44  ;;  %v4899_v32 = vld [vmem:[#allocation5 + $0x3c8] sm:$0xf] }
 0x12e   :  { %3089 = vmatpush.bf16.msra.mxu1 %v5104_v57  ;;  %v5248_v57 = vor.u32 %v5929_v1, %v5245_v50  ;;  %3112 = vmatpush.bf16.msra.mxu3 %v5408_v54  ;;  %v5816_v1 = vld [vmem:[#allocation5 + $0x2f4] sm:$0xf0]  ;;  %v5344_v50 = vor.u32 %v5953_v35, %v5341_v36  ;;  %v5325_v54 = vld [vmem:[#allocation5 + $0x730] sm:$0xf0]  ;;  %v4739_v35 = vld [vmem:[#allocation5 + $0x288] sm:$0xf] }
 0x12f   :  { %v5804_v36 = vld [vmem:[#allocation5 + $0x294] sm:$0xf0]  ;;  %v5027_v44 = vld [vmem:[#allocation5 + $0x4c8] sm:$0xf] }
 0x130   :  { %3077 = vmatpush.bf16.msra.mxu0 %v4960_v2  ;;  %v5744_v2 = vld [vmem:[#allocation5 + $0xb4] sm:$0xf0]  ;;  %3101 = vmatpush.bf16.msra.mxu2 %v5248_v57 }
 0x131   :  { %v4500_v13 = vor.u32 %v5744_v2, %v4499_v0  ;;  %3054 = vmatmul.bf16.vlgmr.msrb.gmra.mxu2 %v6343_v42  ;;  %v4563_v0 = vld [vmem:[#allocation5 + $0x128] sm:$0xf]  ;;  %v5760_v2 = vld [vmem:[#allocation5 + $0x134] sm:$0xf0] }
 0x132   :  { %3090 = vmatpush.bf16.msra.mxu1 %v5088_v8  ;;  %v5232_v8 = vor.u32 %v5925_v61, %v5229_v62  ;;  %3113 = vmatpush.bf16.msra.mxu3 %v5392_v3  ;;  %v4771_v61 = vld [vmem:[#allocation5 + $0x2c8] sm:$0xf]  ;;  %v5812_v62 = vld [vmem:[#allocation5 + $0x2d4] sm:$0xf0]  ;;  %v5945_v3 = vld [vmem:[#allocation5 + $0x704] sm:$0xf] }
 0x133   :  { %v4772_v9 = vor.u32 %v5812_v62, %v4771_v61  ;;  %v5139_v61 = vld [vmem:[#allocation5 + $0x5a8] sm:$0xf]  ;;  %v5904_v62 = vld [vmem:[#allocation5 + $0x5b4] sm:$0xf0] }
 0x134   :  { %3078 = vmatpush.bf16.msra.mxu0 %v4944_v22  ;;  %3102 = vmatpush.bf16.msra.mxu2 %v5232_v8  ;;  %v5957_v22 = vld [vmem:[#allocation5 + $0x764] sm:$0xf] }
 0x135   :  { %v5360_v31 = vor.u32 %v5957_v22, %v5357_v24  ;;  %v5043_v22 = vld [vmem:[#allocation5 + $0x4e8] sm:$0xf] }
 0x136   :  { %3091 = vmatpush.bf16.msra.mxu1 %v5072_v28  ;;  %v4612_v28 = vor.u32 %v5772_v20, %v4611_v19  ;;  %3114 = vmatpush.bf16.msra.mxu3 %v5376_v18  ;;  %v5808_v18 = vld [vmem:[#allocation5 + $0x2b4] sm:$0xf0]  ;;  %v5312_v19 = vor.u32 %v5945_v3, %v5309_v5  ;;  %v4547_v20 = vld [vmem:[#allocation5 + $0x108] sm:$0xf] }
 0x137   :  { %3067 = vmatmul.bf16.vlgmr.msrb.gmra.mxu3 %v6346_v11  ;;  %v4707_v3 = vld [vmem:[#allocation5 + $0x248] sm:$0xf]  ;;  %v5796_v5 = vld [vmem:[#allocation5 + $0x254] sm:$0xf0] }
 0x138   :  { %3079 = vmatpush.bf16.msra.mxu0 %v4928_v41  ;;  %3103 = vmatpush.bf16.msra.mxu2 %v5216_v21  ;;  %v6370_v37 = vpop.f32.mrf.mxu0  ;;  %v4468_v41 = vor.u32 %v5736_v30, %v4467_v29  ;;  %v5756_v21 = vld [vmem:[#allocation5 + $0x114] sm:$0xf0]  ;;  %v4420_v30 = vor.u32 %v5724_v17, %v4419_v14  ;;  %v5123_v14 = vld [vmem:[#allocation5 + $0x588] sm:$0xf]  ;;  %v4708_v17 = vor.u32 %v5796_v5, %v4707_v3 }
 0x139   :  { %v5820_v3 = vld [vmem:[#allocation5 + $0x314] sm:$0xf0] }
 0x13a   :  { %3092 = vmatpush.bf16.msra.mxu1 %v5056_v48  ;;  %v5732_v48 = vld [vmem:[#allocation5 + $0x54] sm:$0xf0]  ;;  %3115 = vmatpush.bf16.msra.mxu3 %v5360_v31  ;;  %v6373_v55 = vpop.f32.mrf.mxu1  ;;  %v4756_v31 = vor.u32 %v5808_v18, %v4755_v23  ;;  %v4851_v23 = vld [vmem:[#allocation5 + $0x368] sm:$0xf] }
 0x13b   :  { %3080 = vmatmul.bf16.vlgmr.msra.gmra.mxu0 %v6351_v38  ;;  %v4452_v56 = vor.u32 %v5732_v48, %v4451_v45  ;;  %v4900_v45 = vor.u32 %v5844_v33, %v4899_v32  ;;  %v5155_v48 = vld [vmem:[#allocation5 + $0x5c8] sm:$0xf]  ;;  %v5832_v18 = vld [vmem:[#allocation5 + $0x374] sm:$0xf0] }
 0x13c   :  { %3124 = vmatpush.bf16.msrb.mxu0 %v4532_v49  ;;  %v4787_v49 = vld [vmem:[#allocation5 + $0x2e8] sm:$0xf]  ;;  %3104 = vmatpush.bf16.msra.mxu2 %v5200_v34  ;;  %v4548_v34 = vor.u32 %v5756_v21, %v4547_v20  ;;  %v5792_v20 = vld [vmem:[#allocation5 + $0x234] sm:$0xf0] }
 0x13d   :  { %3093 = vmatmul.bf16.vlgmr.msra.gmra.mxu1 %v6354_v10  ;;  %v4788_v57 = vor.u32 %v5816_v1, %v4787_v49  ;;  %v5908_v49 = vld [vmem:[#allocation5 + $0x5d4] sm:$0xf0]  ;;  %v4740_v1 = vor.u32 %v5804_v36, %v4739_v35 }
 0x13e   :  { %3137 = vmatpush.bf16.msrb.mxu1 %v4660_v51  ;;  %v5764_v51 = vld [vmem:[#allocation5 + $0x154] sm:$0xf0]  ;;  %3116 = vmatpush.bf16.msra.mxu3 %v5344_v50  ;;  %v6375_v15 = vpop.f32.mrf.mxu2  ;;  %v4883_v50 = vld [vmem:[#allocation5 + $0x3a8] sm:$0xf] }
 0x13f   :  { %v4580_v59 = vor.u32 %v5764_v51, %v4579_v4  ;;  %v5840_v4 = vld [vmem:[#allocation5 + $0x3b4] sm:$0xf0] }
 0x140   :  { %3125 = vmatpush.bf16.msrb.mxu0 %v4516_v60  ;;  %v5728_v60 = vld [vmem:[#allocation5 + $0x34] sm:$0xf0]  ;;  %3105 = vmatpush.bf16.msra.mxu2 %v5184_v52  ;;  %v1595_v7 = vpop.f32.mrf.mxu0  ;;  %v6378_v24 = vpop.f32.mrf.mxu3  ;;  %v4723_v52 = vld [vmem:[#allocation5 + $0x268] sm:$0xf] }
 0x141   :  { %v4436_v8 = vor.u32 %v5728_v60, %v4435_v58  ;;  %v5872_v60 = vld [vmem:[#allocation5 + $0x4b4] sm:$0xf0] }
 0x142   :  { %3138 = vmatpush.bf16.msrb.mxu1 %v4644_v63  ;;  %v5328_v63 = vor.u32 %v5949_v53, %v5325_v54  ;;  %v1608_v29 = vpop.f32.mrf.mxu1  ;;  %v5800_v53 = vld [vmem:[#allocation5 + $0x274] sm:$0xf0] }
 0x143   :  { %3106 = vmatmul.bf16.vlgmr.msra.gmra.mxu2 %v6361_v6  ;;  %v5896_v29 = vld [vmem:[#allocation5 + $0x574] sm:$0xf0] }
 0x144   :  { %3126 = vmatpush.bf16.msrb.mxu0 %v4500_v13  ;;  %3150 = vmatpush.bf16.msrb.mxu2 %v4788_v57  ;;  %v5848_v13 = vld [vmem:[#allocation5 + $0x3f4] sm:$0xf0]  ;;  %v5011_v57 = vld [vmem:[#allocation5 + $0x4a8] sm:$0xf] }
 0x145   :  { %3117 = vmatpush.bf16.msra.mxu3 %v5328_v63  ;;  %v4724_v63 = vor.u32 %v5800_v53, %v4723_v52  ;;  %v5012_v7 = vor.u32 %v5872_v60, %v5011_v57  ;;  %v5828_v32 = vld [vmem:[#allocation5 + $0x354] sm:$0xf0]  ;;  %v4819_v53 = vld [vmem:[#allocation5 + $0x328] sm:$0xf] }
 0x146   :  { %3139 = vmatpush.bf16.msrb.mxu1 %v4628_v16  ;;  %v4564_v16 = vor.u32 %v5760_v2, %v4563_v0  ;;  %v1621_v51 = vpop.f32.mrf.mxu2  ;;  %v4867_v0 = vld [vmem:[#allocation5 + $0x388] sm:$0xf]  ;;  %v5836_v2 = vld [vmem:[#allocation5 + $0x394] sm:$0xf0] }
 0x147   :  { %v5788_v35 = vld [vmem:[#allocation5 + $0x214] sm:$0xf0] }
 0x148   :  { %3127 = vmatpush.bf16.msrb.mxu0 %v4484_v25  ;;  %v4916_v25 = vor.u32 %v5848_v13, %v4915_v12  ;;  %3151 = vmatpush.bf16.msrb.mxu2 %v4772_v9  ;;  %v1634_v58 = vpop.f32.mrf.mxu3  ;;  %v4995_v9 = vld [vmem:[#allocation5 + $0x488] sm:$0xf]  ;;  %v4868_v12 = vor.u32 %v5836_v2, %v4867_v0  ;;  %v5868_v13 = vld [vmem:[#allocation5 + $0x494] sm:$0xf0] }
 0x149   :  { %3118 = vmatpush.bf16.msra.mxu3 %v5312_v19  ;;  %v4691_v19 = vld [vmem:[#allocation5 + $0x228] sm:$0xf]  ;;  %v4996_v21 = vor.u32 %v5868_v13, %v4995_v9  ;;  %v5940_v60 = vld [vmem:[#allocation5 + $0x6d4] sm:$0xf0] }
 0x14a   :  { %3140 = vmatpush.bf16.msrb.mxu1 %v4612_v28  ;;  %v5912_v28 = vld [vmem:[#allocation5 + $0x5f4] sm:$0xf0]  ;;  %v4947_v58 = vld [vmem:[#allocation5 + $0x428] sm:$0xf] }
 0x14b   :  { %v5172_v43 = vor.u32 %v5912_v28, %v5171_v27  ;;  %v5864_v27 = vld [vmem:[#allocation5 + $0x474] sm:$0xf0]  ;;  %v5107_v28 = vld [vmem:[#allocation5 + $0x568] sm:$0xf] }
 0x14c   :  { %3128 = vmatpush.bf16.msrb.mxu0 %v4468_v41  ;;  %v5044_v41 = vor.u32 %v5880_v26, %v5043_v22  ;;  %3152 = vmatpush.bf16.msrb.mxu2 %v4756_v31  ;;  %v4852_v26 = vor.u32 %v5832_v18, %v4851_v23  ;;  %v4835_v31 = vld [vmem:[#allocation5 + $0x348] sm:$0xf]  ;;  %v5888_v0 = vld [vmem:[#allocation5 + $0x534] sm:$0xf0] }
 0x14d   :  { %3163 = vmatpush.bf16.msrb.mxu3 %v4916_v25  ;;  %v4979_v25 = vld [vmem:[#allocation5 + $0x468] sm:$0xf]  ;;  %v5976_v9 = vld [vmem:[#allocation5 + $0x7f4] sm:$0xf0] }
 0x14e   :  { %3141 = vmatpush.bf16.msrb.mxu1 %v4596_v47  ;;  %v5876_v47 = vld [vmem:[#allocation5 + $0x4d4] sm:$0xf0]  ;;  %3119 = vmatmul.bf16.vlgmr.msra.gmra.mxu3 %v6364_v39  ;;  %v4803_v2 = vld [vmem:[#allocation5 + $0x308] sm:$0xf] }
 0x14f   :  { %v5028_v54 = vor.u32 %v5876_v47, %v5027_v44  ;;  %v5108_v44 = vor.u32 %v5896_v29, %v5107_v28  ;;  %v5299_v47 = vld [vmem:[#allocation5 + $0x6e8] sm:$0xf]  ;;  %v5936_v23 = vld [vmem:[#allocation5 + $0x6b4] sm:$0xf0]  ;;  %v4804_v18 = vor.u32 %v5820_v3, %v4803_v2  ;;  %v4661_v29 = vld [vmem:[#allocation5 + $0x1f8] sm:$0xf0] }
 0x150   :  { %3129 = vmatpush.bf16.msrb.mxu0 %v4452_v56  ;;  %v5156_v56 = vor.u32 %v5908_v49, %v5155_v48  ;;  %3153 = vmatpush.bf16.msrb.mxu2 %v4740_v1  ;;  %v5944_v48 = vld [vmem:[#allocation5 + $0x6f4] sm:$0xf0]  ;;  %v4836_v49 = vor.u32 %v5828_v32, %v4835_v31 }
 0x151   :  { %3164 = vmatpush.bf16.msrb.mxu3 %v4900_v45  ;;  %v4963_v45 = vld [vmem:[#allocation5 + $0x448] sm:$0xf]  ;;  %v5860_v1 = vld [vmem:[#allocation5 + $0x454] sm:$0xf0] }
 0x152   :  { %3142 = vmatpush.bf16.msrb.mxu1 %v4580_v59  ;;  %v4884_v59 = vor.u32 %v5840_v4, %v4883_v50  ;;  %v5091_v50 = vld [vmem:[#allocation5 + $0x548] sm:$0xf]  ;;  %v5892_v4 = vld [vmem:[#allocation5 + $0x554] sm:$0xf0] }
 0x153   :  { %v5092_v57 = vor.u32 %v5892_v4, %v5091_v50  ;;  %v5972_v31 = vld [vmem:[#allocation5 + $0x7d4] sm:$0xf0]  ;;  %v5235_v4 = vld [vmem:[#allocation5 + $0x668] sm:$0xf] }
 0x154   :  { %3130 = vmatpush.bf16.msrb.mxu0 %v4436_v8  ;;  %v5140_v8 = vor.u32 %v5904_v62, %v5139_v61  ;;  %3154 = vmatpush.bf16.msrb.mxu2 %v4724_v63  ;;  %v5856_v62 = vld [vmem:[#allocation5 + $0x434] sm:$0xf0]  ;;  %v5075_v63 = vld [vmem:[#allocation5 + $0x528] sm:$0xf] }
 0x155   :  { %3165 = vmatpush.bf16.msrb.mxu3 %v4884_v59  ;;  %v5283_v59 = vld [vmem:[#allocation5 + $0x6c8] sm:$0xf]  ;;  %v4948_v13 = vor.u32 %v5856_v62, %v4947_v58  ;;  %v5968_v50 = vld [vmem:[#allocation5 + $0x7b4] sm:$0xf0]  ;;  %v5774_v58 = vld [vmem:[#allocation5 + $0x1ac] sm:$0xf] }
 0x156   :  { %3143 = vmatpush.bf16.msrb.mxu1 %v4564_v16  ;;  %v5900_v16 = vld [vmem:[#allocation5 + $0x594] sm:$0xf0] }
 0x157   :  { %v5124_v22 = vor.u32 %v5900_v16, %v5123_v14  ;;  %v5076_v14 = vor.u32 %v5888_v0, %v5075_v63  ;;  %v4931_v16 = vld [vmem:[#allocation5 + $0x408] sm:$0xf]  ;;  %v5964_v62 = vld [vmem:[#allocation5 + $0x794] sm:$0xf0] }
 0x158   :  { %3131 = vmatpush.bf16.msrb.mxu0 %v4420_v30  ;;  %3155 = vmatpush.bf16.msrb.mxu2 %v4708_v17  ;;  %v4692_v30 = vor.u32 %v5792_v20, %v4691_v19  ;;  %v2925_v33 = vpop.f32.mrf.mxu0  ;;  %v5267_v17 = vld [vmem:[#allocation5 + $0x6a8] sm:$0xf]  ;;  %v5852_v19 = vld [vmem:[#allocation5 + $0x414] sm:$0xf0] }
 0x159   :  { %3166 = vmatpush.bf16.msrb.mxu3 %v4868_v12  ;;  %v2926_v36 = vadd.f32 %v2925_v33, %v6370_v37  ;;  %v5300_v37 = vor.u32 %v5944_v48, %v5299_v47  ;;  %v5059_v20 = vld [vmem:[#allocation5 + $0x508] sm:$0xf]  ;;  %v5268_v28 = vor.u32 %v5936_v23, %v5267_v17  ;;  %v4932_v32 = vor.u32 %v5852_v19, %v4931_v16  ;;  %v5778_v47 = vld [vmem:[#allocation5 + $0x1cc] sm:$0xf]  ;;  %v5924_v2 = vld [vmem:[#allocation5 + $0x654] sm:$0xf0] }
 0x15a   :  { %3144 = vmatpush.bf16.msrb.mxu1 %v4548_v34  ;;  %v4675_v34 = vld [vmem:[#allocation5 + $0x208] sm:$0xf]  ;;  %v4613_v16 = vld [vmem:[#allocation5 + $0x198] sm:$0xf0]  ;;  %v5960_v23 = vld [vmem:[#allocation5 + $0x774] sm:$0xf0] }
 0x15b   :  { %3132 = vmatmul.bf16.vlgmr.msrb.gmra.mxu0 %v6335_v40  ;;  %v4676_v52 = vor.u32 %v5788_v35, %v4675_v34  ;;  %v5251_v33 = vld [vmem:[#allocation5 + $0x688] sm:$0xf]  ;;  %v5932_v34 = vld [vmem:[#allocation5 + $0x694] sm:$0xf0] }
 0x15c   :  { %3176 = vmatpush.bf16.msra.mxu0 %v5044_v41  ;;  %v2938_v41 = vpop.f32.mrf.mxu1  ;;  %3156 = vmatpush.bf16.msrb.mxu2 %v4692_v30  ;;  %v5411_v30 = vld [vmem:[#allocation5 + $0x7c8] sm:$0xf]  ;;  %v5252_v48 = vor.u32 %v5932_v34, %v5251_v33  ;;  %v5920_v19 = vld [vmem:[#allocation5 + $0x634] sm:$0xf0] }
 0x15d   :  { %3145 = vmatmul.bf16.vlgmr.msrb.gmra.mxu1 %v6337_v46  ;;  %3167 = vmatpush.bf16.msrb.mxu3 %v4852_v26  ;;  %v6384_v51 = vadd.f32 %v2938_v41, %v2926_v36  ;;  %v4533_v26 = vld [vmem:[#allocation5 + $0xf8] sm:$0xf0]  ;;  %v5219_v0 = vld [vmem:[#allocation5 + $0x648] sm:$0xf]  ;;  %v5916_v33 = vld [vmem:[#allocation5 + $0x614] sm:$0xf0] }
 0x15e   :  { %3189 = vmatpush.bf16.msra.mxu1 %v5172_v43  ;;  %v4980_v43 = vor.u32 %v5864_v27, %v4979_v25  ;;  %v5750_v25 = vld [vmem:[#allocation5 + $0xec] sm:$0xf]  ;;  %v5363_v17 = vld [vmem:[#allocation5 + $0x768] sm:$0xf] }
 0x15f   :  { %v5782_v27 = vld [vmem:[#allocation5 + $0x1ec] sm:$0xf]  ;;  %v4536_v36 = vor.u32 %v5750_v25, %v4533_v26  ;;  %v4469_v25 = vld [vmem:[#allocation5 + $0x78] sm:$0xf0] }
 0x160   :  { %3177 = vmatpush.bf16.msra.mxu0 %v5028_v54  ;;  %v5824_v54 = vld [vmem:[#allocation5 + $0x334] sm:$0xf0]  ;;  %3157 = vmatpush.bf16.msrb.mxu2 %v4676_v52  ;;  %v2927_v5 = vpop.f32.mrf.mxu0  ;;  %v4664_v41 = vor.u32 %v5782_v27, %v4661_v29  ;;  %v5766_v26 = vld [vmem:[#allocation5 + $0x16c] sm:$0xf]  ;;  %v4597_v29 = vld [vmem:[#allocation5 + $0x178] sm:$0xf0] }
 0x161   :  { %3168 = vmatpush.bf16.msrb.mxu3 %v4836_v49  ;;  %v4820_v61 = vor.u32 %v5824_v54, %v4819_v53  ;;  %v4645_v49 = vld [vmem:[#allocation5 + $0x1d8] sm:$0xf0]  ;;  %v5928_v52 = vld [vmem:[#allocation5 + $0x674] sm:$0xf0] }
 0x162   :  { %3190 = vmatpush.bf16.msra.mxu1 %v5156_v56  ;;  %v4964_v56 = vor.u32 %v5860_v1, %v4963_v45  ;;  %v4517_v45 = vld [vmem:[#allocation5 + $0xd8] sm:$0xf0]  ;;  %v5395_v1 = vld [vmem:[#allocation5 + $0x7a8] sm:$0xf]  ;;  %v4648_v54 = vor.u32 %v5778_v47, %v4645_v49 }
 0x163   :  { %3158 = vmatmul.bf16.vlgmr.msrb.gmra.mxu2 %v6343_v42  ;;  %v4453_v47 = vld [vmem:[#allocation5 + $0x58] sm:$0xf0] }
 0x164   :  { %3178 = vmatpush.bf16.msra.mxu0 %v5012_v7  ;;  %3202 = vmatpush.bf16.msra.mxu2 %v5300_v37  ;;  %v5284_v7 = vor.u32 %v5940_v60, %v5283_v59  ;;  %v2940_v12 = vpop.f32.mrf.mxu1  ;;  %v5396_v37 = vor.u32 %v5968_v50, %v5395_v1  ;;  %v5236_v59 = vor.u32 %v5928_v52, %v5235_v4  ;;  %v4629_v60 = vld [vmem:[#allocation5 + $0x1b8] sm:$0xf0]  ;;  %v2951_v63 = vpop.f32.mrf.mxu2  ;;  %v5331_v50 = vld [vmem:[#allocation5 + $0x728] sm:$0xf]  ;;  %v5952_v4 = vld [vmem:[#allocation5 + $0x734] sm:$0xf0] }
 0x165   :  { %3169 = vmatpush.bf16.msrb.mxu3 %v4820_v61  ;;  %v5379_v61 = vld [vmem:[#allocation5 + $0x788] sm:$0xf]  ;;  %v6391_v3 = vadd.f32 %v2951_v63, %v6384_v51  ;;  %v4485_v12 = vld [vmem:[#allocation5 + $0x98] sm:$0xf0]  ;;  %v5948_v63 = vld [vmem:[#allocation5 + $0x714] sm:$0xf0] }
 0x166   :  { %3191 = vmatpush.bf16.msra.mxu1 %v5140_v8  ;;  %v5427_v8 = vld [vmem:[#allocation5 + $0x7e8] sm:$0xf]  ;;  %v4581_v1 = vld [vmem:[#allocation5 + $0x158] sm:$0xf0] }
 0x168   :  { %3179 = vmatpush.bf16.msra.mxu0 %v4996_v21  ;;  %v5884_v21 = vld [vmem:[#allocation5 + $0x514] sm:$0xf0]  ;;  %3203 = vmatpush.bf16.msra.mxu2 %v5284_v7  ;;  %v4632_v7 = vor.u32 %v5774_v58, %v4629_v60  ;;  %v5726_v58 = vld [vmem:[#allocation5 + $0x2c] sm:$0xf] }
 0x169   :  { %3170 = vmatpush.bf16.msrb.mxu3 %v4804_v18  ;;  %v5060_v35 = vor.u32 %v5884_v21, %v5059_v20  ;;  %v5203_v18 = vld [vmem:[#allocation5 + $0x628] sm:$0xf]  ;;  %v5364_v21 = vor.u32 %v5960_v23, %v5363_v17  ;;  %v5758_v60 = vld [vmem:[#allocation5 + $0x12c] sm:$0xf]  ;;  %v4421_v17 = vld [vmem:[#allocation5 + $0x18] sm:$0xf0] }
 0x16a   :  { %3192 = vmatpush.bf16.msra.mxu1 %v5124_v22  ;;  %v5428_v22 = vor.u32 %v5976_v9, %v5427_v8  ;;  %v5380_v8 = vor.u32 %v5964_v62, %v5379_v61  ;;  %v5738_v9 = vld [vmem:[#allocation5 + $0x8c] sm:$0xf]  ;;  %v4565_v61 = vld [vmem:[#allocation5 + $0x138] sm:$0xf0]  ;;  %v5315_v62 = vld [vmem:[#allocation5 + $0x708] sm:$0xf] }
 0x16b   :  { %v4488_v20 = vor.u32 %v5738_v9, %v4485_v12  ;;  %v5722_v9 = vld [vmem:[#allocation5 + $0xc] sm:$0xf] }
 0x16c   :  { %3180 = vmatpush.bf16.msra.mxu0 %v4980_v43  ;;  %v5412_v43 = vor.u32 %v5972_v31, %v5411_v30  ;;  %3204 = vmatpush.bf16.msra.mxu2 %v5268_v28  ;;  %v6393_v27 = vpop.f32.mrf.mxu3  ;;  %v5204_v28 = vor.u32 %v5920_v19, %v5203_v18  ;;  %v5347_v30 = vld [vmem:[#allocation5 + $0x748] sm:$0xf]  ;;  %v5956_v31 = vld [vmem:[#allocation5 + $0x754] sm:$0xf0]  ;;  %v2953_v34 = vpop.f32.mrf.mxu2  ;;  %v5806_v12 = vld [vmem:[#allocation5 + $0x2ac] sm:$0xf] }
 0x16d   :  { %3215 = vmatpush.bf16.msra.mxu3 %v5428_v22  ;;  %v5734_v22 = vld [vmem:[#allocation5 + $0x6c] sm:$0xf]  ;;  %v4549_v18 = vld [vmem:[#allocation5 + $0x118] sm:$0xf0] }
 0x16e   :  { %3193 = vmatpush.bf16.msra.mxu1 %v5108_v44  ;;  %v5746_v44 = vld [vmem:[#allocation5 + $0xcc] sm:$0xf]  ;;  %3171 = vmatmul.bf16.vlgmr.msrb.gmra.mxu3 %v6346_v11 }
 0x16f   :  { %v4520_v53 = vor.u32 %v5746_v44, %v4517_v45  ;;  %v5348_v44 = vor.u32 %v5956_v31, %v5347_v30  ;;  %v5730_v45 = vld [vmem:[#allocation5 + $0x4c] sm:$0xf]  ;;  %v4741_v31 = vld [vmem:[#allocation5 + $0x298] sm:$0xf0] }
 0x170   :  { %3181 = vmatpush.bf16.msra.mxu0 %v4964_v56  ;;  %v5742_v56 = vld [vmem:[#allocation5 + $0xac] sm:$0xf]  ;;  %3205 = vmatpush.bf16.msra.mxu2 %v5252_v48 }
 0x171   :  { %3216 = vmatpush.bf16.msra.mxu3 %v5412_v43  ;;  %v4600_v43 = vor.u32 %v5766_v26, %v4597_v29  ;;  %v5762_v48 = vld [vmem:[#allocation5 + $0x14c] sm:$0xf]  ;;  %v4424_v29 = vor.u32 %v5722_v9, %v4421_v17  ;;  %v4693_v17 = vld [vmem:[#allocation5 + $0x238] sm:$0xf0] }
 0x172   :  { %3194 = vmatpush.bf16.msra.mxu1 %v5092_v57  ;;  %v4501_v57 = vld [vmem:[#allocation5 + $0xb8] sm:$0xf0]  ;;  %v5754_v23 = vld [vmem:[#allocation5 + $0x10c] sm:$0xf] }
 0x173   :  { %v4504_v5 = vor.u32 %v5742_v56, %v4501_v57  ;;  %v4584_v56 = vor.u32 %v5762_v48, %v4581_v1  ;;  %v5332_v57 = vor.u32 %v5952_v4, %v5331_v50  ;;  %v5842_v26 = vld [vmem:[#allocation5 + $0x3cc] sm:$0xf]  ;;  %v4725_v50 = vld [vmem:[#allocation5 + $0x278] sm:$0xf0] }
 0x174   :  { %3182 = vmatpush.bf16.msra.mxu0 %v4948_v13  ;;  %v5770_v13 = vld [vmem:[#allocation5 + $0x18c] sm:$0xf]  ;;  %3206 = vmatpush.bf16.msra.mxu2 %v5236_v59  ;;  %v4437_v59 = vld [vmem:[#allocation5 + $0x38] sm:$0xf0] }
 0x175   :  { %3217 = vmatpush.bf16.msra.mxu3 %v5396_v37  ;;  %v4616_v51 = vor.u32 %v5770_v13, %v4613_v16  ;;  %v4773_v37 = vld [vmem:[#allocation5 + $0x2d8] sm:$0xf0]  ;;  %v5316_v16 = vor.u32 %v5948_v63, %v5315_v62  ;;  %v5802_v30 = vld [vmem:[#allocation5 + $0x28c] sm:$0xf] }
 0x176   :  { %3195 = vmatpush.bf16.msra.mxu1 %v5076_v14  ;;  %v5220_v14 = vor.u32 %v5924_v2, %v5219_v0  ;;  %v2966_v0 = vpop.f32.mrf.mxu3  ;;  %v4757_v13 = vld [vmem:[#allocation5 + $0x2b8] sm:$0xf0]  ;;  %v5838_v48 = vld [vmem:[#allocation5 + $0x3ac] sm:$0xf] }
 0x177   :  { %v5798_v1 = vld [vmem:[#allocation5 + $0x26c] sm:$0xf]  ;;  %v4709_v62 = vld [vmem:[#allocation5 + $0x258] sm:$0xf0] }
 0x178   :  { %3183 = vmatpush.bf16.msra.mxu0 %v4932_v32  ;;  %3207 = vmatpush.bf16.msra.mxu2 %v5220_v14  ;;  %v5187_v32 = vld [vmem:[#allocation5 + $0x608] sm:$0xf]  ;;  %v4568_v14 = vor.u32 %v5758_v60, %v4565_v61  ;;  %v4869_v60 = vld [vmem:[#allocation5 + $0x398] sm:$0xf0]  ;;  %v5794_v61 = vld [vmem:[#allocation5 + $0x24c] sm:$0xf] }
 0x179   :  { %3218 = vmatpush.bf16.msra.mxu3 %v5380_v8  ;;  %v5188_v49 = vor.u32 %v5916_v33, %v5187_v32  ;;  %v4440_v8 = vor.u32 %v5726_v58, %v4437_v59  ;;  %v4552_v32 = vor.u32 %v5754_v23, %v4549_v18  ;;  %v5141_v58 = vld [vmem:[#allocation5 + $0x5b8] sm:$0xf0]  ;;  %v5834_v59 = vld [vmem:[#allocation5 + $0x38c] sm:$0xf] }
 0x17a   :  { %3196 = vmatpush.bf16.msra.mxu1 %v5060_v35  ;;  %v4472_v35 = vor.u32 %v5734_v22, %v4469_v25  ;;  %v4760_v22 = vor.u32 %v5806_v12, %v4757_v13  ;;  %v5173_v25 = vld [vmem:[#allocation5 + $0x5f8] sm:$0xf0]  ;;  %v4712_v12 = vor.u32 %v5794_v61, %v4709_v62  ;;  %v5818_v61 = vld [vmem:[#allocation5 + $0x30c] sm:$0xf] }
 0x17b   :  { %3184 = vmatmul.bf16.vlgmr.msra.gmra.mxu0 %v6351_v38  ;;  %v5125_v13 = vld [vmem:[#allocation5 + $0x598] sm:$0xf0] }
 0x17c   :  { %3228 = vmatpush.bf16.msrb.mxu0 %v4536_v36  ;;  %v5814_v36 = vld [vmem:[#allocation5 + $0x2ec] sm:$0xf]  ;;  %3208 = vmatpush.bf16.msra.mxu2 %v5204_v28  ;;  %v4901_v28 = vld [vmem:[#allocation5 + $0x3d8] sm:$0xf0] }
 0x17d   :  { %3197 = vmatmul.bf16.vlgmr.msra.gmra.mxu1 %v6354_v10  ;;  %3219 = vmatpush.bf16.msra.mxu3 %v5364_v21  ;;  %v5910_v21 = vld [vmem:[#allocation5 + $0x5ec] sm:$0xf]  ;;  %v4805_v62 = vld [vmem:[#allocation5 + $0x318] sm:$0xf0] }
 0x17e   :  { %3241 = vmatpush.bf16.msrb.mxu1 %v4664_v41  ;;  %v4789_v41 = vld [vmem:[#allocation5 + $0x2f8] sm:$0xf0]  ;;  %v5176_v34 = vor.u32 %v5910_v21, %v5173_v25  ;;  %v5894_v21 = vld [vmem:[#allocation5 + $0x56c] sm:$0xf] }
 0x17f   :  { %v4792_v52 = vor.u32 %v5814_v36, %v4789_v41  ;;  %v5874_v36 = vld [vmem:[#allocation5 + $0x4cc] sm:$0xf]  ;;  %v5029_v41 = vld [vmem:[#allocation5 + $0x4d8] sm:$0xf0] }
 0x180   :  { %3229 = vmatpush.bf16.msrb.mxu0 %v4520_v53  ;;  %v4456_v53 = vor.u32 %v5730_v45, %v4453_v47  ;;  %3209 = vmatpush.bf16.msra.mxu2 %v5188_v49  ;;  %v4744_v45 = vor.u32 %v5802_v30, %v4741_v31  ;;  %v5157_v47 = vld [vmem:[#allocation5 + $0x5d8] sm:$0xf0]  ;;  %v5032_v4 = vor.u32 %v5874_v36, %v5029_v41  ;;  %v5858_v41 = vld [vmem:[#allocation5 + $0x44c] sm:$0xf] }
 0x181   :  { %3220 = vmatpush.bf16.msra.mxu3 %v5348_v44  ;;  %v6396_v44 = vpop.f32.mrf.mxu0  ;;  %v4885_v49 = vld [vmem:[#allocation5 + $0x3b8] sm:$0xf0] }
 0x182   :  { %3242 = vmatpush.bf16.msrb.mxu1 %v4648_v54  ;;  %v5810_v54 = vld [vmem:[#allocation5 + $0x2cc] sm:$0xf]  ;;  %v5109_v25 = vld [vmem:[#allocation5 + $0x578] sm:$0xf0] }
 0x183   :  { %v4776_v2 = vor.u32 %v5810_v54, %v4773_v37  ;;  %3210 = vmatmul.bf16.vlgmr.msra.gmra.mxu2 %v6361_v6  ;;  %v5870_v54 = vld [vmem:[#allocation5 + $0x4ac] sm:$0xf]  ;;  %v5013_v37 = vld [vmem:[#allocation5 + $0x4b8] sm:$0xf0] }
 0x184   :  { %3230 = vmatpush.bf16.msrb.mxu0 %v4504_v5  ;;  %3254 = vmatpush.bf16.msrb.mxu2 %v4792_v52  ;;  %v5846_v5 = vld [vmem:[#allocation5 + $0x3ec] sm:$0xf]  ;;  %v5016_v63 = vor.u32 %v5870_v54, %v5013_v37  ;;  %v4677_v30 = vld [vmem:[#allocation5 + $0x218] sm:$0xf0] }
 0x185   :  { %3221 = vmatpush.bf16.msra.mxu3 %v5332_v57  ;;  %v4728_v57 = vor.u32 %v5798_v1, %v4725_v50  ;;  %v5822_v1 = vld [vmem:[#allocation5 + $0x32c] sm:$0xf]  ;;  %v4821_v50 = vld [vmem:[#allocation5 + $0x338] sm:$0xf0] }
 0x186   :  { %3243 = vmatpush.bf16.msrb.mxu1 %v4632_v7  ;;  %v4917_v7 = vld [vmem:[#allocation5 + $0x3f8] sm:$0xf0] }
 0x187   :  { %v4920_v19 = vor.u32 %v5846_v5, %v4917_v7  ;;  %v4872_v5 = vor.u32 %v5834_v59, %v4869_v60  ;;  %v5866_v7 = vld [vmem:[#allocation5 + $0x48c] sm:$0xf]  ;;  %v5285_v54 = vld [vmem:[#allocation5 + $0x6d8] sm:$0xf0] }
 0x188   :  { %3231 = vmatpush.bf16.msrb.mxu0 %v4488_v20  ;;  %v5878_v20 = vld [vmem:[#allocation5 + $0x4ec] sm:$0xf]  ;;  %3255 = vmatpush.bf16.msrb.mxu2 %v4776_v2  ;;  %v5077_v60 = vld [vmem:[#allocation5 + $0x538] sm:$0xf0] }
 0x189   :  { %3222 = vmatpush.bf16.msra.mxu3 %v5316_v16  ;;  %v2979_v9 = vpop.f32.mrf.mxu0  ;;  %v4853_v16 = vld [vmem:[#allocation5 + $0x378] sm:$0xf0]  ;;  %v5886_v59 = vld [vmem:[#allocation5 + $0x52c] sm:$0xf] }
 0x18a   :  { %3244 = vmatpush.bf16.msrb.mxu1 %v4616_v51  ;;  %v5045_v51 = vld [vmem:[#allocation5 + $0x4f8] sm:$0xf0]  ;;  %v6401_v0 = vpop.f32.mrf.mxu1  ;;  %v5080_v9 = vor.u32 %v5886_v59, %v5077_v60  ;;  %v6021_v60 = vld [vmem:[#allocation8 + $0x60] sm:$0xff] }
 0x18b   :  { %v5048_v33 = vor.u32 %v5878_v20, %v5045_v51  ;;  %v5862_v20 = vld [vmem:[#allocation5 + $0x46c] sm:$0xf]  ;;  %v4981_v51 = vld [vmem:[#allocation5 + $0x478] sm:$0xf0] }
 0x18c   :  { %3232 = vmatpush.bf16.msrb.mxu0 %v4472_v35  ;;  %v4904_v35 = vor.u32 %v5842_v26, %v4901_v28  ;;  %3256 = vmatpush.bf16.msrb.mxu2 %v4760_v22  ;;  %v5826_v26 = vld [vmem:[#allocation5 + $0x34c] sm:$0xf]  ;;  %v4837_v28 = vld [vmem:[#allocation5 + $0x358] sm:$0xf0]  ;;  %v4984_v31 = vor.u32 %v5862_v20, %v4981_v51 }
 0x18d   :  { %3267 = vmatpush.bf16.msrb.mxu3 %v4920_v19  ;;  %v4840_v36 = vor.u32 %v5826_v26, %v4837_v28  ;;  %v5970_v20 = vld [vmem:[#allocation5 + $0x7cc] sm:$0xf]  ;;  %v5413_v51 = vld [vmem:[#allocation5 + $0x7d8] sm:$0xf0] }
 0x18e   :  { %3245 = vmatpush.bf16.msrb.mxu1 %v4600_v43  ;;  %v5906_v43 = vld [vmem:[#allocation5 + $0x5cc] sm:$0xf]  ;;  %3223 = vmatmul.bf16.vlgmr.msra.gmra.mxu3 %v6364_v39  ;;  %v6016_v28 = vld [vmem:[#allocation8 + $0x38] sm:$0xff] }
 0x18f   :  { %v5160_v52 = vor.u32 %v5906_v43, %v5157_v47  ;;  %v4965_v43 = vld [vmem:[#allocation5 + $0x458] sm:$0xf0] }
 0x190   :  { %3233 = vmatpush.bf16.msrb.mxu0 %v4456_v53  ;;  %v4888_v53 = vor.u32 %v5838_v48, %v4885_v49  ;;  %3257 = vmatpush.bf16.msrb.mxu2 %v4744_v45  ;;  %v5890_v45 = vld [vmem:[#allocation5 + $0x54c] sm:$0xf]  ;;  %v5093_v49 = vld [vmem:[#allocation5 + $0x558] sm:$0xf0] }
 0x191   :  { %3268 = vmatpush.bf16.msrb.mxu3 %v4904_v35  ;;  %v5112_v35 = vor.u32 %v5894_v21, %v5109_v25  ;;  %v5096_v37 = vor.u32 %v5890_v45, %v5093_v49  ;;  %v5253_v25 = vld [vmem:[#allocation5 + $0x698] sm:$0xf0] }
 0x192   :  { %3246 = vmatpush.bf16.msrb.mxu1 %v4584_v56  ;;  %v5902_v56 = vld [vmem:[#allocation5 + $0x5ac] sm:$0xf]  ;;  %v5381_v49 = vld [vmem:[#allocation5 + $0x798] sm:$0xf0] }
 0x193   :  { %v5144_v2 = vor.u32 %v5902_v56, %v5141_v58  ;;  %v4824_v56 = vor.u32 %v5822_v1, %v4821_v50  ;;  %v4949_v58 = vld [vmem:[#allocation5 + $0x438] sm:$0xf0] }
 0x194   :  { %3234 = vmatpush.bf16.msrb.mxu0 %v4440_v8  ;;  %v4997_v8 = vld [vmem:[#allocation5 + $0x498] sm:$0xf0]  ;;  %3258 = vmatpush.bf16.msrb.mxu2 %v4728_v57  ;;  %v5854_v57 = vld [vmem:[#allocation5 + $0x42c] sm:$0xf] }
 0x195   :  { %3269 = vmatpush.bf16.msrb.mxu3 %v4888_v53  ;;  %v5000_v23 = vor.u32 %v5866_v7, %v4997_v8  ;;  %v5938_v53 = vld [vmem:[#allocation5 + $0x6cc] sm:$0xf]  ;;  %v4952_v7 = vor.u32 %v5854_v57, %v4949_v58  ;;  %v5221_v1 = vld [vmem:[#allocation5 + $0x658] sm:$0xf0]  ;;  %v6013_v58 = vld [vmem:[#allocation8 + $0x20] sm:$0xff] }
 0x196   :  { %3247 = vmatpush.bf16.msrb.mxu1 %v4568_v14  ;;  %v5830_v14 = vld [vmem:[#allocation5 + $0x36c] sm:$0xf]  ;;  %v5205_v57 = vld [vmem:[#allocation5 + $0x638] sm:$0xf0] }
 0x197   :  { %v4856_v19 = vor.u32 %v5830_v14, %v4853_v16  ;;  %v5934_v8 = vld [vmem:[#allocation5 + $0x6ac] sm:$0xf]  ;;  %v4933_v14 = vld [vmem:[#allocation5 + $0x418] sm:$0xf0] }
 0x198   :  { %3235 = vmatpush.bf16.msrb.mxu0 %v4424_v29  ;;  %3259 = vmatpush.bf16.msrb.mxu2 %v4712_v12  ;;  %v5786_v29 = vld [vmem:[#allocation5 + $0x20c] sm:$0xf]  ;;  %v6403_v47 = vpop.f32.mrf.mxu0  ;;  %v4808_v12 = vor.u32 %v5818_v61, %v4805_v62 }
 0x199   :  { %3270 = vmatpush.bf16.msrb.mxu3 %v4872_v5  ;;  %v4680_v48 = vor.u32 %v5786_v29, %v4677_v30  ;;  %v5429_v5 = vld [vmem:[#allocation5 + $0x7f8] sm:$0xf0]  ;;  %v5416_v29 = vor.u32 %v5970_v20, %v5413_v51 }
 0x19a   :  { %3248 = vmatpush.bf16.msrb.mxu1 %v4552_v32  ;;  %v5942_v32 = vld [vmem:[#allocation5 + $0x6ec] sm:$0xf]  ;;  %v6024_v30 = vld [vmem:[#allocation8 + $0x78] sm:$0xff] }
 0x19b   :  { %3236 = vmatmul.bf16.vlgmr.msrb.gmra.mxu0 %v6335_v40  ;;  %v5898_v40 = vld [vmem:[#allocation5 + $0x58c] sm:$0xf] }
 0x19c   :  { %3280 = vmatpush.bf16.msra.mxu0 %v5048_v33  ;;  %v5128_v18 = vor.u32 %v5898_v40, %v5125_v13  ;;  %v5301_v33 = vld [vmem:[#allocation5 + $0x6f8] sm:$0xf0]  ;;  %v5850_v13 = vld [vmem:[#allocation5 + $0x40c] sm:$0xf] }
 0x19d   :  { %3249 = vmatmul.bf16.vlgmr.msrb.gmra.mxu1 %v6337_v46  ;;  %v5790_v46 = vld [vmem:[#allocation5 + $0x22c] sm:$0xf]  ;;  %3271 = vmatpush.bf16.msrb.mxu3 %v4856_v19  ;;  %v5269_v40 = vld [vmem:[#allocation5 + $0x6b8] sm:$0xf0]  ;;  %v4936_v21 = vor.u32 %v5850_v13, %v4933_v14 }
 0x19e   :  { %3293 = vmatpush.bf16.msra.mxu1 %v5176_v34  ;;  %v4696_v22 = vor.u32 %v5790_v46, %v4693_v17  ;;  %v2992_v34 = vpop.f32.mrf.mxu1  ;;  %v5272_v19 = vor.u32 %v5934_v8, %v5269_v40  ;;  %v5914_v40 = vld [vmem:[#allocation5 + $0x60c] sm:$0xf]  ;;  %v6012_v13 = vld [vmem:[#allocation8 + $0x18] sm:$0xff] }
 0x19f   :  { %v5237_v34 = vld [vmem:[#allocation5 + $0x678] sm:$0xf0] }
 0x1a0   :  { %3281 = vmatpush.bf16.msra.mxu0 %v5032_v4  ;;  %3260 = vmatpush.bf16.msrb.mxu2 %v4696_v22  ;;  %v5304_v4 = vor.u32 %v5942_v32, %v5301_v33  ;;  %v3031_v46 = vpop.f32.mrf.mxu0  ;;  %v5930_v22 = vld [vmem:[#allocation5 + $0x68c] sm:$0xf]  ;;  %v5397_v32 = vld [vmem:[#allocation5 + $0x7b8] sm:$0xf0] }
 0x1a1   :  { %3272 = vmatpush.bf16.msrb.mxu3 %v4840_v36  ;;  %v5926_v33 = vld [vmem:[#allocation5 + $0x66c] sm:$0xf]  ;;  %v6020_v14 = vld [vmem:[#allocation8 + $0x58] sm:$0xff]  ;;  %v6420_v46 = vld [vmem:[%s6449_s6] sm:$0xf] }
 0x1a2   :  { %3294 = vmatpush.bf16.msra.mxu1 %v5160_v52  ;;  %v4968_v52 = vor.u32 %v5858_v41, %v4965_v43  ;;  %v6023_v43 = vld [vmem:[#allocation8 + $0x70] sm:$0xff]  ;;  %v5240_v45 = vor.u32 %v5926_v33, %v5237_v34  ;;  %v3334_v51 = vperm.slane %v6420_v46, 0  ;;  %v6018_v33 = vld [vmem:[#allocation8 + $0x48] sm:$0xff]  ;;  %v6009_v34 = vld [vmem:[#allocation8] sm:$0xff] }
 0x1a4   :  { %3282 = vmatpush.bf16.msra.mxu0 %v5016_v63  ;;  %3261 = vmatpush.bf16.msrb.mxu2 %v4680_v48  ;;  %v5288_v63 = vor.u32 %v5938_v53, %v5285_v54  ;;  %v5962_v48 = vld [vmem:[#allocation5 + $0x78c] sm:$0xf]  ;;  %v3003_v50 = vpop.f32.mrf.mxu2 }
 0x1a5   :  { %3273 = vmatpush.bf16.msrb.mxu3 %v4824_v56  ;;  %v6022_v53 = vld [vmem:[#allocation8 + $0x68] sm:$0xff]  ;;  %v5365_v56 = vld [vmem:[#allocation5 + $0x778] sm:$0xf0] }
 0x1a6   :  { %3295 = vmatpush.bf16.msra.mxu1 %v5144_v2  ;;  %v5974_v2 = vld [vmem:[#allocation5 + $0x7ec] sm:$0xf]  ;;  %v6405_v16 = vpop.f32.mrf.mxu1 }
 0x1a7   :  { %3262 = vmatmul.bf16.vlgmr.msrb.gmra.mxu2 %v6343_v42  ;;  %v5432_v17 = vor.u32 %v5974_v2, %v5429_v5  ;;  %v5256_v42 = vor.u32 %v5930_v22, %v5253_v25  ;;  %v5349_v2 = vld [vmem:[#allocation5 + $0x758] sm:$0xf0]  ;;  %v5946_v22 = vld [vmem:[#allocation5 + $0x70c] sm:$0xf] }
 0x1a8   :  { %3283 = vmatpush.bf16.msra.mxu0 %v5000_v23  ;;  %3306 = vmatpush.bf16.msra.mxu2 %v5304_v4  ;;  %v5882_v23 = vld [vmem:[#allocation5 + $0x50c] sm:$0xf]  ;;  %v5317_v25 = vld [vmem:[#allocation5 + $0x718] sm:$0xf0] }
 0x1a9   :  { %3274 = vmatpush.bf16.msrb.mxu3 %v4808_v12  ;;  %v6014_v4 = vld [vmem:[#allocation8 + $0x28] sm:$0xff] }
 0x1aa   :  { %3296 = vmatpush.bf16.msra.mxu1 %v5128_v18  ;;  %v5061_v18 = vld [vmem:[#allocation5 + $0x518] sm:$0xf0]  ;;  %v3016_v8 = vpop.f32.mrf.mxu3 }
 0x1ab   :  { %v5064_v26 = vor.u32 %v5882_v23, %v5061_v18  ;;  %v5333_v23 = vld [vmem:[#allocation5 + $0x738] sm:$0xf0] }
 0x1ac   :  { %3284 = vmatpush.bf16.msra.mxu0 %v4984_v31  ;;  %3307 = vmatpush.bf16.msra.mxu2 %v5288_v63  ;;  %v5966_v31 = vld [vmem:[#allocation5 + $0x7ac] sm:$0xf]  ;;  %v3005_v12 = vpop.f32.mrf.mxu2 }
 0x1ad   :  { %3319 = vmatpush.bf16.msra.mxu3 %v5432_v17  ;;  %v5400_v41 = vor.u32 %v5966_v31, %v5397_v32  ;;  %v5954_v63 = vld [vmem:[#allocation5 + $0x74c] sm:$0xf]  ;;  %v5320_v32 = vor.u32 %v5946_v22, %v5317_v25 }
 0x1ae   :  { %3297 = vmatpush.bf16.msra.mxu1 %v5112_v35  ;;  %3275 = vmatmul.bf16.vlgmr.msrb.gmra.mxu3 %v6346_v11  ;;  %v6015_v35 = vld [vmem:[#allocation8 + $0x30] sm:$0xff]  ;;  %v3044_v36 = vpop.f32.mrf.mxu1  ;;  %v5922_v11 = vld [vmem:[#allocation5 + $0x64c] sm:$0xf] }
 0x1af   :  { %v5224_v54 = vor.u32 %v5922_v11, %v5221_v1  ;;  %v5950_v17 = vld [vmem:[#allocation5 + $0x72c] sm:$0xf]  ;;  %v3030_v36 = vadd.f32 %v6403_v47, %v6373_v55 }
 0x1b0   :  { %3285 = vmatpush.bf16.msra.mxu0 %v4968_v52  ;;  %3308 = vmatpush.bf16.msra.mxu2 %v5272_v19  ;;  %v5384_v52 = vor.u32 %v5962_v48, %v5381_v49  ;;  %v6011_v19 = vld [vmem:[#allocation8 + $0x10] sm:$0xff] }
 0x1b1   :  { %3320 = vmatpush.bf16.msra.mxu3 %v5416_v29 }
 0x1b2   :  { %3298 = vmatpush.bf16.msra.mxu1 %v5096_v37  ;;  %v5958_v37 = vld [vmem:[#allocation5 + $0x76c] sm:$0xf]  ;;  %v3018_v29 = vpop.f32.mrf.mxu3 }
 0x1b3   :  { %v5368_v59 = vor.u32 %v5958_v37, %v5365_v56 }
 0x1b4   :  { %3286 = vmatpush.bf16.msra.mxu0 %v4952_v7  ;;  %3309 = vmatpush.bf16.msra.mxu2 %v5256_v42  ;;  %v6010_v42 = vld [vmem:[#allocation8 + $0x8] sm:$0xff] }
 0x1b5   :  { %3321 = vmatpush.bf16.msra.mxu3 %v5400_v41  ;;  %v6017_v41 = vld [vmem:[#allocation8 + $0x40] sm:$0xff] }
 0x1b6   :  { %3299 = vmatpush.bf16.msra.mxu1 %v5080_v9  ;;  %v5189_v9 = vld [vmem:[#allocation5 + $0x618] sm:$0xf0] }
 0x1b8   :  { %3287 = vmatpush.bf16.msra.mxu0 %v4936_v21  ;;  %3310 = vmatpush.bf16.msra.mxu2 %v5240_v45  ;;  %v6413_v61 = vpop.f32.mrf.mxu0  ;;  %v3043_v45 = vadd.f32 %v6405_v16, %v3030_v36 }
 0x1b9   :  { %3322 = vmatpush.bf16.msra.mxu3 %v5384_v52 }
 0x1ba   :  { %3300 = vmatpush.bf16.msra.mxu1 %v5064_v26  ;;  %v3094_v7 = vpop.f32.mrf.mxu1  ;;  %v6019_v26 = vld [vmem:[#allocation8 + $0x50] sm:$0xff] }
 0x1bb   :  { %3288 = vmatmul.bf16.vlgmr.msra.gmra.mxu0 %v6351_v38  ;;  %v5918_v38 = vld [vmem:[#allocation5 + $0x62c] sm:$0xf] }
 0x1bc   :  { %3614 = vmatpush.bf16.msrb.mxu0 %v6016_v28  ;;  %3311 = vmatpush.bf16.msra.mxu2 %v5224_v54  ;;  %v5208_v62 = vor.u32 %v5918_v38, %v5205_v57  ;;  %v3335_v54 = vperm.slane %v6420_v46, 1  ;;  %v6032_v38 = vld [vmem:[#allocation8 + $0xb8] sm:$0xff] }
 0x1bd   :  { %3301 = vmatmul.bf16.vlgmr.msra.gmra.mxu1 %v6354_v10  ;;  %v2965_v10 = vadd.f32 %v6393_v27, %v6391_v3  ;;  %3323 = vmatpush.bf16.msra.mxu3 %v5368_v59  ;;  %v5352_v27 = vor.u32 %v5954_v63, %v5349_v2  ;;  %v6031_v59 = vld [vmem:[#allocation8 + $0xb0] sm:$0xff]  ;;  %v6029_v63 = vld [vmem:[#allocation8 + $0xa0] sm:$0xff]  ;;  %v6028_v2 = vld [vmem:[#allocation8 + $0x98] sm:$0xff] }
 0x1be   :  { %3627 = vmatpush.bf16.msrb.mxu1 %v6024_v30  ;;  %v3055_v30 = vpop.f32.mrf.mxu2 }
 0x1bf   :  { %v2978_v5 = vadd.f32 %v6396_v44, %v2965_v10  ;;  %v5192_v44 = vor.u32 %v5914_v40, %v5189_v9  ;;  %v3056_v49 = vadd.f32 %v3055_v30, %v3043_v45  ;;  %v6026_v9 = vld [vmem:[#allocation8 + $0x88] sm:$0xff]  ;;  %v6036_v45 = vld [vmem:[#allocation8 + $0xd8] sm:$0xff] }
 0x1c0   :  { %3615 = vmatpush.bf16.msrb.mxu0 %v6015_v35  ;;  %3312 = vmatpush.bf16.msra.mxu2 %v5208_v62  ;;  %v3083_v21 = vpop.f32.mrf.mxu0 }
 0x1c1   :  { %v2991_v3 = vadd.f32 %v6401_v0, %v2978_v5  ;;  %3324 = vmatpush.bf16.msra.mxu3 %v5352_v27  ;;  %v5336_v0 = vor.u32 %v5950_v17, %v5333_v23 }
 0x1c2   :  { %3628 = vmatpush.bf16.msrb.mxu1 %v6023_v43  ;;  %v3096_v28 = vpop.f32.mrf.mxu1  ;;  %v3068_v43 = vpop.f32.mrf.mxu3 }
 0x1c3   :  { %v3004_v18 = vadd.f32 %v3003_v50, %v2991_v3  ;;  %v3069_v11 = vadd.f32 %v3068_v43, %v3056_v49  ;;  %v6025_v3 = vld [vmem:[#allocation8 + $0x80] sm:$0xff] }
 0x1c4   :  { %3616 = vmatpush.bf16.msrb.mxu0 %v6014_v4  ;;  %3313 = vmatpush.bf16.msra.mxu2 %v5192_v44  ;;  %v6037_v43 = vld [vmem:[#allocation8 + $0xe0] sm:$0xff] }
 0x1c5   :  { %v3017_v20 = vadd.f32 %v3016_v8, %v3004_v18  ;;  %3325 = vmatpush.bf16.msra.mxu3 %v5336_v0  ;;  %v3082_v50 = vadd.f32 %v6413_v61, %v3069_v11  ;;  %v6030_v61 = vld [vmem:[#allocation8 + $0xa8] sm:$0xff] }
 0x1c6   :  { %3629 = vmatpush.bf16.msrb.mxu1 %v6022_v53  ;;  %v3057_v48 = vpop.f32.mrf.mxu2 }
 0x1c7   :  { %v3342_v31 = vadd.f32 %v3334_v51, %v3017_v20  ;;  %3314 = vmatmul.bf16.vlgmr.msra.gmra.mxu2 %v6361_v6  ;;  %v3095_v55 = vadd.f32 %v3094_v7, %v3082_v50  ;;  %v6027_v7 = vld [vmem:[#allocation8 + $0x90] sm:$0xff] }
 0x1c8   :  { %3617 = vmatpush.bf16.msrb.mxu0 %v6013_v58  ;;  %3640 = vmatpush.bf16.msrb.mxu2 %v6032_v38 }
 0x1c9   :  { %v3346_v35 = vmax.f32 %v3342_v31, 0.0  ;;  %3326 = vmatpush.bf16.msra.mxu3 %v5320_v32  ;;  %v6040_v31 = vld [vmem:[#allocation8 + $0xf8] sm:$0xff] }
 0x1ca   :  { %3630 = vmatpush.bf16.msrb.mxu1 %v6021_v60  ;;  %v3070_v1 = vpop.f32.mrf.mxu3 }
 0x1cb   :  { %v3350_v6 = vpack.c.bf16 %v3346_v35, %v3346_v35  ;;  %v6034_v1 = vld [vmem:[#allocation8 + $0xc8] sm:$0xff] }
 0x1cc   :  { %3618 = vmatpush.bf16.msrb.mxu0 %v6012_v13  ;;  %3327 = vmatmul.bf16.vlgmr.msra.gmra.mxu3 %v6364_v39 }
 0x1cd   :  { %3641 = vmatpush.bf16.msrb.mxu2 %v6031_v59  ;;  %3653 = vmatpush.bf16.msrb.mxu3 %v6040_v31  ;;  %v3337_v59 = vperm.slane %v6420_v46, 3 }
 0x1ce   :  { %3631 = vmatpush.bf16.msrb.mxu1 %v6020_v14  ;;  %v3107_v4 = vpop.f32.mrf.mxu2 }
 0x1cf   :  { %v3108_v53 = vadd.f32 %v3107_v4, %v3095_v55 }
 0x1d0   :  { %3619 = vmatpush.bf16.msrb.mxu0 %v6011_v19 }
 0x1d1   :  { %3642 = vmatpush.bf16.msrb.mxu2 %v6030_v61 }
 0x1d2   :  { %3632 = vmatpush.bf16.msrb.mxu1 %v6019_v26  ;;  %v3120_v16 = vpop.f32.mrf.mxu3  ;;  %v3336_v26 = vperm.slane %v6420_v46, 2  ;;  %v6047_v46 = vld [vmem:[#allocation10 + $0x30] sm:$0xff] }
 0x1d3   :  { %v3121_v37 = vadd.f32 %v3120_v16, %v3108_v53 }
 0x1d4   :  { %3620 = vmatpush.bf16.msrb.mxu0 %v6010_v42 }
 0x1d5   :  { %v3343_v56 = vadd.f32 %v3335_v54, %v3121_v37  ;;  %3643 = vmatpush.bf16.msrb.mxu2 %v6029_v63 }
 0x1d6   :  { %3633 = vmatpush.bf16.msrb.mxu1 %v6018_v33  ;;  %v3109_v39 = vpop.f32.mrf.mxu2 }
 0x1d7   :  { %v3347_v58 = vmax.f32 %v3343_v56, 0.0 }
 0x1d8   :  { %3621 = vmatpush.bf16.msrb.mxu0 %v6009_v34  ;;  %v3133_v52 = vpop.f32.mrf.mxu0 }
 0x1d9   :  { %v3351_v60 = vpack.c.bf16 %v3347_v58, %v3347_v58  ;;  %3644 = vmatpush.bf16.msrb.mxu2 %v6028_v2  ;;  %v3134_v17 = vadd.f32 %v3133_v52, %v6375_v15  ;;  %v6039_v15 = vld [vmem:[#allocation8 + $0xf0] sm:$0xff]  ;;  %v6033_v52 = vld [vmem:[#allocation8 + $0xc0] sm:$0xff] }
 0x1da   :  { %3634 = vmatpush.bf16.msrb.mxu1 %v6017_v41  ;;  %v3146_v47 = vpop.f32.mrf.mxu1  ;;  %v3122_v62 = vpop.f32.mrf.mxu3  ;;  %3654 = vmatpush.bf16.msrb.mxu3 %v6039_v15  ;;  %v6038_v41 = vld [vmem:[#allocation8 + $0xe8] sm:$0xff] }
 0x1db   :  { %3622 = vmatmul.bf16.vlgmr.msrb.gmra.mxu0 %v3350_v6  ;;  %v3147_v23 = vadd.f32 %v3146_v47, %v3134_v17  ;;  %v6035_v6 = vld [vmem:[#allocation8 + $0xd0] sm:$0xff] }
 0x1dc   :  { %v6043_v17 = vld [vmem:[#allocation10 + $0x10] sm:$0xff] }
 0x1dd   :  { %3635 = vmatmul.bf16.vlgmr.msrb.gmra.mxu1 %v3351_v60  ;;  %3645 = vmatpush.bf16.msrb.mxu2 %v6027_v7 }
 0x1de   :  { %3655 = vmatpush.bf16.msrb.mxu3 %v6038_v41 }
 0x1e0   :  { %v3135_v57 = vpop.f32.mrf.mxu0 }
 0x1e1   :  { %3646 = vmatpush.bf16.msrb.mxu2 %v6026_v9 }
 0x1e2   :  { %v3148_v10 = vpop.f32.mrf.mxu1  ;;  %3656 = vmatpush.bf16.msrb.mxu3 %v6037_v43 }
 0x1e5   :  { %3647 = vmatpush.bf16.msrb.mxu2 %v6025_v3  ;;  %v6048_v3 = vld [vmem:[#allocation10 + $0x38] sm:$0xff] }
 0x1e6   :  { %v3159_v5 = vpop.f32.mrf.mxu2  ;;  %3657 = vmatpush.bf16.msrb.mxu3 %v6036_v45  ;;  %3736 = vmatpush.bf16.msra.mxu0 %v6048_v3 }
 0x1e7   :  { %v3160_v18 = vadd.f32 %v3159_v5, %v3147_v23 }
 0x1ea   :  { %3658 = vmatpush.bf16.msrb.mxu3 %v6035_v6  ;;  %3737 = vmatpush.bf16.msra.mxu0 %v6047_v46 }
 0x1ee   :  { %v3161_v13 = vpop.f32.mrf.mxu2  ;;  %3659 = vmatpush.bf16.msrb.mxu3 %v6034_v1 }
 0x1f1   :  { %v3172_v12 = vpop.f32.mrf.mxu3 }
 0x1f2   :  { %v3173_v19 = vadd.f32 %v3172_v12, %v3160_v18  ;;  %3660 = vmatpush.bf16.msrb.mxu3 %v6033_v52 }
 0x1f8   :  { %v3185_v8 = vpop.f32.mrf.mxu0 }
 0x1f9   :  { %v3174_v44 = vpop.f32.mrf.mxu3  ;;  %v3186_v20 = vadd.f32 %v3185_v8, %v3173_v19  ;;  %v6042_v19 = vld [vmem:[#allocation10 + $0x8] sm:$0xff] }
 0x1fa   :  { %v3198_v40 = vpop.f32.mrf.mxu1  ;;  %v6044_v44 = vld [vmem:[#allocation10 + $0x18] sm:$0xff] }
 0x1fb   :  { %v3199_v0 = vadd.f32 %v3198_v40, %v3186_v20  ;;  %v6041_v20 = vld [vmem:[#allocation10] sm:$0xff] }
 0x200   :  { %v3187_v27 = vpop.f32.mrf.mxu0 }
 0x201   :  { %v6046_v27 = vld [vmem:[#allocation10 + $0x28] sm:$0xff] }
 0x202   :  { %v3200_v14 = vpop.f32.mrf.mxu1  ;;  %3738 = vmatpush.bf16.msra.mxu0 %v6046_v27 }
 0x203   :  { %v6045_v14 = vld [vmem:[#allocation10 + $0x20] sm:$0xff] }
 0x206   :  { %v3211_v51 = vpop.f32.mrf.mxu2  ;;  %3739 = vmatpush.bf16.msra.mxu0 %v6045_v14 }
 0x207   :  { %v3212_v25 = vadd.f32 %v3211_v51, %v3199_v0 }
 0x20a   :  { %3740 = vmatpush.bf16.msra.mxu0 %v6044_v44 }
 0x20e   :  { %v3213_v30 = vpop.f32.mrf.mxu2  ;;  %3741 = vmatpush.bf16.msra.mxu0 %v6043_v17 }
 0x211   :  { %v3224_v28 = vpop.f32.mrf.mxu3 }
 0x212   :  { %v3225_v29 = vadd.f32 %v3224_v28, %v3212_v25  ;;  %3742 = vmatpush.bf16.msra.mxu0 %v6042_v19  ;;  %v6062_v28 = vld [vmem:[%s6453_s10] ss:$0 sm:$0xff] }
 0x214   :  { %v3344_v42 = vadd.f32 %v3336_v26, %v3225_v29 }
 0x216   :  { %v3348_v32 = vmax.f32 %v3344_v42, 0.0  ;;  %3743 = vmatpush.bf16.msra.mxu0 %v6041_v20 }
 0x218   :  { %v3237_v21 = vpop.f32.mrf.mxu0  ;;  %v3352_v35 = vpack.c.bf16 %v3348_v32, %v3348_v32 }
 0x219   :  { %v3226_v36 = vpop.f32.mrf.mxu3  ;;  %v3238_v54 = vadd.f32 %v3237_v21, %v6378_v24  ;;  %v6061_v24 = vld [vmem:[%s6451_s8] ss:$0 sm:$0xff] }
 0x21a   :  { %v3250_v22 = vpop.f32.mrf.mxu1  ;;  %3648 = vmatmul.bf16.vlgmr.msrb.gmra.mxu2 %v3352_v35 }
 0x21b   :  { %v3251_v16 = vadd.f32 %v3250_v22, %v3238_v54 }
 0x220   :  { %v3239_v33 = vpop.f32.mrf.mxu0 }
 0x222   :  { %v3252_v34 = vpop.f32.mrf.mxu1 }
 0x22a   :  { %v3263_v48 = vpop.f32.mrf.mxu2 }
 0x22b   :  { %v3264_v37 = vadd.f32 %v3263_v48, %v3251_v16 }
 0x231   :  { %v3276_v50 = vpop.f32.mrf.mxu3 }
 0x232   :  { %v3265_v4 = vpop.f32.mrf.mxu2  ;;  %v3277_v39 = vadd.f32 %v3276_v50, %v3264_v37 }
 0x238   :  { %v3289_v49 = vpop.f32.mrf.mxu0 }
 0x239   :  { %v3278_v53 = vpop.f32.mrf.mxu3  ;;  %v3290_v56 = vadd.f32 %v3289_v49, %v3277_v39 }
 0x23a   :  { %v3302_v11 = vpop.f32.mrf.mxu1 }
 0x23b   :  { %v3303_v57 = vadd.f32 %v3302_v11, %v3290_v56 }
 0x240   :  { %v3291_v55 = vpop.f32.mrf.mxu0 }
 0x242   :  { %v3304_v47 = vpop.f32.mrf.mxu1 }
 0x24a   :  { %v3315_v38 = vpop.f32.mrf.mxu2 }
 0x24b   :  { %v3316_v10 = vadd.f32 %v3315_v38, %v3303_v57 }
 0x24f   :  { %v3328_v60 = vpop.f32.mrf.mxu3 }
 0x250   :  { %v3329_v62 = vadd.f32 %v3328_v60, %v3316_v10 }
 0x252   :  { %v3317_v61 = vpop.f32.mrf.mxu2  ;;  %v3345_v63 = vadd.f32 %v3337_v59, %v3329_v62 }
 0x254   :  { %v3349_v2 = vmax.f32 %v3345_v63, 0.0 }
 0x256   :  { %v3353_v7 = vpack.c.bf16 %v3349_v2, %v3349_v2 }
 0x257   :  { %v3330_v8 = vpop.f32.mrf.mxu3 }
 0x258   :  { %v3623_v58 = vpop.f32.mrf.mxu0  ;;  %3661 = vmatmul.bf16.vlgmr.msrb.gmra.mxu3 %v3353_v7 }
 0x259   :  { %v3624_v40 = vadd.f32 %v6061_v24, %v3623_v58 }
 0x25a   :  { %v3636_v9 = vpop.f32.mrf.mxu1 }
 0x25b   :  { %v3637_v12 = vadd.f32 %v3636_v9, %v3624_v40 }
 0x260   :  { %v3625_v5 = vpop.f32.mrf.mxu0 }
 0x262   :  { %v3638_v13 = vpop.f32.mrf.mxu1 }
 0x29d   :  { %v3649_v23 = vpop.f32.mrf.mxu2 }
 0x29e   :  { %v3650_v51 = vadd.f32 %v3649_v23, %v3637_v12 }
 0x2a5   :  { %v3651_v18 = vpop.f32.mrf.mxu2 }
 0x2db   :  { %v3662_v0 = vpop.f32.mrf.mxu3 }
 0x2dc   :  { %v3663_v21 = vadd.f32 %v3662_v0, %v3650_v51 }
 0x2de   :  { %v3666_v22 = vmax.f32 %v3663_v21, 0.0 }
 0x2e0   :  { %v3667_v25 = vpack.c.bf16 %v3666_v22, %v3666_v22 }
 0x2e2   :  { %3744 = vmatmul.bf16.vlgmr.msra.gmra.mxu0 %v3667_v25 }
 0x2e3   :  { %v3664_v26 = vpop.f32.mrf.mxu3 }
 0x35f   :  { %v3745_v29 = vpop.f32.mrf.mxu0 }
 0x360   :  { %v3746_v30 = vadd.f32 %v6062_v28, %v3745_v29 }
 0x362   :  { %3749 = vst [vmem:[#allocation11] sm:$0xff] %v3746_v30 }
 0x363   :  { %3760 = dma.vmem_to_hbm [thread:$0]  %s3756_s12, 128, %s3758_s15, [#allocation4]  }
 0x367   :  { %v3747_v42 = vpop.f32.mrf.mxu0 }
 0x368   :  { %6213 = dma.done.wait [#allocation4], 128  }
 0x369   :  { %6214 = vsyncadd [#allocation4], 4294967168 }
 0x36a   :  { %3765 = vsyncpa [#allocation3], 1 }
 0x36b   :  { %3766 = vsyncpa [#allocation6], 1 }
 0x36c   :  { %3767 = vsyncpa [#allocation9], 1 }
 0x36d   :  { %3768 = vsyncpa [#allocation4], 1 }

</bundles_post_ra>
